<compile_context>
chip_gen: v5e
topology: v5e:2x2
jax: 0.10.0
libtpu: 0.0.40
codegen_flags: <defaults>
</compile_context>

<pallas_src>
import jax
import jax.numpy as jnp
import numpy as np
from jax.experimental import pallas as pl
from jax.experimental.pallas import tpu as pltpu


# ------------------------------ Pallas kernel --------------------------------

def _make_asff2_kernel(H, W, C1, C, CC, C2):
    """Build the fused per-image kernel for static spatial/channel sizes."""
    Wp = W + 1                     # widened row length (one scratch column)
    M = H * Wp                     # flattened spatial extent per image
    # Flat halo buffer for the expand conv: the fused interior sits at a
    # 16-sublane aligned offset >= Wp+1; tap (dy, dx) then reads the buffer at
    # row offset  base + dy*Wp + dx  for every flattened output position.
    interior = -(-(Wp + 1) // 16) * 16
    base = interior - (Wp + 1)
    NB = -(-(base + 2 * Wp + 2 + M) // 8) * 8

    # stride-2 conv: tap t = 3*dy + dx -> (parity slab index, row offset);
    # slab order: 0=even/even 1=even/odd 2=odd/even 3=odd/odd (row, col).
    stride_taps = ((0, 0), (1, 0), (0, 1),
                   (2, 0), (3, 0), (2, 1),
                   (0, Wp), (1, Wp), (0, Wp + 1))

    def kernel(x0_ref, pee_ref, peo_ref, poe_ref, poo_ref, mask_ref,
               ws_ref, bs_ref, w0_ref, b0_ref, w1_ref, b1_ref,
               wlt_ref, bl_ref, we_ref, be_ref, o_ref, fbuf_ref):
        f32 = jnp.float32
        bf16 = jnp.bfloat16
        parity = (pee_ref, peo_ref, poe_ref, poo_ref)

        # ---- stride_level_1: 3x3 / stride-2 Conv+BN+SiLU as 9 shifted matmuls
        acc = jnp.zeros((M, C), f32)
        for t, (p, off) in enumerate(stride_taps):
            tap = parity[p][pl.ds(off, M), :]                     # (M, C1) bf16
            acc = acc + jnp.dot(tap, ws_ref[t], preferred_element_type=f32)
        l1 = acc + bs_ref[...]
        l1 = l1 * jax.nn.sigmoid(l1)                              # SiLU (f32)
        l0 = x0_ref[...].astype(f32)                              # level_0_resized

        # ---- attention branch: two 1x1 Conv+BN+SiLU compressions (MXU, bf16)
        a = jnp.dot(x0_ref[...], w0_ref[...], preferred_element_type=f32)
        a = a + b0_ref[...]
        a = a * jax.nn.sigmoid(a)
        b = jnp.dot(l1.astype(bf16), w1_ref[...], preferred_element_type=f32)
        b = b + b1_ref[...]
        b = b * jax.nn.sigmoid(b)

        # weight_levels 1x1 conv (only 2 output channels) on the VPU:
        # logits[:, k] = concat(a, b) . wl[:, k] + bl[k]
        wlt = wlt_ref[...]                                        # (2, 2*CC) f32
        blv = bl_ref[...]                                         # (1, 2)    f32
        z0 = (jnp.sum(a * wlt[0:1, 0:CC], axis=-1, keepdims=True)
              + jnp.sum(b * wlt[0:1, CC:2 * CC], axis=-1, keepdims=True)
              + blv[:, 0:1])
        z1 = (jnp.sum(a * wlt[1:2, 0:CC], axis=-1, keepdims=True)
              + jnp.sum(b * wlt[1:2, CC:2 * CC], axis=-1, keepdims=True)
              + blv[:, 1:2])
        s0 = z0 * jax.nn.sigmoid(z0)                              # SiLU
        s1 = z1 * jax.nn.sigmoid(z1)
        # softmax over the two levels == sigmoid of the logit difference
        p0 = jax.nn.sigmoid(s0 - s1)
        p1 = 1.0 - p0
        # weighted fusion; the mask zeroes the scratch column so it doubles as
        # the expand conv's left/right zero padding.
        fused = (l0 * p0 + l1 * p1) * mask_ref[...]

        # ---- expand: 3x3 / stride-1 Conv+BN+SiLU via a flat halo VMEM buffer
        fbuf_ref[...] = jnp.zeros((NB, C), bf16)
        fbuf_ref[pl.ds(interior, M), :] = fused.astype(bf16)
        acc2 = jnp.zeros((M, C2), f32)
        for dy in range(3):
            for dx in range(3):
                tap = fbuf_ref[pl.ds(base + dy * Wp + dx, M), :]  # (M, C) bf16
                acc2 = acc2 + jnp.dot(tap, we_ref[3 * dy + dx],
                                      preferred_element_type=f32)
        y = acc2 + be_ref[...]
        o_ref[...] = (y * jax.nn.sigmoid(y)).astype(o_ref.dtype)

    return kernel, NB


# --------------------------- glue: BN fold / wrapper --------------------------

def fold_bn(w_oihw, gamma, beta, mean, var, eps=1e-5):
    """Fold eval-mode BatchNorm into the bias-free conv.  Returns the weight as
    (k*k, Cin, Cout) (tap-major, tap index t = 3*dy + dx) plus the bias."""
    cout, cin, k, _ = w_oihw.shape
    scale = gamma / jnp.sqrt(var + eps)
    w = jnp.transpose(w_oihw, (2, 3, 1, 0)).reshape(k * k, cin, cout)
    return w * scale[None, None, :], beta - mean * scale


def asff2_level0_pallas(x_small, x_large, params):
    """ASFF2 level=0 forward.  x_small = x[0] (C1 channels, 2x spatial),
    x_large = x[1] (C channels).  NCHW in / NCHW (float32) out."""
    x1 = jnp.transpose(x_small, (0, 2, 3, 1))          # (N, 2H, 2W, C1)  NHWC
    x0 = jnp.transpose(x_large, (0, 2, 3, 1))          # (N, H, W, C)     NHWC
    N, H, W, C = x0.shape
    C1 = x1.shape[-1]
    Wp, M = W + 1, H * (W + 1)
    bf16, f32 = jnp.bfloat16, jnp.float32

    # -- single cheap XLA pass per input; no im2col / 9x HBM duplication ------
    # even/odd parity slabs of the zero-padded 2x input: the stride-2 conv taps
    # become contiguous row-offset slices of these inside the kernel.
    xp = jnp.pad(x1, ((0, 0), (1, 3), (1, 1), (0, 0)))
    slabs = [xp[:, oy::2, ox::2, :].reshape(N, (H + 2) * Wp, C1).astype(bf16)
             for oy in (0, 1) for ox in (0, 1)]
    pee, peo, poe, poo = slabs
    # x_level_0 widened by one scratch column and flattened.
    x0w = jnp.pad(x0, ((0, 0), (0, 0), (0, 1), (0, 0)))
    x0w = x0w.reshape(N, M, C).astype(bf16)
    # mask zeroing the scratch column of the fused map (computed at trace time).
    colmask = jnp.asarray(
        np.tile(np.arange(Wp) < W, H).reshape(M, 1).astype(np.float32))

    # -- fold eval-mode BN into the conv weights; bf16 MXU operands -----------
    ws, bs = fold_bn(*params['stride_level_1'])        # (9, C1, C)
    w0, b0 = fold_bn(*params['weight_level_0'])        # (1, C, CC)
    w1, b1 = fold_bn(*params['weight_level_1'])
    wl, bl = fold_bn(*params['weight_levels'])         # (1, 2*CC, 2)
    we, be = fold_bn(*params['expand'])                # (9, C, C2)
    CC, C2 = w0.shape[-1], we.shape[-1]

    ws, we = ws.astype(bf16), we.astype(bf16)
    w0, w1 = w0[0].astype(bf16), w1[0].astype(bf16)
    wlt = wl[0].T.astype(f32)                          # (2, 2*CC), VPU operand
    bs = bs.reshape(1, C).astype(f32)
    b0 = b0.reshape(1, CC).astype(f32)
    b1 = b1.reshape(1, CC).astype(f32)
    bl = bl.reshape(1, 2).astype(f32)
    be = be.reshape(1, C2).astype(f32)

    kernel, NB = _make_asff2_kernel(H, W, C1, C, CC, C2)
    RP = (H + 2) * Wp

    def img_spec(rows, ch):
        return pl.BlockSpec((None, rows, ch), lambda n: (n, 0, 0))

    def const_spec(shape):
        if len(shape) == 2:
            return pl.BlockSpec(shape, lambda n: (0, 0))
        return pl.BlockSpec(shape, lambda n: (0, 0, 0))

    flops = 2 * N * M * (9 * C1 * C + 2 * C * CC + 2 * 2 * CC + 9 * C * C2)
    transcendentals = N * M * (2 * C + 2 * CC + 3 + C2)
    bytes_accessed = int(sum(int(np.prod(t.shape)) * t.dtype.itemsize
                             for t in (x0w, pee, peo, poe, poo))
                         + 4 * N * M * C2)

    out = pl.pallas_call(
        kernel,
        out_shape=jax.ShapeDtypeStruct((N, M, C2), jnp.float32),
        grid_spec=pltpu.PrefetchScalarGridSpec(
            num_scalar_prefetch=0,
            grid=(N,),                                  # >=2 parallel steps keep
            in_specs=[                                  # both v7x cores busy
                img_spec(M, C),                         # x0w
                img_spec(RP, C1),                       # parity ee
                img_spec(RP, C1),                       # parity eo
                img_spec(RP, C1),                       # parity oe
                img_spec(RP, C1),                       # parity oo
                const_spec((M, 1)),                     # colmask
                const_spec((9, C1, C)),                 # stride conv weight
                const_spec((1, C)),                     # stride conv bias
                const_spec((C, CC)),                    # weight_level_0 w
                const_spec((1, CC)),                    # weight_level_0 b
                const_spec((C, CC)),                    # weight_level_1 w
                const_spec((1, CC)),                    # weight_level_1 b
                const_spec((2, 2 * CC)),                # weight_levels w (T)
                const_spec((1, 2)),                     # weight_levels b
                const_spec((9, C, C2)),                 # expand w
                const_spec((1, C2)),                    # expand b
            ],
            out_specs=pl.BlockSpec((None, M, C2), lambda n: (n, 0, 0)),
            scratch_shapes=[pltpu.VMEM((NB, C), bf16)],
        ),
        compiler_params=pltpu.CompilerParams(
            dimension_semantics=("parallel",),
            vmem_limit_bytes=32 * 1024 * 1024),
        cost_estimate=pl.CostEstimate(
            flops=int(flops), transcendentals=int(transcendentals),
            bytes_accessed=bytes_accessed),
    )(x0w, pee, peo, poe, poo, colmask,
      ws, bs, w0, b0, w1, b1, wlt, bl, we, be)

    out = out.reshape(N, H, Wp, C2)[:, :, :W, :]        # drop the scratch column
    return jnp.transpose(out, (0, 3, 1, 2))             # back to NCHW


# ------------------------------ pure-JAX reference ----------------------------

def conv_bn_silu_ref(x_nchw, w_oihw, gamma, beta, mean, var, stride, pad,
                     eps=1e-5):
    y = jax.lax.conv_general_dilated(
        x_nchw, w_oihw, window_strides=(stride, stride),
        padding=[(pad, pad), (pad, pad)],
        dimension_numbers=('NCHW', 'OIHW', 'NCHW'))
    scale = gamma / jnp.sqrt(var + eps)
    y = y * scale[None, :, None, None] + (beta - mean * scale)[None, :, None, None]
    return y * jax.nn.sigmoid(y)


def asff2_level0_ref(x_small, x_large, params):
    x_level_0, x_level_1 = x_large, x_small
    level_0_resized = x_level_0
    level_1_resized = conv_bn_silu_ref(x_level_1, *params['stride_level_1'],
                                       stride=2, pad=1)
    w0v = conv_bn_silu_ref(level_0_resized, *params['weight_level_0'],
                           stride=1, pad=0)
    w1v = conv_bn_silu_ref(level_1_resized, *params['weight_level_1'],
                           stride=1, pad=0)
    cat = jnp.concatenate([w0v, w1v], axis=1)
    lw = conv_bn_silu_ref(cat, *params['weight_levels'], stride=1, pad=0)
    lw = jax.nn.softmax(lw, axis=1)
    fused = level_0_resized * lw[:, 0:1] + level_1_resized * lw[:, 1:2]
    return conv_bn_silu_ref(fused, *params['expand'], stride=1, pad=1)


# ---------------------------------- main --------------------------------------

def make_conv_params(key, cin, cout, k):
    kw, kg, kb, km, kv = jax.random.split(key, 5)
    w = 0.1 * jax.random.normal(kw, (cout, cin, k, k), jnp.float32)
    gamma = 1.0 + 0.1 * jax.random.normal(kg, (cout,), jnp.float32)
    beta = 0.1 * jax.random.normal(kb, (cout,), jnp.float32)
    mean = 0.1 * jax.random.normal(km, (cout,), jnp.float32)
    var = 1.0 + jnp.abs(jax.random.normal(kv, (cout,), jnp.float32))
    return (w, gamma, beta, mean, var)


if __name__ == "__main__":
    key = jax.random.PRNGKey(0)
    # ASFF2(level=0, multiplier=1, rfb=False, dim=[32, 16])
    dim = [32, 16]
    level = 0
    inter_dim = dim[level]
    compress_c = 16
    N, H, W = 2, 8, 8

    k_x0, k_x1, k1, k2, k3, k4, k5 = jax.random.split(key, 7)
    # x[0]: small channels / large spatial;  x[1]: large channels / small spatial
    x0 = jax.random.normal(k_x0, (N, dim[1], 2 * H, 2 * W), jnp.float32)
    x1 = jax.random.normal(k_x1, (N, dim[0], H, W), jnp.float32)

    params = {
        'stride_level_1': make_conv_params(k1, dim[1], inter_dim, 3),
        'weight_level_0': make_conv_params(k2, inter_dim, compress_c, 1),
        'weight_level_1': make_conv_params(k3, inter_dim, compress_c, 1),
        'weight_levels':  make_conv_params(k4, 2 * compress_c, 2, 1),
        'expand':         make_conv_params(k5, inter_dim, dim[0], 3),
    }

    out = jax.jit(lambda a, b: asff2_level0_pallas(a, b, params))(x0, x1)
    out = jax.block_until_ready(out)

    ref = asff2_level0_ref(x0, x1, params)
    np.testing.assert_allclose(np.asarray(out), np.asarray(ref),
                               rtol=5e-2, atol=5e-2)
    print("KERNEL_OK")
</pallas_src>

<mosaic_0001>
module attributes {stable_mosaic.version = 11 : i64} {
  func.func @kernel(%arg0: i32, %arg1: memref<1x72x32xbf16, #tpu.memory_space<vmem>>, %arg2: memref<1x90x16xbf16, #tpu.memory_space<vmem>>, %arg3: memref<1x90x16xbf16, #tpu.memory_space<vmem>>, %arg4: memref<1x90x16xbf16, #tpu.memory_space<vmem>>, %arg5: memref<1x90x16xbf16, #tpu.memory_space<vmem>>, %arg6: memref<72x1xf32, #tpu.memory_space<vmem>>, %arg7: memref<9x16x32xbf16, #tpu.memory_space<vmem>>, %arg8: memref<1x32xf32, #tpu.memory_space<vmem>>, %arg9: memref<32x16xbf16, #tpu.memory_space<vmem>>, %arg10: memref<1x16xf32, #tpu.memory_space<vmem>>, %arg11: memref<32x16xbf16, #tpu.memory_space<vmem>>, %arg12: memref<1x16xf32, #tpu.memory_space<vmem>>, %arg13: memref<2x32xf32, #tpu.memory_space<vmem>>, %arg14: memref<1x2xf32, #tpu.memory_space<vmem>>, %arg15: memref<9x32x32xbf16, #tpu.memory_space<vmem>>, %arg16: memref<1x32xf32, #tpu.memory_space<vmem>>, %arg17: memref<1x72x32xf32, #tpu.memory_space<vmem>>, %arg18: memref<104x32xbf16, #tpu.memory_space<vmem>>) attributes {dimension_semantics = [#tpu.dimension_semantics<parallel>], iteration_bounds = array<i64: 2>, scalar_prefetch = 0 : i64, scratch_operands = 1 : i64, tpu.core_type = #tpu.core_type<tc>, window_params = [{transform_indices = @transform_0, window_bounds = array<i64: 1, 72, 32>}, {transform_indices = @transform_1, window_bounds = array<i64: 1, 90, 16>}, {transform_indices = @transform_2, window_bounds = array<i64: 1, 90, 16>}, {transform_indices = @transform_3, window_bounds = array<i64: 1, 90, 16>}, {transform_indices = @transform_4, window_bounds = array<i64: 1, 90, 16>}, {pipeline_mode = #tpu.pipeline_mode<synchronous>, transform_indices = @transform_5, window_bounds = array<i64: 72, 1>}, {pipeline_mode = #tpu.pipeline_mode<synchronous>, transform_indices = @transform_6, window_bounds = array<i64: 9, 16, 32>}, {pipeline_mode = #tpu.pipeline_mode<synchronous>, transform_indices = @transform_7, window_bounds = array<i64: 1, 32>}, {pipeline_mode = #tpu.pipeline_mode<synchronous>, transform_indices = @transform_8, window_bounds = array<i64: 32, 16>}, {pipeline_mode = #tpu.pipeline_mode<synchronous>, transform_indices = @transform_9, window_bounds = array<i64: 1, 16>}, {pipeline_mode = #tpu.pipeline_mode<synchronous>, transform_indices = @transform_10, window_bounds = array<i64: 32, 16>}, {pipeline_mode = #tpu.pipeline_mode<synchronous>, transform_indices = @transform_11, window_bounds = array<i64: 1, 16>}, {pipeline_mode = #tpu.pipeline_mode<synchronous>, transform_indices = @transform_12, window_bounds = array<i64: 2, 32>}, {pipeline_mode = #tpu.pipeline_mode<synchronous>, transform_indices = @transform_13, window_bounds = array<i64: 1, 2>}, {pipeline_mode = #tpu.pipeline_mode<synchronous>, transform_indices = @transform_14, window_bounds = array<i64: 9, 32, 32>}, {pipeline_mode = #tpu.pipeline_mode<synchronous>, transform_indices = @transform_15, window_bounds = array<i64: 1, 32>}, {transform_indices = @transform_16, window_bounds = array<i64: 1, 72, 32>}]} {
    %cst = arith.constant 0.000000e+00 : f32
    %0 = vector.broadcast %cst : f32 to vector<72x32xf32>
    %c0 = arith.constant 0 : index
    %c0_0 = arith.constant 0 : index
    %c0_1 = arith.constant 0 : index
    %1 = vector.load %arg2[%c0, %c0_0, %c0_1] : memref<1x90x16xbf16, #tpu.memory_space<vmem>>, vector<1x72x16xbf16>
    %2 = vector.shape_cast %1 : vector<1x72x16xbf16> to vector<72x16xbf16>
    %c0_2 = arith.constant 0 : index
    %c0_3 = arith.constant 0 : index
    %c0_4 = arith.constant 0 : index
    %3 = vector.load %arg7[%c0_2, %c0_3, %c0_4] : memref<9x16x32xbf16, #tpu.memory_space<vmem>>, vector<1x16x32xbf16>
    %4 = vector.shape_cast %3 : vector<1x16x32xbf16> to vector<16x32xbf16>
    %cst_5 = arith.constant dense<0.000000e+00> : vector<72x32xf32>
    %5 = tpu.matmul %2, %4, %cst_5 {dimension_numbers = #tpu.dot_dimension_numbers<[1], [0], [0], [1], [0, 0, 1, 1], [], []>} : vector<72x16xbf16>, vector<16x32xbf16>, vector<72x32xf32> -> vector<72x32xf32>
    %6 = arith.addf %0, %5 : vector<72x32xf32>
    %c0_6 = arith.constant 0 : index
    %c0_7 = arith.constant 0 : index
    %c0_8 = arith.constant 0 : index
    %7 = vector.load %arg3[%c0_6, %c0_7, %c0_8] : memref<1x90x16xbf16, #tpu.memory_space<vmem>>, vector<1x72x16xbf16>
    %8 = vector.shape_cast %7 : vector<1x72x16xbf16> to vector<72x16xbf16>
    %c1 = arith.constant 1 : index
    %c0_9 = arith.constant 0 : index
    %c0_10 = arith.constant 0 : index
    %9 = vector.load %arg7[%c1, %c0_9, %c0_10] : memref<9x16x32xbf16, #tpu.memory_space<vmem>>, vector<1x16x32xbf16>
    %10 = vector.shape_cast %9 : vector<1x16x32xbf16> to vector<16x32xbf16>
    %cst_11 = arith.constant dense<0.000000e+00> : vector<72x32xf32>
    %11 = tpu.matmul %8, %10, %cst_11 {dimension_numbers = #tpu.dot_dimension_numbers<[1], [0], [0], [1], [0, 0, 1, 1], [], []>} : vector<72x16xbf16>, vector<16x32xbf16>, vector<72x32xf32> -> vector<72x32xf32>
    %12 = arith.addf %6, %11 : vector<72x32xf32>
    %c0_12 = arith.constant 0 : index
    %c1_13 = arith.constant 1 : index
    %c0_14 = arith.constant 0 : index
    %13 = vector.load %arg2[%c0_12, %c1_13, %c0_14] : memref<1x90x16xbf16, #tpu.memory_space<vmem>>, vector<1x72x16xbf16>
    %14 = vector.shape_cast %13 : vector<1x72x16xbf16> to vector<72x16xbf16>
    %c2 = arith.constant 2 : index
    %c0_15 = arith.constant 0 : index
    %c0_16 = arith.constant 0 : index
    %15 = vector.load %arg7[%c2, %c0_15, %c0_16] : memref<9x16x32xbf16, #tpu.memory_space<vmem>>, vector<1x16x32xbf16>
    %16 = vector.shape_cast %15 : vector<1x16x32xbf16> to vector<16x32xbf16>
    %cst_17 = arith.constant dense<0.000000e+00> : vector<72x32xf32>
    %17 = tpu.matmul %14, %16, %cst_17 {dimension_numbers = #tpu.dot_dimension_numbers<[1], [0], [0], [1], [0, 0, 1, 1], [], []>} : vector<72x16xbf16>, vector<16x32xbf16>, vector<72x32xf32> -> vector<72x32xf32>
    %18 = arith.addf %12, %17 : vector<72x32xf32>
    %c0_18 = arith.constant 0 : index
    %c0_19 = arith.constant 0 : index
    %c0_20 = arith.constant 0 : index
    %19 = vector.load %arg4[%c0_18, %c0_19, %c0_20] : memref<1x90x16xbf16, #tpu.memory_space<vmem>>, vector<1x72x16xbf16>
    %20 = vector.shape_cast %19 : vector<1x72x16xbf16> to vector<72x16xbf16>
    %c3 = arith.constant 3 : index
    %c0_21 = arith.constant 0 : index
    %c0_22 = arith.constant 0 : index
    %21 = vector.load %arg7[%c3, %c0_21, %c0_22] : memref<9x16x32xbf16, #tpu.memory_space<vmem>>, vector<1x16x32xbf16>
    %22 = vector.shape_cast %21 : vector<1x16x32xbf16> to vector<16x32xbf16>
    %cst_23 = arith.constant dense<0.000000e+00> : vector<72x32xf32>
    %23 = tpu.matmul %20, %22, %cst_23 {dimension_numbers = #tpu.dot_dimension_numbers<[1], [0], [0], [1], [0, 0, 1, 1], [], []>} : vector<72x16xbf16>, vector<16x32xbf16>, vector<72x32xf32> -> vector<72x32xf32>
    %24 = arith.addf %18, %23 : vector<72x32xf32>
    %c0_24 = arith.constant 0 : index
    %c0_25 = arith.constant 0 : index
    %c0_26 = arith.constant 0 : index
    %25 = vector.load %arg5[%c0_24, %c0_25, %c0_26] : memref<1x90x16xbf16, #tpu.memory_space<vmem>>, vector<1x72x16xbf16>
    %26 = vector.shape_cast %25 : vector<1x72x16xbf16> to vector<72x16xbf16>
    %c4 = arith.constant 4 : index
    %c0_27 = arith.constant 0 : index
    %c0_28 = arith.constant 0 : index
    %27 = vector.load %arg7[%c4, %c0_27, %c0_28] : memref<9x16x32xbf16, #tpu.memory_space<vmem>>, vector<1x16x32xbf16>
    %28 = vector.shape_cast %27 : vector<1x16x32xbf16> to vector<16x32xbf16>
    %cst_29 = arith.constant dense<0.000000e+00> : vector<72x32xf32>
    %29 = tpu.matmul %26, %28, %cst_29 {dimension_numbers = #tpu.dot_dimension_numbers<[1], [0], [0], [1], [0, 0, 1, 1], [], []>} : vector<72x16xbf16>, vector<16x32xbf16>, vector<72x32xf32> -> vector<72x32xf32>
    %30 = arith.addf %24, %29 : vector<72x32xf32>
    %c0_30 = arith.constant 0 : index
    %c1_31 = arith.constant 1 : index
    %c0_32 = arith.constant 0 : index
    %31 = vector.load %arg4[%c0_30, %c1_31, %c0_32] : memref<1x90x16xbf16, #tpu.memory_space<vmem>>, vector<1x72x16xbf16>
    %32 = vector.shape_cast %31 : vector<1x72x16xbf16> to vector<72x16xbf16>
    %c5 = arith.constant 5 : index
    %c0_33 = arith.constant 0 : index
    %c0_34 = arith.constant 0 : index
    %33 = vector.load %arg7[%c5, %c0_33, %c0_34] : memref<9x16x32xbf16, #tpu.memory_space<vmem>>, vector<1x16x32xbf16>
    %34 = vector.shape_cast %33 : vector<1x16x32xbf16> to vector<16x32xbf16>
    %cst_35 = arith.constant dense<0.000000e+00> : vector<72x32xf32>
    %35 = tpu.matmul %32, %34, %cst_35 {dimension_numbers = #tpu.dot_dimension_numbers<[1], [0], [0], [1], [0, 0, 1, 1], [], []>} : vector<72x16xbf16>, vector<16x32xbf16>, vector<72x32xf32> -> vector<72x32xf32>
    %36 = arith.addf %30, %35 : vector<72x32xf32>
    %c0_36 = arith.constant 0 : index
    %c9 = arith.constant 9 : index
    %c0_37 = arith.constant 0 : index
    %37 = vector.load %arg2[%c0_36, %c9, %c0_37] : memref<1x90x16xbf16, #tpu.memory_space<vmem>>, vector<1x72x16xbf16>
    %38 = vector.shape_cast %37 : vector<1x72x16xbf16> to vector<72x16xbf16>
    %c6 = arith.constant 6 : index
    %c0_38 = arith.constant 0 : index
    %c0_39 = arith.constant 0 : index
    %39 = vector.load %arg7[%c6, %c0_38, %c0_39] : memref<9x16x32xbf16, #tpu.memory_space<vmem>>, vector<1x16x32xbf16>
    %40 = vector.shape_cast %39 : vector<1x16x32xbf16> to vector<16x32xbf16>
    %cst_40 = arith.constant dense<0.000000e+00> : vector<72x32xf32>
    %41 = tpu.matmul %38, %40, %cst_40 {dimension_numbers = #tpu.dot_dimension_numbers<[1], [0], [0], [1], [0, 0, 1, 1], [], []>} : vector<72x16xbf16>, vector<16x32xbf16>, vector<72x32xf32> -> vector<72x32xf32>
    %42 = arith.addf %36, %41 : vector<72x32xf32>
    %c0_41 = arith.constant 0 : index
    %c9_42 = arith.constant 9 : index
    %c0_43 = arith.constant 0 : index
    %43 = vector.load %arg3[%c0_41, %c9_42, %c0_43] : memref<1x90x16xbf16, #tpu.memory_space<vmem>>, vector<1x72x16xbf16>
    %44 = vector.shape_cast %43 : vector<1x72x16xbf16> to vector<72x16xbf16>
    %c7 = arith.constant 7 : index
    %c0_44 = arith.constant 0 : index
    %c0_45 = arith.constant 0 : index
    %45 = vector.load %arg7[%c7, %c0_44, %c0_45] : memref<9x16x32xbf16, #tpu.memory_space<vmem>>, vector<1x16x32xbf16>
    %46 = vector.shape_cast %45 : vector<1x16x32xbf16> to vector<16x32xbf16>
    %cst_46 = arith.constant dense<0.000000e+00> : vector<72x32xf32>
    %47 = tpu.matmul %44, %46, %cst_46 {dimension_numbers = #tpu.dot_dimension_numbers<[1], [0], [0], [1], [0, 0, 1, 1], [], []>} : vector<72x16xbf16>, vector<16x32xbf16>, vector<72x32xf32> -> vector<72x32xf32>
    %48 = arith.addf %42, %47 : vector<72x32xf32>
    %c0_47 = arith.constant 0 : index
    %c10 = arith.constant 10 : index
    %c0_48 = arith.constant 0 : index
    %49 = vector.load %arg2[%c0_47, %c10, %c0_48] : memref<1x90x16xbf16, #tpu.memory_space<vmem>>, vector<1x72x16xbf16>
    %50 = vector.shape_cast %49 : vector<1x72x16xbf16> to vector<72x16xbf16>
    %c8 = arith.constant 8 : index
    %c0_49 = arith.constant 0 : index
    %c0_50 = arith.constant 0 : index
    %51 = vector.load %arg7[%c8, %c0_49, %c0_50] : memref<9x16x32xbf16, #tpu.memory_space<vmem>>, vector<1x16x32xbf16>
    %52 = vector.shape_cast %51 : vector<1x16x32xbf16> to vector<16x32xbf16>
    %cst_51 = arith.constant dense<0.000000e+00> : vector<72x32xf32>
    %53 = tpu.matmul %50, %52, %cst_51 {dimension_numbers = #tpu.dot_dimension_numbers<[1], [0], [0], [1], [0, 0, 1, 1], [], []>} : vector<72x16xbf16>, vector<16x32xbf16>, vector<72x32xf32> -> vector<72x32xf32>
    %54 = arith.addf %48, %53 : vector<72x32xf32>
    %c0_52 = arith.constant 0 : index
    %c0_53 = arith.constant 0 : index
    %55 = vector.load %arg8[%c0_52, %c0_53] : memref<1x32xf32, #tpu.memory_space<vmem>>, vector<1x32xf32>
    %56 = vector.broadcast %55 : vector<1x32xf32> to vector<72x32xf32>
    %57 = arith.addf %54, %56 : vector<72x32xf32>
    %58 = arith.negf %57 : vector<72x32xf32>
    %59 = math.exp %58 : vector<72x32xf32>
    %cst_54 = arith.constant 1.000000e+00 : f32
    %60 = vector.broadcast %cst_54 : f32 to vector<72x32xf32>
    %61 = arith.addf %60, %59 : vector<72x32xf32>
    %62 = arith.divf %60, %61 : vector<72x32xf32>
    %63 = arith.mulf %57, %62 : vector<72x32xf32>
    %c0_55 = arith.constant 0 : index
    %c0_56 = arith.constant 0 : index
    %c0_57 = arith.constant 0 : index
    %64 = vector.load %arg1[%c0_55, %c0_56, %c0_57] : memref<1x72x32xbf16, #tpu.memory_space<vmem>>, vector<1x72x32xbf16>
    %65 = vector.shape_cast %64 : vector<1x72x32xbf16> to vector<72x32xbf16>
    %66 = arith.extf %65 : vector<72x32xbf16> to vector<72x32xf32>
    %c0_58 = arith.constant 0 : index
    %c0_59 = arith.constant 0 : index
    %c0_60 = arith.constant 0 : index
    %67 = vector.load %arg1[%c0_58, %c0_59, %c0_60] : memref<1x72x32xbf16, #tpu.memory_space<vmem>>, vector<1x72x32xbf16>
    %68 = vector.shape_cast %67 : vector<1x72x32xbf16> to vector<72x32xbf16>
    %c0_61 = arith.constant 0 : index
    %c0_62 = arith.constant 0 : index
    %69 = vector.load %arg9[%c0_61, %c0_62] : memref<32x16xbf16, #tpu.memory_space<vmem>>, vector<32x16xbf16>
    %cst_63 = arith.constant dense<0.000000e+00> : vector<72x16xf32>
    %70 = tpu.matmul %68, %69, %cst_63 {dimension_numbers = #tpu.dot_dimension_numbers<[1], [0], [0], [1], [0, 0, 1, 1], [], []>} : vector<72x32xbf16>, vector<32x16xbf16>, vector<72x16xf32> -> vector<72x16xf32>
    %c0_64 = arith.constant 0 : index
    %c0_65 = arith.constant 0 : index
    %71 = vector.load %arg10[%c0_64, %c0_65] : memref<1x16xf32, #tpu.memory_space<vmem>>, vector<1x16xf32>
    %72 = vector.broadcast %71 : vector<1x16xf32> to vector<72x16xf32>
    %73 = arith.addf %70, %72 : vector<72x16xf32>
    %74 = arith.negf %73 : vector<72x16xf32>
    %75 = math.exp %74 : vector<72x16xf32>
    %cst_66 = arith.constant 1.000000e+00 : f32
    %76 = vector.broadcast %cst_66 : f32 to vector<72x16xf32>
    %77 = arith.addf %76, %75 : vector<72x16xf32>
    %78 = arith.divf %76, %77 : vector<72x16xf32>
    %79 = arith.mulf %73, %78 : vector<72x16xf32>
    %80 = arith.truncf %63 : vector<72x32xf32> to vector<72x32xbf16>
    %c0_67 = arith.constant 0 : index
    %c0_68 = arith.constant 0 : index
    %81 = vector.load %arg11[%c0_67, %c0_68] : memref<32x16xbf16, #tpu.memory_space<vmem>>, vector<32x16xbf16>
    %cst_69 = arith.constant dense<0.000000e+00> : vector<72x16xf32>
    %82 = tpu.matmul %80, %81, %cst_69 {dimension_numbers = #tpu.dot_dimension_numbers<[1], [0], [0], [1], [0, 0, 1, 1], [], []>} : vector<72x32xbf16>, vector<32x16xbf16>, vector<72x16xf32> -> vector<72x16xf32>
    %c0_70 = arith.constant 0 : index
    %c0_71 = arith.constant 0 : index
    %83 = vector.load %arg12[%c0_70, %c0_71] : memref<1x16xf32, #tpu.memory_space<vmem>>, vector<1x16xf32>
    %84 = vector.broadcast %83 : vector<1x16xf32> to vector<72x16xf32>
    %85 = arith.addf %82, %84 : vector<72x16xf32>
    %86 = arith.negf %85 : vector<72x16xf32>
    %87 = math.exp %86 : vector<72x16xf32>
    %cst_72 = arith.constant 1.000000e+00 : f32
    %88 = vector.broadcast %cst_72 : f32 to vector<72x16xf32>
    %89 = arith.addf %88, %87 : vector<72x16xf32>
    %90 = arith.divf %88, %89 : vector<72x16xf32>
    %91 = arith.mulf %85, %90 : vector<72x16xf32>
    %c0_73 = arith.constant 0 : index
    %c0_74 = arith.constant 0 : index
    %92 = vector.load %arg13[%c0_73, %c0_74] : memref<2x32xf32, #tpu.memory_space<vmem>>, vector<2x32xf32>
    %c0_75 = arith.constant 0 : index
    %c0_76 = arith.constant 0 : index
    %93 = vector.load %arg14[%c0_75, %c0_76] : memref<1x2xf32, #tpu.memory_space<vmem>>, vector<1x2xf32>
    %94 = vector.extract_strided_slice %92 {offsets = [0, 0], sizes = [1, 16], strides = [1, 1]} : vector<2x32xf32> to vector<1x16xf32>
    %95 = vector.broadcast %94 : vector<1x16xf32> to vector<72x16xf32>
    %96 = arith.mulf %79, %95 : vector<72x16xf32>
    %cst_77 = arith.constant dense<0.000000e+00> : vector<72xf32>
    %97 = vector.multi_reduction <add>, %96, %cst_77 [1] : vector<72x16xf32> to vector<72xf32>
    %98 = vector.shape_cast %97 : vector<72xf32> to vector<72x1xf32>
    %99 = vector.extract_strided_slice %92 {offsets = [0, 16], sizes = [1, 16], strides = [1, 1]} : vector<2x32xf32> to vector<1x16xf32>
    %100 = vector.broadcast %99 : vector<1x16xf32> to vector<72x16xf32>
    %101 = arith.mulf %91, %100 : vector<72x16xf32>
    %cst_78 = arith.constant dense<0.000000e+00> : vector<72xf32>
    %102 = vector.multi_reduction <add>, %101, %cst_78 [1] : vector<72x16xf32> to vector<72xf32>
    %103 = vector.shape_cast %102 : vector<72xf32> to vector<72x1xf32>
    %104 = arith.addf %98, %103 : vector<72x1xf32>
    %105 = vector.extract_strided_slice %93 {offsets = [0, 0], sizes = [1, 1], strides = [1, 1]} : vector<1x2xf32> to vector<1x1xf32>
    %106 = vector.broadcast %105 : vector<1x1xf32> to vector<72x1xf32>
    %107 = arith.addf %104, %106 : vector<72x1xf32>
    %108 = vector.extract_strided_slice %92 {offsets = [1, 0], sizes = [1, 16], strides = [1, 1]} : vector<2x32xf32> to vector<1x16xf32>
    %109 = vector.broadcast %108 : vector<1x16xf32> to vector<72x16xf32>
    %110 = arith.mulf %79, %109 : vector<72x16xf32>
    %cst_79 = arith.constant dense<0.000000e+00> : vector<72xf32>
    %111 = vector.multi_reduction <add>, %110, %cst_79 [1] : vector<72x16xf32> to vector<72xf32>
    %112 = vector.shape_cast %111 : vector<72xf32> to vector<72x1xf32>
    %113 = vector.extract_strided_slice %92 {offsets = [1, 16], sizes = [1, 16], strides = [1, 1]} : vector<2x32xf32> to vector<1x16xf32>
    %114 = vector.broadcast %113 : vector<1x16xf32> to vector<72x16xf32>
    %115 = arith.mulf %91, %114 : vector<72x16xf32>
    %cst_80 = arith.constant dense<0.000000e+00> : vector<72xf32>
    %116 = vector.multi_reduction <add>, %115, %cst_80 [1] : vector<72x16xf32> to vector<72xf32>
    %117 = vector.shape_cast %116 : vector<72xf32> to vector<72x1xf32>
    %118 = arith.addf %112, %117 : vector<72x1xf32>
    %119 = vector.extract_strided_slice %93 {offsets = [0, 1], sizes = [1, 1], strides = [1, 1]} : vector<1x2xf32> to vector<1x1xf32>
    %120 = vector.broadcast %119 : vector<1x1xf32> to vector<72x1xf32>
    %121 = arith.addf %118, %120 : vector<72x1xf32>
    %122 = arith.negf %107 : vector<72x1xf32>
    %123 = math.exp %122 : vector<72x1xf32>
    %cst_81 = arith.constant 1.000000e+00 : f32
    %124 = vector.broadcast %cst_81 : f32 to vector<72x1xf32>
    %125 = arith.addf %124, %123 : vector<72x1xf32>
    %126 = arith.divf %124, %125 : vector<72x1xf32>
    %127 = arith.mulf %107, %126 : vector<72x1xf32>
    %128 = arith.negf %121 : vector<72x1xf32>
    %129 = math.exp %128 : vector<72x1xf32>
    %cst_82 = arith.constant 1.000000e+00 : f32
    %130 = vector.broadcast %cst_82 : f32 to vector<72x1xf32>
    %131 = arith.addf %130, %129 : vector<72x1xf32>
    %132 = arith.divf %130, %131 : vector<72x1xf32>
    %133 = arith.mulf %121, %132 : vector<72x1xf32>
    %134 = arith.subf %127, %133 : vector<72x1xf32>
    %135 = arith.negf %134 : vector<72x1xf32>
    %136 = math.exp %135 : vector<72x1xf32>
    %cst_83 = arith.constant 1.000000e+00 : f32
    %137 = vector.broadcast %cst_83 : f32 to vector<72x1xf32>
    %138 = arith.addf %137, %136 : vector<72x1xf32>
    %139 = arith.divf %137, %138 : vector<72x1xf32>
    %cst_84 = arith.constant 1.000000e+00 : f32
    %140 = vector.broadcast %cst_84 : f32 to vector<72x1xf32>
    %141 = arith.subf %140, %139 : vector<72x1xf32>
    %142 = vector.broadcast %139 : vector<72x1xf32> to vector<72x32xf32>
    %143 = arith.mulf %66, %142 : vector<72x32xf32>
    %144 = vector.broadcast %141 : vector<72x1xf32> to vector<72x32xf32>
    %145 = arith.mulf %63, %144 : vector<72x32xf32>
    %146 = arith.addf %143, %145 : vector<72x32xf32>
    %c0_85 = arith.constant 0 : index
    %c0_86 = arith.constant 0 : index
    %147 = vector.load %arg6[%c0_85, %c0_86] : memref<72x1xf32, #tpu.memory_space<vmem>>, vector<72x1xf32>
    %148 = vector.broadcast %147 : vector<72x1xf32> to vector<72x32xf32>
    %149 = arith.mulf %146, %148 : vector<72x32xf32>
    %cst_87 = arith.constant 0.000000e+00 : bf16
    %150 = vector.broadcast %cst_87 : bf16 to vector<104x32xbf16>
    %c0_88 = arith.constant 0 : index
    %c0_89 = arith.constant 0 : index
    %151 = vector.load %arg18[%c0_88, %c0_89] : memref<104x32xbf16, #tpu.memory_space<vmem>>, vector<104x32xbf16>
    tpu.vector_store %arg18[%c0_88, %c0_89], %150 {strides = array<i32>} : memref<104x32xbf16, #tpu.memory_space<vmem>>, vector<104x32xbf16>,
    %152 = arith.truncf %149 : vector<72x32xf32> to vector<72x32xbf16>
    %c16 = arith.constant 16 : index
    %c0_90 = arith.constant 0 : index
    %153 = vector.load %arg18[%c16, %c0_90] : memref<104x32xbf16, #tpu.memory_space<vmem>>, vector<72x32xbf16>
    tpu.vector_store %arg18[%c16, %c0_90], %152 {strides = array<i32>} : memref<104x32xbf16, #tpu.memory_space<vmem>>, vector<72x32xbf16>,
    %cst_91 = arith.constant 0.000000e+00 : f32
    %154 = vector.broadcast %cst_91 : f32 to vector<72x32xf32>
    %c6_92 = arith.constant 6 : index
    %c0_93 = arith.constant 0 : index
    %155 = vector.load %arg18[%c6_92, %c0_93] : memref<104x32xbf16, #tpu.memory_space<vmem>>, vector<72x32xbf16>
    %c0_94 = arith.constant 0 : index
    %c0_95 = arith.constant 0 : index
    %c0_96 = arith.constant 0 : index
    %156 = vector.load %arg15[%c0_94, %c0_95, %c0_96] : memref<9x32x32xbf16, #tpu.memory_space<vmem>>, vector<1x32x32xbf16>
    %157 = vector.shape_cast %156 : vector<1x32x32xbf16> to vector<32x32xbf16>
    %cst_97 = arith.constant dense<0.000000e+00> : vector<72x32xf32>
    %158 = tpu.matmul %155, %157, %cst_97 {dimension_numbers = #tpu.dot_dimension_numbers<[1], [0], [0], [1], [0, 0, 1, 1], [], []>} : vector<72x32xbf16>, vector<32x32xbf16>, vector<72x32xf32> -> vector<72x32xf32>
    %159 = arith.addf %154, %158 : vector<72x32xf32>
    %c7_98 = arith.constant 7 : index
    %c0_99 = arith.constant 0 : index
    %160 = vector.load %arg18[%c7_98, %c0_99] : memref<104x32xbf16, #tpu.memory_space<vmem>>, vector<72x32xbf16>
    %c1_100 = arith.constant 1 : index
    %c0_101 = arith.constant 0 : index
    %c0_102 = arith.constant 0 : index
    %161 = vector.load %arg15[%c1_100, %c0_101, %c0_102] : memref<9x32x32xbf16, #tpu.memory_space<vmem>>, vector<1x32x32xbf16>
    %162 = vector.shape_cast %161 : vector<1x32x32xbf16> to vector<32x32xbf16>
    %cst_103 = arith.constant dense<0.000000e+00> : vector<72x32xf32>
    %163 = tpu.matmul %160, %162, %cst_103 {dimension_numbers = #tpu.dot_dimension_numbers<[1], [0], [0], [1], [0, 0, 1, 1], [], []>} : vector<72x32xbf16>, vector<32x32xbf16>, vector<72x32xf32> -> vector<72x32xf32>
    %164 = arith.addf %159, %163 : vector<72x32xf32>
    %c8_104 = arith.constant 8 : index
    %c0_105 = arith.constant 0 : index
    %165 = vector.load %arg18[%c8_104, %c0_105] : memref<104x32xbf16, #tpu.memory_space<vmem>>, vector<72x32xbf16>
    %c2_106 = arith.constant 2 : index
    %c0_107 = arith.constant 0 : index
    %c0_108 = arith.constant 0 : index
    %166 = vector.load %arg15[%c2_106, %c0_107, %c0_108] : memref<9x32x32xbf16, #tpu.memory_space<vmem>>, vector<1x32x32xbf16>
    %167 = vector.shape_cast %166 : vector<1x32x32xbf16> to vector<32x32xbf16>
    %cst_109 = arith.constant dense<0.000000e+00> : vector<72x32xf32>
    %168 = tpu.matmul %165, %167, %cst_109 {dimension_numbers = #tpu.dot_dimension_numbers<[1], [0], [0], [1], [0, 0, 1, 1], [], []>} : vector<72x32xbf16>, vector<32x32xbf16>, vector<72x32xf32> -> vector<72x32xf32>
    %169 = arith.addf %164, %168 : vector<72x32xf32>
    %c15 = arith.constant 15 : index
    %c0_110 = arith.constant 0 : index
    %170 = vector.load %arg18[%c15, %c0_110] : memref<104x32xbf16, #tpu.memory_space<vmem>>, vector<72x32xbf16>
    %c3_111 = arith.constant 3 : index
    %c0_112 = arith.constant 0 : index
    %c0_113 = arith.constant 0 : index
    %171 = vector.load %arg15[%c3_111, %c0_112, %c0_113] : memref<9x32x32xbf16, #tpu.memory_space<vmem>>, vector<1x32x32xbf16>
    %172 = vector.shape_cast %171 : vector<1x32x32xbf16> to vector<32x32xbf16>
    %cst_114 = arith.constant dense<0.000000e+00> : vector<72x32xf32>
    %173 = tpu.matmul %170, %172, %cst_114 {dimension_numbers = #tpu.dot_dimension_numbers<[1], [0], [0], [1], [0, 0, 1, 1], [], []>} : vector<72x32xbf16>, vector<32x32xbf16>, vector<72x32xf32> -> vector<72x32xf32>
    %174 = arith.addf %169, %173 : vector<72x32xf32>
    %c16_115 = arith.constant 16 : index
    %c0_116 = arith.constant 0 : index
    %175 = vector.load %arg18[%c16_115, %c0_116] : memref<104x32xbf16, #tpu.memory_space<vmem>>, vector<72x32xbf16>
    %c4_117 = arith.constant 4 : index
    %c0_118 = arith.constant 0 : index
    %c0_119 = arith.constant 0 : index
    %176 = vector.load %arg15[%c4_117, %c0_118, %c0_119] : memref<9x32x32xbf16, #tpu.memory_space<vmem>>, vector<1x32x32xbf16>
    %177 = vector.shape_cast %176 : vector<1x32x32xbf16> to vector<32x32xbf16>
    %cst_120 = arith.constant dense<0.000000e+00> : vector<72x32xf32>
    %178 = tpu.matmul %175, %177, %cst_120 {dimension_numbers = #tpu.dot_dimension_numbers<[1], [0], [0], [1], [0, 0, 1, 1], [], []>} : vector<72x32xbf16>, vector<32x32xbf16>, vector<72x32xf32> -> vector<72x32xf32>
    %179 = arith.addf %174, %178 : vector<72x32xf32>
    %c17 = arith.constant 17 : index
    %c0_121 = arith.constant 0 : index
    %180 = vector.load %arg18[%c17, %c0_121] : memref<104x32xbf16, #tpu.memory_space<vmem>>, vector<72x32xbf16>
    %c5_122 = arith.constant 5 : index
    %c0_123 = arith.constant 0 : index
    %c0_124 = arith.constant 0 : index
    %181 = vector.load %arg15[%c5_122, %c0_123, %c0_124] : memref<9x32x32xbf16, #tpu.memory_space<vmem>>, vector<1x32x32xbf16>
    %182 = vector.shape_cast %181 : vector<1x32x32xbf16> to vector<32x32xbf16>
    %cst_125 = arith.constant dense<0.000000e+00> : vector<72x32xf32>
    %183 = tpu.matmul %180, %182, %cst_125 {dimension_numbers = #tpu.dot_dimension_numbers<[1], [0], [0], [1], [0, 0, 1, 1], [], []>} : vector<72x32xbf16>, vector<32x32xbf16>, vector<72x32xf32> -> vector<72x32xf32>
    %184 = arith.addf %179, %183 : vector<72x32xf32>
    %c24 = arith.constant 24 : index
    %c0_126 = arith.constant 0 : index
    %185 = vector.load %arg18[%c24, %c0_126] : memref<104x32xbf16, #tpu.memory_space<vmem>>, vector<72x32xbf16>
    %c6_127 = arith.constant 6 : index
    %c0_128 = arith.constant 0 : index
    %c0_129 = arith.constant 0 : index
    %186 = vector.load %arg15[%c6_127, %c0_128, %c0_129] : memref<9x32x32xbf16, #tpu.memory_space<vmem>>, vector<1x32x32xbf16>
    %187 = vector.shape_cast %186 : vector<1x32x32xbf16> to vector<32x32xbf16>
    %cst_130 = arith.constant dense<0.000000e+00> : vector<72x32xf32>
    %188 = tpu.matmul %185, %187, %cst_130 {dimension_numbers = #tpu.dot_dimension_numbers<[1], [0], [0], [1], [0, 0, 1, 1], [], []>} : vector<72x32xbf16>, vector<32x32xbf16>, vector<72x32xf32> -> vector<72x32xf32>
    %189 = arith.addf %184, %188 : vector<72x32xf32>
    %c25 = arith.constant 25 : index
    %c0_131 = arith.constant 0 : index
    %190 = vector.load %arg18[%c25, %c0_131] : memref<104x32xbf16, #tpu.memory_space<vmem>>, vector<72x32xbf16>
    %c7_132 = arith.constant 7 : index
    %c0_133 = arith.constant 0 : index
    %c0_134 = arith.constant 0 : index
    %191 = vector.load %arg15[%c7_132, %c0_133, %c0_134] : memref<9x32x32xbf16, #tpu.memory_space<vmem>>, vector<1x32x32xbf16>
    %192 = vector.shape_cast %191 : vector<1x32x32xbf16> to vector<32x32xbf16>
    %cst_135 = arith.constant dense<0.000000e+00> : vector<72x32xf32>
    %193 = tpu.matmul %190, %192, %cst_135 {dimension_numbers = #tpu.dot_dimension_numbers<[1], [0], [0], [1], [0, 0, 1, 1], [], []>} : vector<72x32xbf16>, vector<32x32xbf16>, vector<72x32xf32> -> vector<72x32xf32>
    %194 = arith.addf %189, %193 : vector<72x32xf32>
    %c26 = arith.constant 26 : index
    %c0_136 = arith.constant 0 : index
    %195 = vector.load %arg18[%c26, %c0_136] : memref<104x32xbf16, #tpu.memory_space<vmem>>, vector<72x32xbf16>
    %c8_137 = arith.constant 8 : index
    %c0_138 = arith.constant 0 : index
    %c0_139 = arith.constant 0 : index
    %196 = vector.load %arg15[%c8_137, %c0_138, %c0_139] : memref<9x32x32xbf16, #tpu.memory_space<vmem>>, vector<1x32x32xbf16>
    %197 = vector.shape_cast %196 : vector<1x32x32xbf16> to vector<32x32xbf16>
    %cst_140 = arith.constant dense<0.000000e+00> : vector<72x32xf32>
    %198 = tpu.matmul %195, %197, %cst_140 {dimension_numbers = #tpu.dot_dimension_numbers<[1], [0], [0], [1], [0, 0, 1, 1], [], []>} : vector<72x32xbf16>, vector<32x32xbf16>, vector<72x32xf32> -> vector<72x32xf32>
    %199 = arith.addf %194, %198 : vector<72x32xf32>
    %c0_141 = arith.constant 0 : index
    %c0_142 = arith.constant 0 : index
    %200 = vector.load %arg16[%c0_141, %c0_142] : memref<1x32xf32, #tpu.memory_space<vmem>>, vector<1x32xf32>
    %201 = vector.broadcast %200 : vector<1x32xf32> to vector<72x32xf32>
    %202 = arith.addf %199, %201 : vector<72x32xf32>
    %203 = arith.negf %202 : vector<72x32xf32>
    %204 = math.exp %203 : vector<72x32xf32>
    %cst_143 = arith.constant 1.000000e+00 : f32
    %205 = vector.broadcast %cst_143 : f32 to vector<72x32xf32>
    %206 = arith.addf %205, %204 : vector<72x32xf32>
    %207 = arith.divf %205, %206 : vector<72x32xf32>
    %208 = arith.mulf %202, %207 : vector<72x32xf32>
    %c0_144 = arith.constant 0 : index
    %c0_145 = arith.constant 0 : index
    %c0_146 = arith.constant 0 : index
    %209 = vector.load %arg17[%c0_144, %c0_145, %c0_146] : memref<1x72x32xf32, #tpu.memory_space<vmem>>, vector<1x72x32xf32>
    %210 = vector.shape_cast %209 : vector<1x72x32xf32> to vector<72x32xf32>
    %211 = vector.shape_cast %208 : vector<72x32xf32> to vector<1x72x32xf32>
    tpu.vector_store %arg17[%c0_144, %c0_145, %c0_146], %211 {strides = array<i32>} : memref<1x72x32xf32, #tpu.memory_space<vmem>>, vector<1x72x32xf32>,
    return
  }
  func.func @transform_0(%arg0: i32) -> (i32, i32, i32) {
    %c0_i32 = arith.constant 0 : i32
    %c0_i32_0 = arith.constant 0 : i32
    %c0_i32_1 = arith.constant 0 : i32
    return %arg0, %c0_i32, %c0_i32_0 : i32, i32, i32
  }
  func.func @transform_1(%arg0: i32) -> (i32, i32, i32) {
    %c0_i32 = arith.constant 0 : i32
    %c0_i32_0 = arith.constant 0 : i32
    %c0_i32_1 = arith.constant 0 : i32
    return %arg0, %c0_i32, %c0_i32_0 : i32, i32, i32
  }
  func.func @transform_2(%arg0: i32) -> (i32, i32, i32) {
    %c0_i32 = arith.constant 0 : i32
    %c0_i32_0 = arith.constant 0 : i32
    %c0_i32_1 = arith.constant 0 : i32
    return %arg0, %c0_i32, %c0_i32_0 : i32, i32, i32
  }
  func.func @transform_3(%arg0: i32) -> (i32, i32, i32) {
    %c0_i32 = arith.constant 0 : i32
    %c0_i32_0 = arith.constant 0 : i32
    %c0_i32_1 = arith.constant 0 : i32
    return %arg0, %c0_i32, %c0_i32_0 : i32, i32, i32
  }
  func.func @transform_4(%arg0: i32) -> (i32, i32, i32) {
    %c0_i32 = arith.constant 0 : i32
    %c0_i32_0 = arith.constant 0 : i32
    %c0_i32_1 = arith.constant 0 : i32
    return %arg0, %c0_i32, %c0_i32_0 : i32, i32, i32
  }
  func.func @transform_5(%arg0: i32) -> (i32, i32) {
    %c0_i32 = arith.constant 0 : i32
    %c0_i32_0 = arith.constant 0 : i32
    %c0_i32_1 = arith.constant 0 : i32
    return %c0_i32, %c0_i32_0 : i32, i32
  }
  func.func @transform_6(%arg0: i32) -> (i32, i32, i32) {
    %c0_i32 = arith.constant 0 : i32
    %c0_i32_0 = arith.constant 0 : i32
    %c0_i32_1 = arith.constant 0 : i32
    %c0_i32_2 = arith.constant 0 : i32
    return %c0_i32, %c0_i32_0, %c0_i32_1 : i32, i32, i32
  }
  func.func @transform_7(%arg0: i32) -> (i32, i32) {
    %c0_i32 = arith.constant 0 : i32
    %c0_i32_0 = arith.constant 0 : i32
    %c0_i32_1 = arith.constant 0 : i32
    return %c0_i32, %c0_i32_0 : i32, i32
  }
  func.func @transform_8(%arg0: i32) -> (i32, i32) {
    %c0_i32 = arith.constant 0 : i32
    %c0_i32_0 = arith.constant 0 : i32
    %c0_i32_1 = arith.constant 0 : i32
    return %c0_i32, %c0_i32_0 : i32, i32
  }
  func.func @transform_9(%arg0: i32) -> (i32, i32) {
    %c0_i32 = arith.constant 0 : i32
    %c0_i32_0 = arith.constant 0 : i32
    %c0_i32_1 = arith.constant 0 : i32
    return %c0_i32, %c0_i32_0 : i32, i32
  }
  func.func @transform_10(%arg0: i32) -> (i32, i32) {
    %c0_i32 = arith.constant 0 : i32
    %c0_i32_0 = arith.constant 0 : i32
    %c0_i32_1 = arith.constant 0 : i32
    return %c0_i32, %c0_i32_0 : i32, i32
  }
  func.func @transform_11(%arg0: i32) -> (i32, i32) {
    %c0_i32 = arith.constant 0 : i32
    %c0_i32_0 = arith.constant 0 : i32
    %c0_i32_1 = arith.constant 0 : i32
    return %c0_i32, %c0_i32_0 : i32, i32
  }
  func.func @transform_12(%arg0: i32) -> (i32, i32) {
    %c0_i32 = arith.constant 0 : i32
    %c0_i32_0 = arith.constant 0 : i32
    %c0_i32_1 = arith.constant 0 : i32
    return %c0_i32, %c0_i32_0 : i32, i32
  }
  func.func @transform_13(%arg0: i32) -> (i32, i32) {
    %c0_i32 = arith.constant 0 : i32
    %c0_i32_0 = arith.constant 0 : i32
    %c0_i32_1 = arith.constant 0 : i32
    return %c0_i32, %c0_i32_0 : i32, i32
  }
  func.func @transform_14(%arg0: i32) -> (i32, i32, i32) {
    %c0_i32 = arith.constant 0 : i32
    %c0_i32_0 = arith.constant 0 : i32
    %c0_i32_1 = arith.constant 0 : i32
    %c0_i32_2 = arith.constant 0 : i32
    return %c0_i32, %c0_i32_0, %c0_i32_1 : i32, i32, i32
  }
  func.func @transform_15(%arg0: i32) -> (i32, i32) {
    %c0_i32 = arith.constant 0 : i32
    %c0_i32_0 = arith.constant 0 : i32
    %c0_i32_1 = arith.constant 0 : i32
    return %c0_i32, %c0_i32_0 : i32, i32
  }
  func.func @transform_16(%arg0: i32) -> (i32, i32, i32) {
    %c0_i32 = arith.constant 0 : i32
    %c0_i32_0 = arith.constant 0 : i32
    %c0_i32_1 = arith.constant 0 : i32
    return %arg0, %c0_i32, %c0_i32_0 : i32, i32, i32
  }
}

</mosaic_0001>

<bundles_post_ra>
// kernel: _lambda_.1
= control target key start
LH: loop header
LB: loop body
LE: loop exit
PB: predicated region body
PF: predicated region fallthrough
CT: control target
= control target key end

     0   :  { %s5738_s21 = smov 0   ;;  %s7335_s0 = inlined_call_operand.vmem [shape: bf16[2,72,32], index: 0, kind: input, shape index: {}]   ;;  %s7336_s1 = inlined_call_operand.vmem [shape: bf16[2,90,16], index: 1, kind: input, shape index: {}]   ;;  %s7337_s2 = inlined_call_operand.vmem [shape: bf16[2,90,16], index: 2, kind: input, shape index: {}]   ;;  %s7338_s3 = inlined_call_operand.vmem [shape: bf16[2,90,16], index: 3, kind: input, shape index: {}]   ;;  %s7339_s4 = inlined_call_operand.vmem [shape: bf16[2,90,16], index: 4, kind: input, shape index: {}]   ;;  %s7340_s5 = inlined_call_operand.vmem [shape: f32[72,1], index: 5, kind: input, shape index: {}]   ;;  %s7341_s6 = inlined_call_operand.vmem [shape: bf16[9,16,32], index: 6, kind: input, shape index: {}]   ;;  %s7342_s7 = inlined_call_operand.vmem [shape: f32[1,32], index: 7, kind: input, shape index: {}]   ;;  %s7343_s8 = inlined_call_operand.vmem [shape: bf16[32,16], index: 8, kind: input, shape index: {}]   ;;  %s7344_s9 = inlined_call_operand.vmem [shape: f32[1,16], index: 9, kind: input, shape index: {}]   ;;  %s7345_s10 = inlined_call_operand.vmem [shape: bf16[32,16], index: 10, kind: input, shape index: {}]   ;;  %s7346_s11 = inlined_call_operand.vmem [shape: f32[1,16], index: 11, kind: input, shape index: {}]   ;;  %s7347_s12 = inlined_call_operand.vmem [shape: f32[2,32], index: 12, kind: input, shape index: {}]   ;;  %s7348_s13 = inlined_call_operand.vmem [shape: f32[1,2], index: 13, kind: input, shape index: {}]   ;;  %s7349_s14 = inlined_call_operand.vmem [shape: bf16[9,32,32], index: 14, kind: input, shape index: {}]   ;;  %s7350_s15 = inlined_call_operand.vmem [shape: f32[1,32], index: 15, kind: input, shape index: {}]   ;;  %s7351_s16 = inlined_call_operand.vmem [shape: f32[2,72,32], index: 16, kind: output, shape index: {}]  }
   0x1   :  { %7352 = sst [smem:[#allocation3_spill]] %s7335_s0 }
   0x2 LB: > { %s4650_s22 = sadd.s32 4294967295, %s5648_s21   ;;  %p4654_p0 = scmp.ge.s32.totalorder %s5648_s21, 1  ;;  %s5648_s21 = sphi %s5738_s21, %s26_s21  }
   0x3   : > { %p502_p1 = scmp.lt.s32.totalorder %s5648_s21, 3 }
   0x5   : > { %p503_p2 = pnand %p4654_p0, %p502_p1 }
   0x6   : > { %p572_p3 = scmp.lt.s32.totalorder (!%p503_p2), %s4650_s22, 1  ;;  %s7353_s24 = sld [smem:[#allocation3_spill]] (!%p503_p2) }
   0x7   : > { %506 = sbr.rel (%p503_p2) target bundleno = 1460 (0x5b4), region = 84  ;;  %s5650_s20 = smov (!%p503_p2), 112  }
   0xc   : > { %v5179_v0 = vld [vmem:[%s7341_s6 + $0x8] sm:$0xff]  ;;  %v5174_v1 = vld [vmem:[%s7341_s6] sm:$0xff]  ;;  %v5185_v3 = vld [vmem:[%s7341_s6 + $0x10] sm:$0xff]  ;;  %s7389_s22 = smov (!%p572_p3, %s4650_s22), 1  ;;  %vm655_vm0 = vcmask 130048   ;;  %vm1545_vm2 = vcmask 1046528  }
   0xd   : > { %v5195_v2 = vld [vmem:[%s7341_s6 + $0x20] sm:$0xff]  ;;  %v5190_v4 = vld [vmem:[%s7341_s6 + $0x18] sm:$0xff]  ;;  %678 = vmatpush.bf16.msra.mxu0 %v5179_v0  ;;  %755 = vmatpush.bf16.msra.mxu1 %v5174_v1  ;;  %s5764_s18 = smul.u32 48, %s7389_s22  ;;  %vm819_vm1 = vsmask.f32 7424  ;;  %v5206_v34 = vld [vmem:[%s7341_s6 + $0x30] sm:$0xff] }
   0xe   : > { %887 = vmatpush.bf16.msra.mxu2 %v5185_v3  ;;  %985 = vmatpush.bf16.msra.mxu3 %v5190_v4  ;;  %v5212_v38 = vld [vmem:[%s7341_s6 + $0x38] sm:$0xff]  ;;  %v5201_v39 = vld [vmem:[%s7341_s6 + $0x28] sm:$0xff]  ;;  %v5213_v48 = vld [vmem:[%s7341_s6 + $0x40] sm:$0xff]  ;;  %vm1872_vm3 = vcmask 261120   ;;  %s5362_s30 = smul.u32 72, %s7389_s22 }
   0xf   : > { %s5770_s23 = scalar_lea.vmem %s7336_s1, %s5764_s18  ;;  %s5776_s26 = scalar_lea.vmem %s7337_s2, %s5764_s18 }
  0x10   : > { %v5175_v5 = vld [vmem:[%s5776_s26] sm:$0xff]  ;;  %s5785_s29 = scalar_lea.vmem %s7338_s3, %s5764_s18  ;;  %v5181_v8 = vld [vmem:[%s5770_s23 + $0x8] sm:$0xff]  ;;  %v5182_v17 = vld [vmem:[%s5770_s23 + $0x10] sm:$0xff]  ;;  %s5856_s0 = scalar_lea.vmem %s7339_s4, %s5764_s18 }
  0x11   : > { %1083 = vmatpush.bf16.msrb.mxu0 %v5195_v2  ;;  %v5170_v6 = vld [vmem:[%s5770_s23] sm:$0xff]  ;;  %v828_v12 = vshll.u32 %v5181_v8, 16  ;;  %v5176_v18 = vld [vmem:[%s5776_s26 + $0x8] sm:$0xff]  ;;  %v832_v20 = vshrl.u32 %v5181_v8, 16  ;;  %v836_v21 = vshll.u32 %v5182_v17, 16  ;;  %v5183_v26 = vld [vmem:[%s5770_s23 + $0x18] sm:$0xff]  ;;  %1223 = vmatpush.bf16.msrb.mxu1 %v5201_v39 }
  0x12   : > { %v5180_v7 = vld [vmem:[%s5770_s23] sm:$0xff]  ;;  %4683 = vmatmul.msk.bf16.vlgmr.msra.gmra.mxu0 %vm655_vm0, %v5175_v5  ;;  %4708 = vmatmul.msk.bf16.vlgmr.msra.gmra.mxu1 %vm655_vm0, %v5170_v6  ;;  %v5171_v19 = vld [vmem:[%s5770_s23 + $0x8] sm:$0xff]  ;;  %v5177_v27 = vld [vmem:[%s5776_s26 + $0x10] sm:$0xff]  ;;  %v840_v29 = vshrl.u32 %v5182_v17, 16  ;;  %v844_v30 = vshll.u32 %v5183_v26, 16  ;;  %v848_v43 = vshrl.u32 %v5183_v26, 16 }
  0x13   : > { %v5186_v9 = vld [vmem:[%s5785_s29] sm:$0xff]  ;;  %v821_v10 = vshrl.u32 %v5180_v7, 16  ;;  %v823_v11 = vshll.u32 %v5180_v7, 16  ;;  %v830_v14 = vrot.slane %v828_v12, 1  ;;  %v5187_v22 = vld [vmem:[%s5785_s29 + $0x8] sm:$0xff]  ;;  %v838_v24 = vrot.slane %v836_v21, 1  ;;  %1363 = vmatpush.bf16.msrb.mxu2 %v5206_v34  ;;  %1503 = vmatpush.bf16.msrb.mxu3 %v5212_v38 }
  0x14   : > { %4766 = vmatmul.msk.bf16.vlgmr.msra.gmra.mxu3 %vm655_vm0, %v5186_v9  ;;  %v5172_v28 = vld [vmem:[%s5770_s23 + $0x10] sm:$0xff]  ;;  %v846_v33 = vrot.slane %v844_v30, 1  ;;  %v4733_v36 = vld [vmem:[%s5770_s23 + $0x20] sm:$0xf]  ;;  %v5184_v37 = vld [vmem:[%s5770_s23 + $0x20] sm:$0x10] }
  0x15   : > { %v825_v13 = vrot.slane %v823_v11, 1  ;;  %v834_v23 = vor.u32 %v832_v20, %v830_v14  ;;  %v5188_v31 = vld [vmem:[%s5785_s29 + $0x10] sm:$0xff]  ;;  %v842_v32 = vor.u32 %v840_v29, %v838_v24  ;;  %v4734_v40 = vor.u32 %v5184_v37, %v4733_v36  ;;  %v5178_v41 = vld [vmem:[%s5776_s26 + $0x18] sm:$0xff]  ;;  %1583 = vmatpush.bf16.msra.mxu0 %v5213_v48  ;;  %v622_v50 = vld [vmem:[%s5776_s26 + $0x20] sm:$0xf] }
  0x16   : > { %v5173_v42 = vld [vmem:[%s5770_s23 + $0x18] sm:$0xff]  ;;  %v850_v46 = vor.u32 %v848_v43, %v846_v33  ;;  %v611_v51 = vld [vmem:[%s5770_s23 + $0x20] sm:$0xf]  ;;  %v643_v53 = vunpack.c.l.b16 %v622_v50  ;;  %v1258_v60 = vld [vmem:[%s5770_s23 + $0x4] sm:$0xff]  }
  0x17   : > { %v826_v15 = vor.u32 %v825_v13, %v821_v10  ;;  %v839_v25 = vsel %vm819_vm1, %v834_v23, %v838_v24  ;;  %v847_v35 = vsel %vm819_vm1, %v842_v32, %v846_v33  ;;  %v852_v44 = vshll.u32 %v4734_v40, 16  ;;  %v5189_v45 = vld [vmem:[%s5785_s29 + $0x18] sm:$0xff]  ;;  %v930_v52 = vld [vmem:[%s5785_s29 + $0x20] sm:$0xf]  ;;  %v5840_v61 = vld [vmem:[%s5770_s23 + $0x4] sm:$0xf0] }
  0x18   : > { %v721_v54 = vunpack.c.l.b16 %v611_v51  ;;  %v951_v55 = vunpack.c.l.b16 %v930_v52  ;;  %v648_v56 = vpack.c.b16 %v643_v53, %v643_v53  ;;  %v5196_v59 = vld [vmem:[%s5785_s29] sm:$0xff]  ;;  %v856_v63 = vshrl.u32 %v4734_v40, 16  ;;  %v5197_v0 = vld [vmem:[%s5785_s29 + $0x8] sm:$0xff]  ;;  %v5209_v26 = vld [vmem:[%s5776_s26 + $0x14] sm:$0xff] }
  0x19   : > { %v831_v16 = vsel %vm819_vm1, %v826_v15, %v830_v14  ;;  %v854_v47 = vrot.slane %v852_v44, 1  ;;  %v5207_v62 = vld [vmem:[%s5776_s26 + $0x4] sm:$0xff]  ;;  %v1159_v1 = vshll.u32 %v5196_v59, 16  ;;  %v5208_v2 = vld [vmem:[%s5776_s26 + $0xc] sm:$0xff]  ;;  %v1157_v5 = vshrl.u32 %v5196_v59, 16  ;;  %v5870_v32 = vld [vmem:[%s5770_s23 + $0x14] sm:$0xff] }
  0x1a   : > { %4739 = vmatmul.msk.bf16.vlgmr.msra.gmra.mxu2 %vm655_vm0, %v831_v16  ;;  %v726_v57 = vpack.c.b16 %v721_v54, %v721_v54  ;;  %v956_v58 = vpack.c.b16 %v951_v55, %v951_v55  ;;  %v1439_v3 = vshll.u32 %v5207_v62, 16  ;;  %v1164_v7 = vshll.u32 %v5197_v0, 16  ;;  %v5850_v11 = vld [vmem:[%s5770_s23 + $0xc] sm:$0xff]  ;;  %v5191_v17 = vld [vmem:[%s5856_s0] sm:$0xff]  ;;  %v5199_v44 = vld [vmem:[%s5785_s29 + $0x18] sm:$0xff] }
  0x1b   : > { %v855_v49 = vsel %vm819_vm1, %v850_v46, %v854_v47  ;;  %v858_v4 = vor.u32 %v856_v63, %v854_v47  ;;  %v1161_v6 = vrot.slane %v1159_v1, 1  ;;  %v1437_v8 = vshrl.u32 %v5207_v62, 16  ;;  %v5192_v37 = vld [vmem:[%s5856_s0 + $0x8] sm:$0xff]  ;;  %v5885_v51 = vld [vmem:[%s5770_s23 + $0x1c] sm:$0xff]  ;;  %v5200_v63 = vld [vmem:[%s5785_s29 + $0x20] sm:$0x10] }
  0x1c   : > { %v1441_v9 = vrot.slane %v1439_v3, 1  ;;  %v1444_v10 = vshll.u32 %v5208_v2, 16  ;;  %v1299_v12 = vshll.u32 %v1258_v60, 16  ;;  %v1166_v14 = vrot.slane %v1164_v7, 1  ;;  %v4818_v62 = vld [vmem:[%s5785_s29 + $0x20] sm:$0xf] }
  0x1d   : > { %v1162_v13 = vor.u32 %v1161_v6, %v1157_v5  ;;  %v1304_v20 = vshll.u32 %v5850_v11, 16  ;;  %v1448_v30 = vshrl.u32 %v5208_v2, 16  ;;  %v1308_v38 = vshrl.u32 %v5850_v11, 16  ;;  %v5211_v1 = vld [vmem:[%s5776_s26 + $0x24] sm:$0x10] }
  0x1e   : > { %v1442_v15 = vor.u32 %v1441_v9, %v1437_v8  ;;  %v1446_v16 = vrot.slane %v1444_v10, 1  ;;  %v1312_v39 = vshll.u32 %v5870_v32, 16  ;;  %v1180_v48 = vshll.u32 %v5199_v44, 16  ;;  %v4845_v9 = vld [vmem:[%s5770_s23 + $0x24] sm:$0xf] }
  0x1f   : > { %v1167_v21 = vsel %vm819_vm1, %v1162_v13, %v1166_v14  ;;  %v1306_v24 = vrot.slane %v1304_v20, 1  ;;  %v1184_v7 = vshrl.u32 %v5199_v44, 16  ;;  %v5205_v10 = vld [vmem:[%s5770_s23 + $0x24] sm:$0x10]  ;;  %v1324_v20 = vshrl.u32 %v5885_v51, 16 }
  0x20   : > { %v1314_v43 = vrot.slane %v1312_v39, 1  ;;  %v1182_v53 = vrot.slane %v1180_v48, 1  ;;  %v5637_v48 = vld [vmem:[%s5770_s23 + $0x4] sm:$0xe] }
  0x22   : > { %4684 = vmatmul.msk.bf16.gmra.mxu0 %vm655_vm0, %v5176_v18  ;;  %4709 = vmatmul.msk.bf16.gmra.mxu1 %vm655_vm0, %v5171_v19  ;;  %v1297_v18 = vshrl.u32 %v1258_v60, 16  ;;  %v1301_v19 = vrot.slane %v1299_v12, 1 }
  0x24   : > { %4767 = vmatmul.msk.bf16.gmra.mxu3 %vm655_vm0, %v5187_v22  ;;  %v1447_v22 = vsel %vm819_vm1, %v1442_v15, %v1446_v16  ;;  %v1302_v23 = vor.u32 %v1301_v19, %v1297_v18  ;;  %v1186_v15 = vor.u32 %v1184_v7, %v1182_v53  ;;  %v5194_v19 = vld [vmem:[%s5856_s0 + $0x18] sm:$0xff]  ;;  %v1549_v7 = vrot.slane %v5870_v32, 1 }
  0x2a   : > { %4740 = vmatmul.msk.bf16.gmra.mxu2 %vm655_vm0, %v839_v25  ;;  %v5198_v25 = vld [vmem:[%s5785_s29 + $0x10] sm:$0xff] }
  0x2b   : > { %v1172_v29 = vshll.u32 %v5198_v25, 16  ;;  %v1176_v47 = vshrl.u32 %v5198_v25, 16 }
  0x2d   : > { %v1174_v34 = vrot.slane %v1172_v29, 1 }
  0x2f   : > { %v1178_v52 = vor.u32 %v1176_v47, %v1174_v34 }
  0x31   : > { %v1183_v59 = vsel %vm819_vm1, %v1178_v52, %v1182_v53 }
  0x32   : > { %4685 = vmatmul.msk.bf16.gmra.mxu0 %vm655_vm0, %v5177_v27  ;;  %4710 = vmatmul.msk.bf16.gmra.mxu1 %vm655_vm0, %v5172_v28  ;;  %v1307_v27 = vsel %vm819_vm1, %v1302_v23, %v1306_v24  ;;  %v1168_v28 = vshrl.u32 %v5197_v0, 16  ;;  %v4876_v0 = vld [vmem:[%s5776_s26 + $0x24] sm:$0xf] }
  0x33   : > { %v4877_v5 = vor.u32 %v5211_v1, %v4876_v0 }
  0x34   : > { %4768 = vmatmul.msk.bf16.gmra.mxu3 %vm655_vm0, %v5188_v31  ;;  %v1452_v31 = vshll.u32 %v5209_v26, 16  ;;  %v1170_v33 = vor.u32 %v1168_v28, %v1166_v14  ;;  %v5903_v14 = vor.u32 %v5205_v10, %v4845_v9 }
  0x35   : > { %v1468_v13 = vshll.u32 %v4877_v5, 16 }
  0x36   : > { %v1454_v36 = vrot.slane %v1452_v31, 1  ;;  %v1175_v40 = vsel %vm819_vm1, %v1170_v33, %v1174_v34  ;;  %v1028_v34 = vld [vmem:[%s5856_s0 + $0x20] sm:$0xf] }
  0x37   : > { %v1470_v18 = vrot.slane %v1468_v13, 1 }
  0x3a   : > { %4741 = vmatmul.msk.bf16.gmra.mxu2 %vm655_vm0, %v847_v35  ;;  %v1450_v35 = vor.u32 %v1448_v30, %v1446_v16 }
  0x42   : > { %4686 = vmatmul.msk.bf16.gmra.mxu0 %vm655_vm0, %v5178_v41  ;;  %4711 = vmatmul.msk.bf16.gmra.mxu1 %vm655_vm0, %v5173_v42  ;;  %v1455_v41 = vsel %vm819_vm1, %v1450_v35, %v1454_v36  ;;  %v1310_v42 = vor.u32 %v1308_v38, %v1306_v24  ;;  %v1049_v35 = vunpack.c.l.b16 %v1028_v34 }
  0x44   : > { %4769 = vmatmul.msk.bf16.gmra.mxu3 %vm655_vm0, %v5189_v45  ;;  %v5210_v45 = vld [vmem:[%s5776_s26 + $0x1c] sm:$0xff]  ;;  %v1315_v46 = vsel %vm819_vm1, %v1310_v42, %v1314_v43  ;;  %s5360_s26 = smul.u32 36, %s7389_s22 }
  0x45   : > { %v1460_v50 = vshll.u32 %v5210_v45, 16  ;;  %v1464_v12 = vshrl.u32 %v5210_v45, 16 }
  0x46   : > { %s5982_s25 = scalar_lea.vmem %s7353_s24, %s5360_s26  ;;  %s7279_s26 = scalar_lea.vmem %s7351_s16, %s5362_s30 }
  0x47   : > { %v1462_v55 = vrot.slane %v1460_v50, 1 }
  0x4a   : > { %4742 = vmatmul.msk.bf16.gmra.mxu2 %vm655_vm0, %v855_v49  ;;  %v1456_v49 = vshrl.u32 %v5209_v26, 16 }
  0x4c   : > { %v1458_v54 = vor.u32 %v1456_v49, %v1454_v36  ;;  %v1332_v49 = vshrl.u32 %v5903_v14, 16 }
  0x4e   : > { %v1463_v60 = vsel %vm819_vm1, %v1458_v54, %v1462_v55 }
  0x52   : > { %4687 = vmatmul.msk.bf16.gmra.mxu0 %vm655_vm0, %v648_v56  ;;  %4712 = vmatmul.msk.bf16.gmra.mxu1 %vm655_vm0, %v726_v57  ;;  %v5193_v56 = vld [vmem:[%s5856_s0 + $0x10] sm:$0xff]  ;;  %v1316_v57 = vshrl.u32 %v5870_v32, 16  ;;  %s5652_s0 = smov 127  }
  0x54   : > { %4770 = vmatmul.msk.bf16.gmra.mxu3 %vm655_vm0, %v956_v58  ;;  %v1320_v58 = vshll.u32 %v5885_v51, 16  ;;  %v1318_v2 = vor.u32 %v1316_v57, %v1314_v43 }
  0x56   : > { %v1322_v3 = vrot.slane %v1320_v58, 1  ;;  %v1547_v58 = vrot.slane %v5850_v11, 1 }
  0x58   : > { %v1323_v6 = vsel %vm819_vm1, %v1318_v2, %v1322_v3 }
  0x5a   : > { %4743 = vmatmul.msk.bf16.gmra.mxu2 %vm655_vm0, %v858_v4  ;;  %v4819_v4 = vor.u32 %v5200_v63, %v4818_v62 }
  0x5c   : > { %v1188_v8 = vshll.u32 %v4819_v4, 16  ;;  %v1192_v36 = vshrl.u32 %v4819_v4, 16 }
  0x5e   : > { %v1190_v16 = vrot.slane %v1188_v8, 1 }
  0x60   : > { %v1191_v24 = vsel %vm819_vm1, %v1186_v15, %v1190_v16 }
  0x62   : > { %4793 = vmatmul.msk.bf16.vlgmr.msrb.gmra.mxu0 %vm655_vm0, %v5191_v17  ;;  %4824 = vmatmul.msk.bf16.vlgmr.msrb.gmra.mxu1 %vm655_vm0, %v1167_v21  ;;  %v1466_v17 = vor.u32 %v1464_v12, %v1462_v55  ;;  %v1328_v21 = vshll.u32 %v5903_v14, 16 }
  0x64   : > { %4882 = vmatmul.msk.bf16.vlgmr.msrb.gmra.mxu3 %vm655_vm0, %v1447_v22  ;;  %v1471_v26 = vsel %vm819_vm1, %v1466_v17, %v1470_v18  ;;  %v1330_v28 = vrot.slane %v1328_v21, 1  ;;  %v1551_v21 = vrot.slane %v5885_v51, 1  ;;  %v5218_v51 = vld [vmem:[%s7343_s8] sm:$0xff] }
  0x66   : > { %v1334_v52 = vor.u32 %v1332_v49, %v1330_v28 }
  0x6a   : > { %4851 = vmatmul.msk.bf16.vlgmr.msrb.gmra.mxu2 %vm655_vm0, %v1307_v27  ;;  %v1326_v27 = vor.u32 %v1324_v20, %v1322_v3 }
  0x6c   : > { %v1331_v29 = vsel %vm819_vm1, %v1326_v27, %v1330_v28  ;;  %v1552_v28 = vsel %vm1545_vm2, %v1549_v7, %v1551_v21 }
  0x72   : > { %4794 = vmatmul.msk.bf16.gmra.mxu0 %vm655_vm0, %v5192_v37  ;;  %4825 = vmatmul.msk.bf16.gmra.mxu1 %vm655_vm0, %v1175_v40  ;;  %v1472_v37 = vshrl.u32 %v4877_v5, 16  ;;  %v1054_v40 = vpack.c.b16 %v1049_v35, %v1049_v35 }
  0x74   : > { %4883 = vmatmul.msk.bf16.gmra.mxu3 %vm655_vm0, %v1455_v41  ;;  %v1194_v41 = vor.u32 %v1192_v36, %v1190_v16  ;;  %v1550_v16 = vsel %vm1545_vm2, %v1547_v58, %v1549_v7 }
  0x7a   : > { %4852 = vmatmul.msk.bf16.gmra.mxu2 %vm655_vm0, %v1315_v46  ;;  %v1474_v46 = vor.u32 %v1472_v37, %v1470_v18  ;;  %v1553_v37 = vrot.slane %v5903_v14, 1 }
  0x82   : > { %4795 = vmatmul.msk.bf16.gmra.mxu0 %vm655_vm0, %v5193_v56  ;;  %4826 = vmatmul.msk.bf16.gmra.mxu1 %vm655_vm0, %v1183_v59  ;;  %v5638_v56 = vor.u32 %v5637_v48, %v5840_v61 }
  0x84   : > { %4884 = vmatmul.msk.bf16.gmra.mxu3 %vm655_vm0, %v1463_v60  ;;  %v1546_v57 = vrot.slane %v5638_v56, 1 }
  0x86   : > { %v1548_v2 = vsel %vm1545_vm2, %v1546_v57, %v1547_v58  ;;  %v5215_v58 = vld [vmem:[%s5982_s25 + $0x8] sm:$0xff] }
  0x8a   : > { %4853 = vmatmul.msk.bf16.gmra.mxu2 %vm655_vm0, %v1323_v6  ;;  %v5219_v6 = vld [vmem:[%s7343_s8 + $0x8] sm:$0xff] }
  0x8b   : > { %1894 = vmatpush.bf16.msra.mxu1 %v5219_v6 }
  0x8f   : > { %v680_v22 = vpop.f32.mrf.mxu0  ;;  %v757_v23 = vpop.f32.mrf.mxu1  ;;  %1895 = vmatpush.bf16.msra.mxu1 %v5218_v51 }
  0x90   : > { %v758_v25 = vadd.f32 %v757_v23, %v680_v22 }
  0x92   : > { %4796 = vmatmul.msk.bf16.gmra.mxu0 %vm655_vm0, %v5194_v19  ;;  %4827 = vmatmul.msk.bf16.gmra.mxu1 %vm655_vm0, %v1191_v24 }
  0x94   : > { %4885 = vmatmul.msk.bf16.gmra.mxu3 %vm655_vm0, %v1471_v26 }
  0x97   : > { %v987_v30 = vpop.f32.mrf.mxu3  ;;  %v5914_v31 = vpop.f32.mrf.mxu0 }
  0x98   : > { %v5916_v33 = vpop.f32.mrf.mxu1 }
  0x9a   : > { %4854 = vmatmul.msk.bf16.gmra.mxu2 %vm655_vm0, %v1331_v29 }
  0x9d   : > { %v889_v38 = vpop.f32.mrf.mxu2 }
  0x9e   : > { %v913_v39 = vadd.f32 %v889_v38, %v758_v25 }
  0x9f   : > { %v5920_v42 = vpop.f32.mrf.mxu3  ;;  %v685_v44 = vpop.f32.mrf.mxu0 }
  0xa0   : > { %v5922_v43 = vadd.f32 %v987_v30, %v913_v39  ;;  %v762_v45 = vpop.f32.mrf.mxu1  ;;  %v5214_v39 = vld [vmem:[%s5982_s25] sm:$0xff] }
  0xa1   : > { %v763_v47 = vadd.f32 %v762_v45, %v685_v44 }
  0xa2   : > { %4797 = vmatmul.msk.bf16.gmra.mxu0 %vm655_vm0, %v1054_v40  ;;  %4828 = vmatmul.msk.bf16.gmra.mxu1 %vm655_vm0, %v1194_v41 }
  0xa4   : > { %4886 = vmatmul.msk.bf16.gmra.mxu3 %vm655_vm0, %v1474_v46 }
  0xa5   : > { %v5929_v50 = vpop.f32.mrf.mxu2 }
  0xa7   : > { %v992_v53 = vpop.f32.mrf.mxu3  ;;  %v5931_v54 = vpop.f32.mrf.mxu0 }
  0xa8   : > { %v5933_v55 = vpop.f32.mrf.mxu1 }
  0xaa   : > { %4855 = vmatmul.msk.bf16.gmra.mxu2 %vm655_vm0, %v1334_v52 }
  0xad   : > { %v894_v59 = vpop.f32.mrf.mxu2 }
  0xae   : > { %v915_v60 = vadd.f32 %v894_v59, %v763_v47  ;;  %v1554_v47 = vsel %vm1545_vm2, %v1551_v21, %v1553_v37 }
  0xaf   : > { %v5938_v62 = vpop.f32.mrf.mxu3  ;;  %v690_v0 = vpop.f32.mrf.mxu0 }
  0xb0   : > { %v5940_v63 = vadd.f32 %v992_v53, %v915_v60  ;;  %v767_v1 = vpop.f32.mrf.mxu1  ;;  %v5221_v60 = vld [vmem:[%s7345_s10 + $0x8] sm:$0xff] }
  0xb1   : > { %v768_v3 = vadd.f32 %v767_v1, %v690_v0  ;;  %2147 = vmatpush.bf16.msra.mxu2 %v5221_v60  ;;  %v760_v60 = vadd.f32 %v5916_v33, %v5914_v31 }
  0xb2   : > { %4893 = vmatmul.msk.bf16.vlgmr.msra.gmra.mxu0 %vm655_vm0, %v1548_v2  ;;  %4931 = vmatmul.msk.bf16.vlgmr.msra.gmra.mxu1 %vm1872_vm3, %v5214_v39 }
  0xb5   : > { %v5944_v61 = vpop.f32.mrf.mxu2 }
  0xb7   : > { %v997_v4 = vpop.f32.mrf.mxu3  ;;  %v5946_v5 = vpop.f32.mrf.mxu0 }
  0xb8   : > { %v5948_v11 = vpop.f32.mrf.mxu1 }
  0xbd   : > { %v899_v8 = vpop.f32.mrf.mxu2 }
  0xbe   : > { %v917_v9 = vadd.f32 %v899_v8, %v768_v3 }
  0xbf   : > { %v5954_v10 = vpop.f32.mrf.mxu3  ;;  %v695_v13 = vpop.f32.mrf.mxu0 }
  0xc0   : > { %v5956_v12 = vadd.f32 %v997_v4, %v917_v9  ;;  %v772_v15 = vpop.f32.mrf.mxu1 }
  0xc1   : > { %v773_v17 = vadd.f32 %v772_v15, %v695_v13 }
  0xc2   : > { %4894 = vmatmul.msk.bf16.gmra.mxu0 %vm655_vm0, %v1550_v16  ;;  %4932 = vmatmul.msk.bf16.gmra.mxu1 %vm1872_vm3, %v5215_v58 }
  0xc5   : > { %v5960_v18 = vpop.f32.mrf.mxu2 }
  0xc7   : > { %v1002_v19 = vpop.f32.mrf.mxu3  ;;  %v5962_v20 = vpop.f32.mrf.mxu0 }
  0xc8   : > { %v5964_v32 = vpop.f32.mrf.mxu1 }
  0xcd   : > { %v904_v22 = vpop.f32.mrf.mxu2 }
  0xce   : > { %v919_v23 = vadd.f32 %v904_v22, %v773_v17 }
  0xcf   : > { %v5967_v24 = vpop.f32.mrf.mxu3  ;;  %v700_v26 = vpop.f32.mrf.mxu0 }
  0xd0   : > { %v5969_v25 = vadd.f32 %v1002_v19, %v919_v23  ;;  %v777_v27 = vpop.f32.mrf.mxu1 }
  0xd1   : > { %v778_v29 = vadd.f32 %v777_v27, %v700_v26  ;;  %v5216_v26 = vld [vmem:[%s5982_s25 + $0x10] sm:$0xff] }
  0xd2   : > { %4895 = vmatmul.msk.bf16.gmra.mxu0 %vm655_vm0, %v1552_v28  ;;  %4933 = vmatmul.msk.bf16.gmra.mxu1 %vm1872_vm3, %v5216_v26  ;;  %v5220_v26 = vld [vmem:[%s7345_s10] sm:$0xff] }
  0xd3   : > { %2148 = vmatpush.bf16.msra.mxu2 %v5220_v26 }
  0xd5   : > { %v5973_v30 = vpop.f32.mrf.mxu2 }
  0xd7   : > { %v1007_v34 = vpop.f32.mrf.mxu3  ;;  %v702_v35 = vpop.f32.mrf.mxu0 }
  0xd8   : > { %v779_v36 = vpop.f32.mrf.mxu1 }
  0xdd   : > { %v909_v38 = vpop.f32.mrf.mxu2 }
  0xde   : > { %v921_v40 = vadd.f32 %v909_v38, %v778_v29 }
  0xdf   : > { %v1009_v41 = vpop.f32.mrf.mxu3  ;;  %v1085_v45 = vpop.f32.mrf.mxu0 }
  0xe0   : > { %v1019_v44 = vadd.f32 %v1007_v34, %v921_v40  ;;  %v1225_v46 = vpop.f32.mrf.mxu1  ;;  %v1109_v48 = vadd.f32 %v1085_v45, %v5922_v43  ;;  %v5217_v41 = vld [vmem:[%s5982_s25 + $0x18] sm:$0xff] }
  0xe2   : > { %v1249_v49 = vadd.f32 %v1225_v46, %v1109_v48  ;;  %4896 = vmatmul.msk.bf16.gmra.mxu0 %vm655_vm0, %v1554_v47  ;;  %4934 = vmatmul.msk.bf16.gmra.mxu1 %vm1872_vm3, %v5217_v41 }
  0xe5   : > { %v911_v14 = vpop.f32.mrf.mxu2 }
  0xe7   : > { %v1505_v52 = vpop.f32.mrf.mxu3  ;;  %v1087_v53 = vpop.f32.mrf.mxu0 }
  0xe8   : > { %v5990_v56 = vpop.f32.mrf.mxu1 }
  0xed   : > { %v1365_v57 = vpop.f32.mrf.mxu2 }
  0xee   : > { %v1389_v59 = vadd.f32 %v1365_v57, %v1249_v49 }
  0xef   : > { %v5996_v0 = vpop.f32.mrf.mxu3  ;;  %v1090_v1 = vpop.f32.mrf.mxu0 }
  0xf0   : > { %v1529_v43 = vadd.f32 %v1505_v52, %v1389_v59  ;;  %v1230_v2 = vpop.f32.mrf.mxu1  ;;  %v1111_v3 = vadd.f32 %v1090_v1, %v5940_v63 }
  0xf2   : > { %v1251_v4 = vadd.f32 %v1230_v2, %v1111_v3  ;;  %4897 = vmatmul.msk.bf16.gmra.mxu0 %vm655_vm0, %v1553_v37  ;;  %v914_v2 = vadd.f32 %v5929_v50, %v760_v60 }
  0xf5   : > { %v1367_v6 = vpop.f32.mrf.mxu2 }
  0xf7   : > { %v1510_v7 = vpop.f32.mrf.mxu3  ;;  %v6001_v8 = vpop.f32.mrf.mxu0 }
  0xf8   : > { %v6003_v9 = vpop.f32.mrf.mxu1 }
  0xfd   : > { %v1370_v13 = vpop.f32.mrf.mxu2 }
  0xfe   : > { %v1391_v15 = vadd.f32 %v1370_v13, %v1251_v4  ;;  %v1012_v13 = vadd.f32 %v5920_v42, %v914_v2 }
  0xff   : > { %v6005_v16 = vpop.f32.mrf.mxu3  ;;  %v1095_v19 = vpop.f32.mrf.mxu0 }
 0x100   : > { %v6007_v17 = vadd.f32 %v1510_v7, %v1391_v15  ;;  %v1235_v21 = vpop.f32.mrf.mxu1  ;;  %v1113_v63 = vadd.f32 %v1095_v19, %v5956_v12  ;;  %v1110_v15 = vadd.f32 %v1087_v53, %v1012_v13 }
 0x102   : > { %v1253_v22 = vadd.f32 %v1235_v21, %v1113_v63  ;;  %v1250_v33 = vadd.f32 %v5990_v56, %v1110_v15 }
 0x104   : > { %v1390_v42 = vadd.f32 %v1367_v6, %v1250_v33 }
 0x105   : > { %v6010_v23 = vpop.f32.mrf.mxu2 }
 0x106   : > { %v1530_v56 = vadd.f32 %v5996_v0, %v1390_v42 }
 0x107   : > { %v1515_v27 = vpop.f32.mrf.mxu3  ;;  %v6014_v28 = vpop.f32.mrf.mxu0 }
 0x108   : > { %v6016_v29 = vpop.f32.mrf.mxu1 }
 0x10d   : > { %v1375_v34 = vpop.f32.mrf.mxu2 }
 0x10e   : > { %v1393_v35 = vadd.f32 %v1375_v34, %v1253_v22 }
 0x10f   : > { %v6018_v36 = vpop.f32.mrf.mxu3  ;;  %v1100_v37 = vpop.f32.mrf.mxu0 }
 0x110   : > { %v6020_v51 = vadd.f32 %v1515_v27, %v1393_v35  ;;  %v1240_v12 = vpop.f32.mrf.mxu1  ;;  %v1115_v38 = vadd.f32 %v1100_v37, %v5969_v25  ;;  %v765_v27 = vadd.f32 %v5933_v55, %v5931_v54 }
 0x112   : > { %v1255_v39 = vadd.f32 %v1240_v12, %v1115_v38  ;;  %v916_v37 = vadd.f32 %v5944_v61, %v765_v27  ;;  %v775_v27 = vadd.f32 %v5964_v32, %v5962_v20 }
 0x114   : > { %v1014_v6 = vadd.f32 %v5938_v62, %v916_v37 }
 0x115   : > { %v6023_v40 = vpop.f32.mrf.mxu2 }
 0x116   : > { %v1112_v41 = vadd.f32 %v6001_v8, %v1014_v6  ;;  %v770_v8 = vadd.f32 %v5948_v11, %v5946_v5 }
 0x117   : > { %v1520_v45 = vpop.f32.mrf.mxu3  ;;  %v6027_v46 = vpop.f32.mrf.mxu0 }
 0x118   : > { %v6029_v47 = vpop.f32.mrf.mxu1  ;;  %v1252_v0 = vadd.f32 %v6003_v9, %v1112_v41  ;;  %v918_v9 = vadd.f32 %v5960_v18, %v770_v8 }
 0x11a   : > { %v1392_v62 = vadd.f32 %v6010_v23, %v1252_v0  ;;  %v1016_v13 = vadd.f32 %v5954_v10, %v918_v9 }
 0x11c   : > { %v1114_v15 = vadd.f32 %v6014_v28, %v1016_v13 }
 0x11d   : > { %v1380_v48 = vpop.f32.mrf.mxu2 }
 0x11e   : > { %v1395_v49 = vadd.f32 %v1380_v48, %v1255_v39  ;;  %v1254_v33 = vadd.f32 %v6016_v29, %v1114_v15 }
 0x11f   : > { %v6031_v14 = vpop.f32.mrf.mxu3  ;;  %v1105_v57 = vpop.f32.mrf.mxu0 }
 0x120   : > { %v6033_v52 = vadd.f32 %v1520_v45, %v1395_v49  ;;  %v1245_v58 = vpop.f32.mrf.mxu1  ;;  %v1117_v25 = vadd.f32 %v1105_v57, %v1019_v44  ;;  %v6044_v44 = vld [vmem:[%s7342_s7] ss:$0 sm:$0xff] }
 0x121   : > { %v1819_v45 = vld [vmem:[%s5982_s25 + $0x20] sm:$0xf] }
 0x122   : > { %v1257_v59 = vadd.f32 %v1245_v58, %v1117_v25  ;;  %v1854_v49 = vunpack.c.l.b16 %v1819_v45 }
 0x124   : > { %v1859_v58 = vpack.c.b16 %v1854_v49, %v1854_v49 }
 0x125   : > { %v6037_v1 = vpop.f32.mrf.mxu2 }
 0x126   : > { %4935 = vmatmul.msk.bf16.gmra.mxu1 %vm1872_vm3, %v1859_v58 }
 0x127   : > { %v1525_v3 = vpop.f32.mrf.mxu3  ;;  %v1107_v4 = vpop.f32.mrf.mxu0 }
 0x128   : > { %v1247_v7 = vpop.f32.mrf.mxu1 }
 0x12d   : > { %v1385_v19 = vpop.f32.mrf.mxu2 }
 0x12e   : > { %v1397_v21 = vadd.f32 %v1385_v19, %v1257_v59 }
 0x12f   : > { %v1527_v63 = vpop.f32.mrf.mxu3  ;;  %v1585_v31 = vpop.f32.mrf.mxu0 }
 0x130   : > { %v6046_v22 = vadd.f32 %v1525_v3, %v1397_v21  ;;  %v1609_v50 = vadd.f32 %v1585_v31, %v1529_v43 }
 0x132   : > { %v6053_v53 = vadd.f32 %v6044_v44, %v1609_v50 }
 0x134   : > { %v4898_v34 = vmul.f32 -1.442695, %v6053_v53 }
 0x135   : > { %v1387_v35 = vpop.f32.mrf.mxu2 }
 0x136   : > { %5382 = vpow2.f32 %v4898_v34  ;;  %v1394_v34 = vadd.f32 %v6023_v40, %v1254_v33 }
 0x137   : > { %v1587_v43 = vpop.f32.mrf.mxu0 }
 0x138   : > { %v1610_v12 = vadd.f32 %v1587_v43, %v1530_v56  ;;  %v1534_v41 = vadd.f32 %v6018_v36, %v1394_v34 }
 0x13a   : > { %v6062_v38 = vadd.f32 %v6044_v44, %v1610_v12 }
 0x13c   : > { %v5383_v39 = vpop.eup %5382  ;;  %v4899_v54 = vmul.f32 -1.442695, %v6062_v38 }
 0x13d   : > { %v1658_v55 = vadd.f32 1.0, %v5383_v39 }
 0x13e   : > { %5384 = vpow2.f32 %v4899_v54 }
 0x13f   : > { %5386 = vrcp.f32 %v1658_v55  ;;  %v1590_v61 = vpop.f32.mrf.mxu0  ;;  %v1678_v50 = vand.u32 2147483648, %v1658_v55  ;;  %vm1672_vm5 = vweird.f32 %v1658_v55  ;;  %v1676_v26 = vand.u32 2147483647, %v1658_v55 }
 0x140   : > { %v1611_v48 = vadd.f32 %v1590_v61, %v6007_v17  ;;  %v1532_v17 = vadd.f32 %v6005_v16, %v1392_v62 }
 0x141   : > { %v1679_v6 = vor.u32 1.1754944e-38, %v1678_v50  ;;  %vm1677_vm8 = vcmp.eq.f32.partialorder %v1676_v26, 8.507059e+37  ;;  %v2354_v26 = vld [vmem:[%s7347_s12] sm:$0x3] }
 0x142   : > { %v6071_v57 = vadd.f32 %v6044_v44, %v1611_v48  ;;  %v6167_v35 = vperm.slane %v2354_v26, 1 }
 0x144   : > { %v5385_v25 = vpop.eup %5384  ;;  %v4900_v59 = vmul.f32 -1.442695, %v6071_v57  ;;  %2492 = vrot.lane.b32.xlu0 %v6167_v35, %s5650_s20 }
 0x145   : > { %v5387_v60 = vpop.eup %5386  ;;  %v1659_v2 = vadd.f32 1.0, %v5385_v25 }
 0x146   : > { %v1668_v3 = vmul.f32 %v5387_v60, %v1658_v55  ;;  %5388 = vpow2.f32 %v4900_v59  ;;  %vm1673_vm4 = vweird.f32 %v5387_v60 }
 0x147   : > { %5390 = vrcp.f32 %v1659_v2  ;;  %v1592_v23 = vpop.f32.mrf.mxu0  ;;  %vm6093_vm6 = vmor %vm1672_vm5, %vm1673_vm4  ;;  %v1691_v37 = vand.u32 2147483647, %v1659_v2  ;;  %v1693_v29 = vand.u32 2147483648, %v1659_v2  ;;  %vm1687_vm9 = vweird.f32 %v1659_v2 }
 0x148   : > { %v1669_v4 = vsub.f32 1.0, %v1668_v3  ;;  %v1612_v7 = vadd.f32 %v1592_v23, %v1532_v17 }
 0x149   : > { %v1694_v55 = vor.u32 1.1754944e-38, %v1693_v29  ;;  %vm1692_vm11 = vcmp.eq.f32.partialorder %v1691_v37, 8.507059e+37 }
 0x14a   : > { %v1670_v5 = vmul.f32 %v5387_v60, %v1669_v4  ;;  %v6081_v11 = vadd.f32 %v6044_v44, %v1612_v7 }
 0x14c   : > { %v5389_v19 = vpop.eup %5388  ;;  %v4901_v18 = vmul.f32 -1.442695, %v6081_v11  ;;  %v1671_v16 = vadd.f32 %v5387_v60, %v1670_v5 }
 0x14d   : > { %v5391_v21 = vpop.eup %5390  ;;  %v6085_v63 = vadd.f32 1.0, %v5389_v19 }
 0x14e   : > { %v1683_v31 = vmul.f32 %v5391_v21, %v1659_v2  ;;  %5392 = vpow2.f32 %v4901_v18  ;;  %v1675_v56 = vsel %vm6093_vm6, %v5387_v60, %v1671_v16  ;;  %vm1688_vm7 = vweird.f32 %v5391_v21  ;;  %v1897_v2 = vpop.f32.mrf.mxu1 }
 0x14f   : > { %5394 = vrcp.f32 %v6085_v63  ;;  %v1595_v10 = vpop.f32.mrf.mxu0  ;;  %v1680_v54 = vsel %vm1677_vm8, %v1679_v6, %v1675_v56  ;;  %vm1689_vm10 = vmor %vm1687_vm9, %vm1688_vm7  ;;  %v1706_v5 = vand.u32 2147483647, %v6085_v63  ;;  %v1708_v15 = vand.u32 2147483648, %v6085_v63 }
 0x150   : > { %v1684_v42 = vsub.f32 1.0, %v1683_v31  ;;  %v1613_v28 = vadd.f32 %v1595_v10, %v6020_v51  ;;  %v920_v51 = vadd.f32 %v5973_v30, %v775_v27  ;;  %v6114_v62 = vmul.f32 %v1680_v54, %v6053_v53  ;;  %v6129_v53 = vld [vmem:[%s7344_s9] ss:$0 sm:$0xff] }
 0x151   : > { %v6137_v23 = vadd.f32 %v6129_v53, %v1897_v2  ;;  %vm1702_vm13 = vweird.f32 %v6085_v63  ;;  %vm1707_vm4 = vcmp.eq.f32.partialorder %v1706_v5, 8.507059e+37  ;;  %v1709_v10 = vor.u32 1.1754944e-38, %v1708_v15 }
 0x152   : > { %v1685_v43 = vmul.f32 %v5391_v21, %v1684_v42  ;;  %v6100_v12 = vadd.f32 %v6044_v44, %v1613_v28  ;;  %v1018_v0 = vadd.f32 %v5967_v24, %v920_v51 }
 0x153   : > { %v4936_v31 = vmul.f32 -1.442695, %v6137_v23 }
 0x154   : > { %v5393_v20 = vpop.eup %5392  ;;  %v1686_v32 = vadd.f32 %v5391_v21, %v1685_v43  ;;  %v4902_v40 = vmul.f32 -1.442695, %v6100_v12  ;;  %v1116_v25 = vadd.f32 %v6027_v46, %v1018_v0 }
 0x155   : > { %v6104_v39 = vpop.eup %5394  ;;  %v6107_v45 = vadd.f32 1.0, %v5393_v20 }
 0x156   : > { %v1690_v61 = vsel %vm1689_vm10, %v5391_v21, %v1686_v32  ;;  %v1698_v30 = vmul.f32 %v6104_v39, %v6085_v63  ;;  %5396 = vpow2.f32 %v4902_v40  ;;  %v1256_v17 = vadd.f32 %v6029_v47, %v1116_v25  ;;  %v1899_v34 = vpop.f32.mrf.mxu1 }
 0x157   : > { %v1695_v48 = vsel %vm1692_vm11, %v1694_v55, %v1690_v61  ;;  %5398 = vrcp.f32 %v6107_v45  ;;  %v1597_v49 = vpop.f32.mrf.mxu0  ;;  %vm1703_vm12 = vweird.f32 %v6104_v39  ;;  %v1721_v16 = vand.u32 2147483647, %v6107_v45 }
 0x158   : > { %v6117_v36 = vmul.f32 %v1695_v48, %v6062_v38  ;;  %v1699_v58 = vsub.f32 1.0, %v1698_v30  ;;  %v1614_v8 = vadd.f32 %v1597_v49, %v1534_v41  ;;  %v1396_v13 = vadd.f32 %v6037_v1, %v1256_v17  ;;  %vm6148_vm14 = vmor %vm1702_vm13, %vm1703_vm12 }
 0x159   : > { %v1723_v1 = vand.u32 2147483648, %v6107_v45  ;;  %vm1717_vm5 = vweird.f32 %v6107_v45  ;;  %v6173_v43 = vadd.f32 %v6129_v53, %v1899_v34  ;;  %vm1722_vm7 = vcmp.eq.f32.partialorder %v1721_v16, 8.507059e+37 }
 0x15a   : > { %v2101_v59 = vpack.c.bf16 %v6117_v36, %v6114_v62  ;;  %v1700_v60 = vmul.f32 %v6104_v39, %v1699_v58  ;;  %v6124_v24 = vadd.f32 %v6044_v44, %v1614_v8  ;;  %v6196_v8 = vperm.slane %v2354_v26, 0 }
 0x15c   : > { %v5397_v9 = vpop.eup %5396  ;;  %v4903_v38 = vmul.f32 -1.442695, %v6124_v24  ;;  %4953 = vmatmul.msk.bf16.vlgmr.msra.gmra.mxu2 %vm1872_vm3, %v2101_v59  ;;  %v1701_v4 = vadd.f32 %v6104_v39, %v1700_v60  ;;  %2394 = vrot.lane.b32.xlu0 %v6196_v8, %s5650_s20 }
 0x15d   : > { %v5399_v46 = vpop.eup %5398  ;;  %v6134_v3 = vadd.f32 1.0, %v5397_v9 }
 0x15e   : > { %v1713_v7 = vmul.f32 %v5399_v46, %v6107_v45  ;;  %5400 = vpow2.f32 %v4903_v38  ;;  %v1705_v33 = vsel %vm6148_vm14, %v6104_v39, %v1701_v4  ;;  %vm1718_vm15 = vweird.f32 %v5399_v46  ;;  %v1902_v2 = vpop.f32.mrf.mxu1 }
 0x15f   : > { %5402 = vrcp.f32 %v6134_v3  ;;  %v1600_v47 = vpop.f32.mrf.mxu0  ;;  %v1710_v29 = vsel %vm1707_vm4, %v1709_v10, %v1705_v33  ;;  %vm1719_vm6 = vmor %vm1717_vm5, %vm1718_vm15  ;;  %v4937_v45 = vmul.f32 -1.442695, %v6173_v43  ;;  %vm1732_vm9 = vweird.f32 %v6134_v3 }
 0x160   : > { %v1714_v19 = vsub.f32 1.0, %v1713_v7  ;;  %v1615_v18 = vadd.f32 %v1600_v47, %v6033_v52  ;;  %v1536_v52 = vadd.f32 %v6031_v14, %v1396_v13  ;;  %5404 = vpow2.f32 %v4936_v31 }
 0x161   : > { %v1724_v14 = vor.u32 1.1754944e-38, %v1723_v1  ;;  %v6180_v40 = vmul.f32 %v1710_v29, %v6071_v57  ;;  %v1736_v59 = vand.u32 2147483647, %v6134_v3  ;;  %v6246_v29 = vadd.f32 %v6129_v53, %v1902_v2 }
 0x162   : > { %v1715_v50 = vmul.f32 %v5399_v46, %v1714_v19  ;;  %v6159_v63 = vadd.f32 %v6044_v44, %v1615_v18 }
 0x163   : > { %vm1737_vm11 = vcmp.eq.f32.partialorder %v1736_v59, 8.507059e+37 }
 0x164   : > { %v5401_v42 = vpop.eup %5400  ;;  %v1716_v28 = vadd.f32 %v5399_v46, %v1715_v50  ;;  %v4904_v27 = vmul.f32 -1.442695, %v6159_v63 }
 0x165   : > { %v5403_v37 = vpop.eup %5402  ;;  %v6170_v56 = vadd.f32 1.0, %v5401_v42 }
 0x166   : > { %v1720_v51 = vsel %vm1719_vm6, %v5399_v46, %v1716_v28  ;;  %v1728_v6 = vmul.f32 %v5403_v37, %v6134_v3  ;;  %5406 = vpow2.f32 %v4904_v27  ;;  %v5405_v55 = vpop.eup %5404  ;;  %vm1733_vm8 = vweird.f32 %v5403_v37 }
 0x167   : > { %v1725_v20 = vsel %vm1722_vm7, %v1724_v14, %v1720_v51  ;;  %5408 = vrcp.f32 %v6170_v56  ;;  %v1602_v32 = vpop.f32.mrf.mxu0  ;;  %v6191_v48 = vadd.f32 1.0, %v5405_v55  ;;  %vm6203_vm10 = vmor %vm1732_vm9, %vm1733_vm8  ;;  %v1751_v17 = vand.u32 2147483647, %v6170_v56 }
 0x168   : > { %v6183_v39 = vmul.f32 %v1725_v20, %v6081_v11  ;;  %v1729_v41 = vsub.f32 1.0, %v1728_v6  ;;  %v1616_v54 = vadd.f32 %v1602_v32, %v1536_v52  ;;  %5410 = vpow2.f32 %v4937_v45  ;;  %v1904_v20 = vpop.f32.mrf.mxu1 }
 0x169   : > { %v1738_v11 = vand.u32 2147483648, %v6134_v3  ;;  %5412 = vrcp.f32 %v6191_v48  ;;  %v1753_v3 = vand.u32 2147483648, %v6170_v56  ;;  %vm1747_vm13 = vweird.f32 %v6170_v56 }
 0x16a   : > { %v1730_v61 = vmul.f32 %v5403_v37, %v1729_v41  ;;  %v6187_v30 = vadd.f32 %v6044_v44, %v1616_v54  ;;  %v2102_v0 = vpack.c.bf16 %v6183_v39, %v6180_v40  ;;  %vm6220_vm14 = vcmp.eq.f32.partialorder %v1751_v17, 8.507059e+37 }
 0x16b   : > { %v1739_v7 = vor.u32 1.1754944e-38, %v1738_v11  ;;  %v1754_v1 = vor.u32 1.1754944e-38, %v1753_v3  ;;  %vm1962_vm4 = vweird.f32 %v6191_v48  ;;  %v1966_v34 = vand.u32 2147483647, %v6191_v48 }
 0x16c   : > { %v5407_v57 = vpop.eup %5406  ;;  %v1731_v49 = vadd.f32 %v5403_v37, %v1730_v61  ;;  %v4905_v58 = vmul.f32 -1.442695, %v6187_v30  ;;  %4954 = vmatmul.msk.bf16.gmra.mxu2 %vm1872_vm3, %v2102_v0  ;;  %v4938_v61 = vmul.f32 -1.442695, %v6246_v29  ;;  %v6266_v0 = vadd.f32 %v6129_v53, %v1904_v20 }
 0x16d   : > { %v5409_v25 = vpop.eup %5408  ;;  %v6200_v60 = vadd.f32 1.0, %v5407_v57  ;;  %vm6272_vm9 = vcmp.eq.f32.partialorder %v1966_v34, 8.507059e+37 }
 0x16e   : > { %v1743_v38 = vmul.f32 %v5409_v25, %v6170_v56  ;;  %5414 = vpow2.f32 %v4905_v58  ;;  %v1735_v46 = vsel %vm6203_vm10, %v5403_v37, %v1731_v49  ;;  %v5411_v15 = vpop.eup %5410  ;;  %vm1748_vm12 = vweird.f32 %v5409_v25 }
 0x16f   : > { %5416 = vrcp.f32 %v6200_v60  ;;  %v1605_v4 = vpop.f32.mrf.mxu0  ;;  %v1740_v47 = vsel %vm1737_vm11, %v1739_v7, %v1735_v46  ;;  %v5413_v21 = vpop.eup %5412  ;;  %v6224_v31 = vadd.f32 1.0, %v5411_v15  ;;  %v1766_v50 = vand.u32 2147483647, %v6200_v60  ;;  %vm1749_vm15 = vmor %vm1747_vm13, %vm1748_vm12 }
 0x170   : > { %v1744_v13 = vsub.f32 1.0, %v1743_v38  ;;  %v1617_v5 = vadd.f32 %v1605_v4, %v6046_v22  ;;  %v1958_v10 = vmul.f32 %v5413_v21, %v6191_v48  ;;  %v6232_v26 = vmul.f32 %v1740_v47, %v6100_v12 }
 0x171   : > { %5418 = vrcp.f32 %v6224_v31  ;;  %v1968_v12 = vand.u32 2147483648, %v6191_v48  ;;  %vm1963_vm5 = vweird.f32 %v5413_v21  ;;  %vm1762_vm6 = vweird.f32 %v6200_v60 }
 0x172   : > { %v1745_v19 = vmul.f32 %v5409_v25, %v1744_v13  ;;  %v6217_v18 = vadd.f32 %v6044_v44, %v1617_v5  ;;  %v1959_v6 = vsub.f32 1.0, %v1958_v10  ;;  %v1768_v45 = vand.u32 2147483648, %v6200_v60  ;;  %vm6260_vm7 = vmor %vm1962_vm4, %vm1963_vm5 }
 0x173   : > { %vm6268_vm8 = vcmp.eq.f32.partialorder %v1766_v50, 8.507059e+37  ;;  %v1969_v48 = vor.u32 1.1754944e-38, %v1968_v12  ;;  %v4939_v38 = vmul.f32 -1.442695, %v6266_v0  ;;  %vm1977_vm11 = vweird.f32 %v6224_v31 }
 0x174   : > { %v5415_v33 = vpop.eup %5414  ;;  %v1746_v22 = vadd.f32 %v5409_v25, %v1745_v19  ;;  %v4906_v52 = vmul.f32 -1.442695, %v6217_v18  ;;  %v1960_v41 = vmul.f32 %v5413_v21, %v1959_v6  ;;  %v1769_v3 = vor.u32 1.1754944e-38, %v1768_v45 }
 0x175   : > { %v6229_v44 = vpop.eup %5416  ;;  %v6234_v42 = vadd.f32 1.0, %v5415_v33  ;;  %v1981_v5 = vand.u32 2147483647, %v6224_v31  ;;  %v1983_v15 = vand.u32 2147483648, %v6224_v31 }
 0x176   : > { %v1750_v28 = vsel %vm1749_vm15, %v5409_v25, %v1746_v22  ;;  %v1758_v27 = vmul.f32 %v6229_v44, %v6200_v60  ;;  %5420 = vpow2.f32 %v4906_v52  ;;  %v1961_v11 = vadd.f32 %v5413_v21, %v1960_v41  ;;  %v1907_v52 = vpop.f32.mrf.mxu1 }
 0x177   : > { %v1755_v37 = vsel %vm6220_vm14, %v1754_v1, %v1750_v28  ;;  %5422 = vrcp.f32 %v6234_v42  ;;  %v1607_v14 = vpop.f32.mrf.mxu0  ;;  %v6254_v55 = vpop.eup %5418  ;;  %vm1763_vm10 = vweird.f32 %v6229_v44  ;;  %v1783_v4 = vand.u32 2147483648, %v6234_v42 }
 0x178   : > { %v6249_v56 = vmul.f32 %v1755_v37, %v6124_v24  ;;  %v1759_v51 = vsub.f32 1.0, %v1758_v27  ;;  %v1973_v9 = vmul.f32 %v6254_v55, %v6224_v31  ;;  %5424 = vpow2.f32 %v4938_v61  ;;  %vm6296_vm12 = vmor %vm1762_vm6, %vm1763_vm10 }
 0x179   : > { %v1965_v17 = vsel %vm6260_vm7, %v5413_v21, %v1961_v11  ;;  %vm1978_vm13 = vweird.f32 %v6254_v55  ;;  %v1781_v33 = vand.u32 2147483647, %v6234_v42  ;;  %vm1777_vm15 = vweird.f32 %v6234_v42 }
 0x17a   : > { %v1760_v32 = vmul.f32 %v6229_v44, %v1759_v51  ;;  %v2103_v54 = vpack.c.bf16 %v6249_v56, %v6232_v26  ;;  %v1970_v13 = vsel %vm6272_vm9, %v1969_v48, %v1965_v17  ;;  %v1974_v21 = vsub.f32 1.0, %v1973_v9  ;;  %vm6311_vm4 = vmor %vm1977_vm11, %vm1978_vm13 }
 0x17b   : > { %v2092_v19 = vmul.f32 %v1970_v13, %v6137_v23  ;;  %v1784_v60 = vor.u32 1.1754944e-38, %v1783_v4  ;;  %vm6315_vm5 = vcmp.eq.f32.partialorder %v1981_v5, 8.507059e+37  ;;  %v1984_v27 = vor.u32 1.1754944e-38, %v1983_v15 }
 0x17c   : > { %v5421_v57 = vpop.eup %5420  ;;  %4955 = vmatmul.msk.bf16.gmra.mxu2 %vm1872_vm3, %v2103_v54  ;;  %v1761_v2 = vadd.f32 %v6229_v44, %v1760_v32  ;;  %v1975_v50 = vmul.f32 %v6254_v55, %v1974_v21  ;;  %v6327_v14 = vadd.f32 %v6129_v53, %v1907_v52  ;;  %vm1782_vm7 = vcmp.eq.f32.partialorder %v1781_v33, 8.507059e+37 }
 0x17d   : > { %v5423_v25 = vpop.eup %5422  ;;  %v6277_v59 = vadd.f32 1.0, %v5421_v57  ;;  %v2455_v23 = vmul.f32 %v6167_v35, %v2092_v19 }
 0x17e   : > { %v1773_v46 = vmul.f32 %v5423_v25, %v6234_v42  ;;  %v1765_v16 = vsel %vm6296_vm12, %v6229_v44, %v1761_v2  ;;  %vm1778_vm14 = vweird.f32 %v5423_v25  ;;  %v5425_v22 = vpop.eup %5424  ;;  %v1976_v12 = vadd.f32 %v6254_v55, %v1975_v50 }
 0x17f   : > { %5426 = vrcp.f32 %v6277_v59  ;;  %v1950_v34 = vadd.f32 1.0, %v5425_v22  ;;  %v1770_v37 = vsel %vm6268_vm8, %v1769_v3, %v1765_v16  ;;  %vm1779_vm6 = vmor %vm1777_vm15, %vm1778_vm14  ;;  %v2464_v31 = vsel %vm655_vm0, %v2455_v23, 0.0 }
 0x180   : > { %v1774_v7 = vsub.f32 1.0, %v1773_v46  ;;  %5428 = vpow2.f32 %v4939_v38  ;;  %2465 = vadd.xlane.f32.xlu1 %v2464_v31  ;;  %v1980_v41 = vsel %vm6311_vm4, %v6254_v55, %v1976_v12  ;;  %v6335_v54 = vmul.f32 %v1770_v37, %v6159_v63  ;;  %v1909_v63 = vpop.f32.mrf.mxu1 }
 0x181   : > { %5430 = vrcp.f32 %v1950_v34  ;;  %v1985_v61 = vsel %vm6315_vm5, %v1984_v27, %v1980_v41  ;;  %v4940_v11 = vmul.f32 -1.442695, %v6327_v14  ;;  %v6356_v9 = vadd.f32 %v6129_v53, %v1909_v63 }
 0x182   : > { %v1775_v1 = vmul.f32 %v5423_v25, %v1774_v7  ;;  %v2093_v57 = vmul.f32 %v1985_v61, %v6173_v43  ;;  %v1796_v38 = vand.u32 2147483647, %v6277_v59  ;;  %v1798_v2 = vand.u32 2147483648, %v6277_v59 }
 0x183   : > { %v1996_v17 = vand.u32 2147483647, %v1950_v34  ;;  %vm1792_vm9 = vweird.f32 %v6277_v59  ;;  %v1998_v3 = vand.u32 2147483648, %v1950_v34  ;;  %v4941_v7 = vmul.f32 -1.442695, %v6356_v9 }
 0x184   : > { %v1776_v10 = vadd.f32 %v5423_v25, %v1775_v1  ;;  %v2456_v43 = vmul.f32 %v6167_v35, %v2093_v57  ;;  %vm1992_vm11 = vweird.f32 %v1950_v34  ;;  %v2358_v47 = vmul.f32 %v6196_v8, %v2093_v57 }
 0x185   : > { %v6319_v42 = vpop.eup %5426  ;;  %vm1797_vm13 = vcmp.eq.f32.partialorder %v1796_v38, 8.507059e+37  ;;  %v1799_v21 = vor.u32 1.1754944e-38, %v1798_v2  ;;  %vm6374_vm14 = vcmp.eq.f32.partialorder %v1996_v17, 8.507059e+37 }
 0x186   : > { %v1780_v51 = vsel %vm1779_vm6, %v5423_v25, %v1776_v10  ;;  %v1788_v6 = vmul.f32 %v6319_v42, %v6277_v59  ;;  %v5429_v20 = vpop.eup %5428  ;;  %vm1793_vm8 = vweird.f32 %v6319_v42  ;;  %v2467_v4 = vsel %vm655_vm0, %v2456_v43, 0.0 }
 0x187   : > { %v1785_v32 = vsel %vm1782_vm7, %v1784_v60, %v1780_v51  ;;  %v6343_v49 = vadd.f32 1.0, %v5429_v20  ;;  %v5431_v48 = vpop.eup %5430  ;;  %vm6365_vm10 = vmor %vm1792_vm9, %vm1793_vm8  ;;  %v1999_v60 = vor.u32 1.1754944e-38, %v1998_v3 }
 0x188   : > { %v6338_v45 = vmul.f32 %v1785_v32, %v6187_v30  ;;  %v1789_v24 = vsub.f32 1.0, %v1788_v6  ;;  %v2357_v30 = vmul.f32 %v6196_v8, %v2092_v19  ;;  %v1988_v46 = vmul.f32 %v5431_v48, %v1950_v34  ;;  %2468 = vadd.xlane.f32.xlu1 %v2467_v4  ;;  %v1912_v27 = vpop.f32.mrf.mxu1 }
 0x189   : > { %5432 = vrcp.f32 %v6343_v49  ;;  %vm1993_vm12 = vweird.f32 %v5431_v48  ;;  %vm2007_vm4 = vweird.f32 %v6343_v49  ;;  %v2011_v23 = vand.u32 2147483647, %v6343_v49 }
 0x18a   : > { %v2104_v58 = vpack.c.bf16 %v6338_v45, %v6335_v54  ;;  %v1790_v55 = vmul.f32 %v6319_v42, %v1789_v24  ;;  %5434 = vpow2.f32 %v4940_v11  ;;  %v1989_v5 = vsub.f32 1.0, %v1988_v46  ;;  %vm6378_vm15 = vmor %vm1992_vm11, %vm1993_vm12 }
 0x18b   : > { %v2366_v15 = vsel %vm655_vm0, %v2357_v30, 0.0  ;;  %5436 = vpow2.f32 %v4941_v7  ;;  %v2013_v28 = vand.u32 2147483648, %v6343_v49  ;;  %v6388_v37 = vadd.f32 %v6129_v53, %v1912_v27 }
 0x18c   : > { %v1791_v25 = vadd.f32 %v6319_v42, %v1790_v55  ;;  %4956 = vmatmul.msk.bf16.gmra.mxu2 %vm1872_vm3, %v2104_v58  ;;  %2367 = vadd.xlane.f32.xlu2 %v2366_v15  ;;  %v1990_v16 = vmul.f32 %v5431_v48, %v1989_v5  ;;  %vm2012_vm7 = vcmp.eq.f32.partialorder %v2011_v23, 8.507059e+37 }
 0x18d   : > { %v4942_v32 = vmul.f32 -1.442695, %v6388_v37  ;;  %v2014_v24 = vor.u32 1.1754944e-38, %v2013_v28 }
 0x18e   : > { %v1795_v59 = vsel %vm6365_vm10, %v6319_v42, %v1791_v25  ;;  %v1991_v10 = vadd.f32 %v5431_v48, %v1990_v16  ;;  %v2369_v42 = vsel %vm655_vm0, %v2358_v47, 0.0 }
 0x18f   : > { %v5433_v19 = vpop.eup %5432  ;;  %v1800_v52 = vsel %vm1797_vm13, %v1799_v21, %v1795_v59 }
 0x190   : > { %v5435_v33 = vpop.eup %5434  ;;  %v2003_v50 = vmul.f32 %v5433_v19, %v6343_v49  ;;  %vm2008_vm5 = vweird.f32 %v5433_v19  ;;  %v1995_v12 = vsel %vm6378_vm15, %v5431_v48, %v1991_v10  ;;  %v6393_v51 = vmul.f32 %v1800_v52, %v6217_v18  ;;  %2370 = vadd.xlane.f32.xlu1 %v2369_v42  ;;  %v1914_v48 = vpop.f32.mrf.mxu1 }
 0x191   : > { %v1952_v44 = vadd.f32 1.0, %v5435_v33  ;;  %v5437_v31 = vpop.eup %5436  ;;  %v2000_v6 = vsel %vm6374_vm14, %v1999_v60, %v1995_v12  ;;  %vm2009_vm6 = vmor %vm2007_vm4, %vm2008_vm5  ;;  %v6408_v38 = vadd.f32 %v6129_v53, %v1914_v48 }
 0x192   : > { %v2004_v34 = vsub.f32 1.0, %v2003_v50  ;;  %v2094_v41 = vmul.f32 %v2000_v6, %v6246_v29  ;;  %v1953_v61 = vadd.f32 1.0, %v5437_v31  ;;  %v2105_v18 = vpack.c.bf16 %v6393_v51, %v6393_v51 }
 0x193   : > { %5438 = vrcp.f32 %v1952_v44  ;;  %v2026_v58 = vand.u32 2147483647, %v1952_v44  ;;  %v2028_v29 = vand.u32 2147483648, %v1952_v44  ;;  %vm2022_vm8 = vweird.f32 %v1952_v44 }
 0x194   : > { %v2005_v20 = vmul.f32 %v5433_v19, %v2004_v34  ;;  %5440 = vpow2.f32 %v4942_v32  ;;  %v2457_v55 = vmul.f32 %v6167_v35, %v2094_v41  ;;  %v2359_v2 = vmul.f32 %v6196_v8, %v2094_v41 }
 0x195   : > { %5442 = vrcp.f32 %v1953_v61  ;;  %vm6411_vm10 = vcmp.eq.f32.partialorder %v2026_v58, 8.507059e+37  ;;  %v2029_v7 = vor.u32 1.1754944e-38, %v2028_v29  ;;  %vm2037_vm11 = vweird.f32 %v1953_v61 }
 0x196   : > { %v2006_v57 = vadd.f32 %v5433_v19, %v2005_v20  ;;  %v2470_v43 = vsel %vm655_vm0, %v2457_v55, 0.0  ;;  %v4943_v5 = vmul.f32 -1.442695, %v6408_v38  ;;  %v2041_v47 = vand.u32 2147483647, %v1953_v61 }
 0x197   : > { %2471 = vadd.xlane.f32.xlu0 %v2470_v43  ;;  %v2043_v21 = vand.u32 2147483648, %v1953_v61  ;;  %v2372_v16 = vsel %vm655_vm0, %v2359_v2, 0.0 }
 0x198   : > { %v2010_v11 = vsel %vm2009_vm6, %v5433_v19, %v2006_v57  ;;  %vm2042_vm15 = vcmp.eq.f32.partialorder %v2041_v47, 8.507059e+37 }
 0x199   : > { %v5439_v63 = vpop.eup %5438  ;;  %v2015_v30 = vsel %vm2012_vm7, %v2014_v24, %v2010_v11  ;;  %v2044_v52 = vor.u32 1.1754944e-38, %v2043_v21 }
 0x19a   : > { %v2095_v49 = vmul.f32 %v2015_v30, %v6266_v0  ;;  %v2018_v25 = vmul.f32 %v5439_v63, %v1952_v44  ;;  %v5441_v46 = vpop.eup %5440  ;;  %vm2023_vm9 = vweird.f32 %v5439_v63 }
 0x19b   : > { %v5443_v4 = vpop.eup %5442  ;;  %v1954_v13 = vadd.f32 1.0, %v5441_v46  ;;  %vm2024_vm12 = vmor %vm2022_vm8, %vm2023_vm9 }
 0x19c   : > { %4957 = vmatmul.msk.bf16.gmra.mxu2 %vm1872_vm3, %v2105_v18  ;;  %v2019_v17 = vsub.f32 1.0, %v2018_v25  ;;  %v2458_v0 = vmul.f32 %v6167_v35, %v2095_v49  ;;  %v2033_v59 = vmul.f32 %v5443_v4, %v1953_v61  ;;  %v2360_v1 = vmul.f32 %v6196_v8, %v2095_v49 }
 0x19d   : > { %5444 = vrcp.f32 %v1954_v13  ;;  %vm2038_vm13 = vweird.f32 %v5443_v4  ;;  %vm2052_vm4 = vweird.f32 %v1954_v13  ;;  %v2058_v24 = vand.u32 2147483648, %v1954_v13 }
 0x19e   : > { %v2020_v15 = vmul.f32 %v5439_v63, %v2019_v17  ;;  %v2473_v19 = vsel %vm655_vm0, %v2458_v0, 0.0  ;;  %v2034_v22 = vsub.f32 1.0, %v2033_v59  ;;  %5446 = vpow2.f32 %v4943_v5  ;;  %vm2039_vm14 = vmor %vm2037_vm11, %vm2038_vm13 }
 0x19f   : > { %2474 = vadd.xlane.f32.xlu1 %v2473_v19  ;;  %2373 = vadd.xlane.f32.xlu0 %v2372_v16  ;;  %v2375_v44 = vsel %vm655_vm0, %v2360_v1, 0.0  ;;  %v2056_v57 = vand.u32 2147483647, %v1954_v13 }
 0x1a0   : > { %v2021_v33 = vadd.f32 %v5439_v63, %v2020_v15  ;;  %v2035_v50 = vmul.f32 %v5443_v4, %v2034_v22 }
 0x1a1   : > { %vm2057_vm7 = vcmp.eq.f32.partialorder %v2056_v57, 8.507059e+37 }
 0x1a2   : > { %v2025_v60 = vsel %vm2024_vm12, %v5439_v63, %v2021_v33  ;;  %v2036_v28 = vadd.f32 %v5443_v4, %v2035_v50  ;;  %v2059_v63 = vor.u32 1.1754944e-38, %v2058_v24 }
 0x1a3   : > { %v2030_v23 = vsel %vm6411_vm10, %v2029_v7, %v2025_v60  ;;  %v5445_v27 = vpop.eup %5444  ;;  %v1917_v1 = vpop.f32.mrf.mxu1 }
 0x1a4   : > { %v2096_v10 = vmul.f32 %v2030_v23, %v6327_v14  ;;  %v5447_v34 = vpop.eup %5446  ;;  %v2040_v42 = vsel %vm2039_vm14, %v5443_v4, %v2036_v28  ;;  %v2048_v12 = vmul.f32 %v5445_v27, %v1954_v13  ;;  %vm2053_vm5 = vweird.f32 %v5445_v27 }
 0x1a5   : > { %v2045_v31 = vsel %vm2042_vm15, %v2044_v52, %v2040_v42  ;;  %v1955_v6 = vadd.f32 1.0, %v5447_v34  ;;  %vm2054_vm6 = vmor %vm2052_vm4, %vm2053_vm5  ;;  %v1918_v33 = vadd.f32 %v6129_v53, %v1917_v1 }
 0x1a6   : > { %v2459_v20 = vmul.f32 %v6167_v35, %v2096_v10  ;;  %v2097_v32 = vmul.f32 %v2045_v31, %v6356_v9  ;;  %v2049_v41 = vsub.f32 1.0, %v2048_v12  ;;  %v2361_v14 = vmul.f32 %v6196_v8, %v2096_v10  ;;  %v6449_v31 = vld [vmem:[%s7346_s11] ss:$0 sm:$0xff] }
 0x1a7   : > { %2376 = vadd.xlane.f32.xlu1 %v2375_v44  ;;  %5448 = vrcp.f32 %v1955_v6  ;;  %v2073_v43 = vand.u32 2147483648, %v1955_v6  ;;  %vm2067_vm8 = vweird.f32 %v1955_v6  ;;  %v2071_v46 = vand.u32 2147483647, %v1955_v6 }
 0x1a8   : > { %v2050_v61 = vmul.f32 %v5445_v27, %v2049_v41  ;;  %v2476_v18 = vsel %vm655_vm0, %v2459_v20, 0.0  ;;  %v2378_v58 = vsel %vm655_vm0, %v2361_v14, 0.0  ;;  %v2362_v55 = vmul.f32 %v6196_v8, %v2097_v32 }
 0x1a9   : > { %2477 = vadd.xlane.f32.xlu2 %v2476_v18  ;;  %v2460_v48 = vmul.f32 %v6167_v35, %v2097_v32  ;;  %v2074_v4 = vor.u32 1.1754944e-38, %v2073_v43  ;;  %vm2072_vm11 = vcmp.eq.f32.partialorder %v2071_v46, 8.507059e+37  ;;  %v4944_v60 = vmul.f32 -1.442695, %v1918_v33 }
 0x1aa   : > { %v2051_v11 = vadd.f32 %v5445_v27, %v2050_v61  ;;  %v2381_v49 = vsel %vm655_vm0, %v2362_v55, 0.0 }
 0x1ab   : > { %v2479_v0 = vsel %vm655_vm0, %v2460_v48, 0.0  ;;  %5450 = vpow2.f32 %v4944_v60  ;;  %v1919_v50 = vpop.f32.mrf.mxu1 }
 0x1ac   : > { %v2055_v30 = vsel %vm2054_vm6, %v5445_v27, %v2051_v11 }
 0x1ad   : > { %v5449_v9 = vpop.eup %5448  ;;  %v2060_v25 = vsel %vm2057_vm7, %v2059_v63, %v2055_v30 }
 0x1ae   : > { %v2063_v29 = vmul.f32 %v5449_v9, %v1955_v6  ;;  %vm2068_vm9 = vweird.f32 %v5449_v9  ;;  %v2098_v17 = vmul.f32 %v2060_v25, %v6388_v37 }
 0x1af   : > { %2379 = vadd.xlane.f32.xlu1 %v2378_v58  ;;  %vm2069_vm10 = vmor %vm2067_vm8, %vm2068_vm9 }
 0x1b0   : > { %v2064_v2 = vsub.f32 1.0, %v2063_v29  ;;  %v2363_v5 = vmul.f32 %v6196_v8, %v2098_v17  ;;  %v2461_v47 = vmul.f32 %v6167_v35, %v2098_v17 }
 0x1b1   : > { %2382 = vadd.xlane.f32.xlu2 %v2381_v49  ;;  %v5451_v23 = vpop.eup %5450 }
 0x1b2   : > { %v2065_v3 = vmul.f32 %v5449_v9, %v2064_v2  ;;  %v2384_v19 = vsel %vm655_vm0, %v2363_v5, 0.0  ;;  %v2482_v21 = vsel %vm655_vm0, %v2461_v47, 0.0  ;;  %v1956_v52 = vadd.f32 1.0, %v5451_v23 }
 0x1b4   : > { %v2066_v7 = vadd.f32 %v5449_v9, %v2065_v3  ;;  %5452 = vrcp.f32 %v1956_v52  ;;  %v2088_v44 = vand.u32 2147483648, %v1956_v52  ;;  %vm2082_vm12 = vweird.f32 %v1956_v52 }
 0x1b5   : > { %v2086_v34 = vand.u32 2147483647, %v1956_v52 }
 0x1b6   : > { %v2070_v13 = vsel %vm2069_vm10, %v5449_v9, %v2066_v7  ;;  %v2089_v53 = vor.u32 1.1754944e-38, %v2088_v44 }
 0x1b7   : > { %2480 = vadd.xlane.f32.xlu1 %v2479_v0  ;;  %v2075_v15 = vsel %vm2072_vm11, %v2074_v4, %v2070_v13  ;;  %vm2087_vm15 = vcmp.eq.f32.partialorder %v2086_v34, 8.507059e+37  ;;  %v6468_v4 = vpop.permute.xlu0 %2492 }
 0x1b8   : > { %v2099_v59 = vmul.f32 %v2075_v15, %v6408_v38 }
 0x1b9   : > { %2483 = vadd.xlane.f32.xlu2 %v2482_v21 }
 0x1ba   : > { %v2462_v37 = vmul.f32 %v6167_v35, %v2099_v59  ;;  %v2364_v22 = vmul.f32 %v6196_v8, %v2099_v59  ;;  %v5453_v10 = vpop.eup %5452 }
 0x1bb   : > { %v2078_v28 = vmul.f32 %v5453_v10, %v1956_v52  ;;  %vm2083_vm13 = vweird.f32 %v5453_v10 }
 0x1bc   : > { %v2485_v16 = vsel %vm655_vm0, %v2462_v37, 0.0  ;;  %v2387_v38 = vsel %vm655_vm0, %v2364_v22, 0.0  ;;  %vm2084_vm14 = vmor %vm2082_vm12, %vm2083_vm13 }
 0x1bd   : > { %2486 = vadd.xlane.f32.xlu0 %v2485_v16  ;;  %v2079_v27 = vsub.f32 1.0, %v2078_v28 }
 0x1bf   : > { %2385 = vadd.xlane.f32.xlu1 %v2384_v19  ;;  %v2080_v42 = vmul.f32 %v5453_v10, %v2079_v27 }
 0x1c1   : > { %v2081_v12 = vadd.f32 %v5453_v10, %v2080_v42 }
 0x1c3   : > { %v2085_v6 = vsel %vm2084_vm14, %v5453_v10, %v2081_v12 }
 0x1c4   : > { %v2090_v20 = vsel %vm2087_vm15, %v2089_v53, %v2085_v6 }
 0x1c5   : > { %v6451_v41 = vmul.f32 %v2090_v20, %v1918_v33 }
 0x1c7   : > { %2388 = vadd.xlane.f32.xlu1 %v2387_v38  ;;  %v2463_v61 = vmul.f32 %v6167_v35, %v6451_v41 }
 0x1c9   : > { %v2488_v57 = vsel %vm655_vm0, %v2463_v61, 0.0 }
 0x1ce   : > { %v6477_v53 = vpop.permute.xlu0 %2394 }
 0x1cf   : > { %2489 = vadd.xlane.f32.xlu1 %v2488_v57 }
 0x1df   : > { %v2150_v32 = vpop.f32.mrf.mxu2 }
 0x1e0   : > { %v2151_v14 = vadd.f32 %v6449_v31, %v2150_v32 }
 0x1e2   : > { %v4958_v24 = vmul.f32 -1.442695, %v2151_v14 }
 0x1e4   : > { %5454 = vpow2.f32 %v4958_v24 }
 0x1e7   : > { %v2152_v18 = vpop.f32.mrf.mxu2 }
 0x1e8   : > { %v6458_v11 = vadd.f32 %v6449_v31, %v2152_v18 }
 0x1ea   : > { %v5455_v58 = vpop.eup %5454  ;;  %v4959_v55 = vmul.f32 -1.442695, %v6458_v11 }
 0x1eb   : > { %v2201_v63 = vadd.f32 1.0, %v5455_v58 }
 0x1ec   : > { %5456 = vpow2.f32 %v4959_v55 }
 0x1ed   : > { %5458 = vrcp.f32 %v2201_v63  ;;  %v2221_v2 = vand.u32 2147483648, %v2201_v63  ;;  %v2219_v3 = vand.u32 2147483647, %v2201_v63  ;;  %vm2215_vm5 = vweird.f32 %v2201_v63 }
 0x1ef   : > { %v2155_v30 = vpop.f32.mrf.mxu2  ;;  %v2222_v59 = vor.u32 1.1754944e-38, %v2221_v2  ;;  %vm2220_vm7 = vcmp.eq.f32.partialorder %v2219_v3, 8.507059e+37 }
 0x1f0   : > { %v6462_v9 = vadd.f32 %v6449_v31, %v2155_v30 }
 0x1f2   : > { %v5457_v29 = vpop.eup %5456  ;;  %v4960_v35 = vmul.f32 -1.442695, %v6462_v9 }
 0x1f3   : > { %v5459_v48 = vpop.eup %5458  ;;  %v2202_v49 = vadd.f32 1.0, %v5457_v29 }
 0x1f4   : > { %v2211_v25 = vmul.f32 %v5459_v48, %v2201_v63  ;;  %5460 = vpow2.f32 %v4960_v35  ;;  %vm2216_vm4 = vweird.f32 %v5459_v48 }
 0x1f5   : > { %5462 = vrcp.f32 %v2202_v49  ;;  %vm2217_vm6 = vmor %vm2215_vm5, %vm2216_vm4  ;;  %v2234_v33 = vand.u32 2147483647, %v2202_v49  ;;  %v2236_v22 = vand.u32 2147483648, %v2202_v49  ;;  %vm2230_vm9 = vweird.f32 %v2202_v49 }
 0x1f6   : > { %v2212_v43 = vsub.f32 1.0, %v2211_v25 }
 0x1f7   : > { %v2157_v46 = vpop.f32.mrf.mxu2  ;;  %v2237_v34 = vor.u32 1.1754944e-38, %v2236_v22  ;;  %vm2235_vm11 = vcmp.eq.f32.partialorder %v2234_v33, 8.507059e+37 }
 0x1f8   : > { %v2213_v17 = vmul.f32 %v5459_v48, %v2212_v43  ;;  %v6466_v0 = vadd.f32 %v6449_v31, %v2157_v46 }
 0x1fa   : > { %v5461_v7 = vpop.eup %5460  ;;  %v2214_v13 = vadd.f32 %v5459_v48, %v2213_v17  ;;  %v4961_v5 = vmul.f32 -1.442695, %v6466_v0 }
 0x1fb   : > { %v5463_v15 = vpop.eup %5462  ;;  %v2203_v47 = vadd.f32 1.0, %v5461_v7 }
 0x1fc   : > { %v2218_v19 = vsel %vm2217_vm6, %v5459_v48, %v2214_v13  ;;  %v2226_v37 = vmul.f32 %v5463_v15, %v2202_v49  ;;  %5464 = vpow2.f32 %v4961_v5  ;;  %vm2231_vm8 = vweird.f32 %v5463_v15 }
 0x1fd   : > { %v2223_v21 = vsel %vm2220_vm7, %v2222_v59, %v2218_v19  ;;  %5466 = vrcp.f32 %v2203_v47  ;;  %vm2232_vm10 = vmor %vm2230_vm9, %vm2231_vm8  ;;  %vm2245_vm13 = vweird.f32 %v2203_v47  ;;  %v2249_v55 = vand.u32 2147483647, %v2203_v47 }
 0x1fe   : > { %v2345_v16 = vmul.f32 %v2223_v21, %v2151_v14  ;;  %v2227_v1 = vsub.f32 1.0, %v2226_v37  ;;  %v2251_v63 = vand.u32 2147483648, %v2203_v47 }
 0x1ff   : > { %v2160_v60 = vpop.f32.mrf.mxu2  ;;  %vm2250_vm15 = vcmp.eq.f32.partialorder %v2249_v55, 8.507059e+37 }
 0x200   : > { %v2228_v38 = vmul.f32 %v5463_v15, %v2227_v1  ;;  %v6472_v50 = vadd.f32 %v6449_v31, %v2160_v60  ;;  %v2495_v23 = vmul.f32 %v6468_v4, %v2345_v16  ;;  %v2397_v24 = vmul.f32 %v6477_v53, %v2345_v16 }
 0x201   : > { %v2252_v46 = vor.u32 1.1754944e-38, %v2251_v63 }
 0x202   : > { %v5465_v52 = vpop.eup %5464  ;;  %v2229_v10 = vadd.f32 %v5463_v15, %v2228_v38  ;;  %v4962_v28 = vmul.f32 -1.442695, %v6472_v50  ;;  %v2504_v44 = vsel %vm655_vm0, %v2495_v23, 0.0  ;;  %v2406_v48 = vsel %vm655_vm0, %v2397_v24, 0.0 }
 0x203   : > { %v5467_v27 = vpop.eup %5466  ;;  %v2204_v42 = vadd.f32 1.0, %v5465_v52  ;;  %2505 = vadd.xlane.f32.xlu2 %v2504_v44 }
 0x204   : > { %v2233_v12 = vsel %vm2232_vm10, %v5463_v15, %v2229_v10  ;;  %v2241_v6 = vmul.f32 %v5467_v27, %v2203_v47  ;;  %5468 = vpow2.f32 %v4962_v28  ;;  %vm2246_vm12 = vweird.f32 %v5467_v27 }
 0x205   : > { %v2238_v20 = vsel %vm2235_vm11, %v2237_v34, %v2233_v12  ;;  %5470 = vrcp.f32 %v2204_v42  ;;  %vm2247_vm14 = vmor %vm2245_vm13, %vm2246_vm12  ;;  %v2266_v13 = vand.u32 2147483648, %v2204_v42  ;;  %v2264_v59 = vand.u32 2147483647, %v2204_v42 }
 0x206   : > { %v2346_v32 = vmul.f32 %v2238_v20, %v6458_v11  ;;  %v2242_v14 = vsub.f32 1.0, %v2241_v6  ;;  %vm2260_vm5 = vweird.f32 %v2204_v42 }
 0x207   : > { %v2162_v61 = vpop.f32.mrf.mxu2  ;;  %v2267_v22 = vor.u32 1.1754944e-38, %v2266_v13  ;;  %vm2265_vm7 = vcmp.eq.f32.partialorder %v2264_v59, 8.507059e+37 }
 0x208   : > { %v2243_v57 = vmul.f32 %v5467_v27, %v2242_v14  ;;  %v6482_v18 = vadd.f32 %v6449_v31, %v2162_v61  ;;  %v2398_v58 = vmul.f32 %v6477_v53, %v2346_v32  ;;  %v2496_v3 = vmul.f32 %v6468_v4, %v2346_v32 }
 0x20a   : > { %v5469_v30 = vpop.eup %5468  ;;  %v2244_v29 = vadd.f32 %v5467_v27, %v2243_v57  ;;  %v4963_v35 = vmul.f32 -1.442695, %v6482_v18  ;;  %v2409_v11 = vsel %vm655_vm0, %v2398_v58, 0.0  ;;  %v2507_v1 = vsel %vm655_vm0, %v2496_v3, 0.0 }
 0x20b   : > { %v5471_v49 = vpop.eup %5470  ;;  %v2205_v25 = vadd.f32 1.0, %v5469_v30  ;;  %2410 = vadd.xlane.f32.xlu1 %v2409_v11  ;;  %2407 = vadd.xlane.f32.xlu2 %v2406_v48 }
 0x20c   : > { %v2248_v43 = vsel %vm2247_vm14, %v5467_v27, %v2244_v29  ;;  %v2256_v2 = vmul.f32 %v5471_v49, %v2204_v42  ;;  %5472 = vpow2.f32 %v4963_v35  ;;  %vm2261_vm4 = vweird.f32 %v5471_v49 }
 0x20d   : > { %5474 = vrcp.f32 %v2205_v25  ;;  %v2253_v7 = vsel %vm2250_vm15, %v2252_v46, %v2248_v43  ;;  %vm2262_vm6 = vmor %vm2260_vm5, %vm2261_vm4  ;;  %v2279_v44 = vand.u32 2147483647, %v2205_v25  ;;  %v2281_v27 = vand.u32 2147483648, %v2205_v25 }
 0x20e   : > { %v2257_v17 = vsub.f32 1.0, %v2256_v2  ;;  %v2347_v37 = vmul.f32 %v2253_v7, %v6462_v9  ;;  %vm2275_vm9 = vweird.f32 %v2205_v25 }
 0x20f   : > { %v2165_v5 = vpop.f32.mrf.mxu2  ;;  %v2282_v58 = vor.u32 1.1754944e-38, %v2281_v27  ;;  %vm2280_vm11 = vcmp.eq.f32.partialorder %v2279_v44, 8.507059e+37 }
 0x210   : > { %v2258_v15 = vmul.f32 %v5471_v49, %v2257_v17  ;;  %v6490_v47 = vadd.f32 %v6449_v31, %v2165_v5  ;;  %v2497_v9 = vmul.f32 %v6468_v4, %v2347_v37 }
 0x212   : > { %v5473_v19 = vpop.eup %5472  ;;  %v2259_v21 = vadd.f32 %v5471_v49, %v2258_v15  ;;  %v4964_v16 = vmul.f32 -1.442695, %v6490_v47  ;;  %v2510_v61 = vsel %vm655_vm0, %v2497_v9, 0.0 }
 0x213   : > { %v5475_v33 = vpop.eup %5474  ;;  %v2206_v60 = vadd.f32 1.0, %v5473_v19  ;;  %2508 = vadd.xlane.f32.xlu2 %v2507_v1 }
 0x214   : > { %v2263_v38 = vsel %vm2262_vm6, %v5471_v49, %v2259_v21  ;;  %v2271_v23 = vmul.f32 %v5475_v33, %v2205_v25  ;;  %5476 = vpow2.f32 %v4964_v16  ;;  %vm2276_vm8 = vweird.f32 %v5475_v33  ;;  %v6514_v16 = vpop.xlane.xlu1 %2465 }
 0x215   : > { %v2268_v52 = vsel %vm2265_vm7, %v2267_v22, %v2263_v38  ;;  %5478 = vrcp.f32 %v2206_v60  ;;  %vm2277_vm10 = vmor %vm2275_vm9, %vm2276_vm8  ;;  %v2399_v49 = vmul.f32 %v6477_v53, %v2347_v37  ;;  %v2294_v25 = vand.u32 2147483647, %v2206_v60 }
 0x216   : > { %v2348_v10 = vmul.f32 %v2268_v52, %v6466_v0  ;;  %v2272_v28 = vsub.f32 1.0, %v2271_v23  ;;  %v2296_v43 = vand.u32 2147483648, %v2206_v60  ;;  %vm2290_vm13 = vweird.f32 %v2206_v60 }
 0x217   : > { %v2167_v34 = vpop.f32.mrf.mxu2  ;;  %vm2295_vm15 = vcmp.eq.f32.partialorder %v2294_v25, 8.507059e+37 }
 0x218   : > { %v2273_v42 = vmul.f32 %v5475_v33, %v2272_v28  ;;  %v6498_v12 = vadd.f32 %v6449_v31, %v2167_v34  ;;  %v2400_v6 = vmul.f32 %v6477_v53, %v2348_v10  ;;  %v2498_v20 = vmul.f32 %v6468_v4, %v2348_v10 }
 0x219   : > { %v2297_v59 = vor.u32 1.1754944e-38, %v2296_v43 }
 0x21a   : > { %v5477_v32 = vpop.eup %5476  ;;  %v2274_v14 = vadd.f32 %v5475_v33, %v2273_v42  ;;  %v4965_v0 = vmul.f32 -1.442695, %v6498_v12  ;;  %v2415_v24 = vsel %vm655_vm0, %v2400_v6, 0.0  ;;  %v2513_v63 = vsel %vm655_vm0, %v2498_v20, 0.0 }
 0x21b   : > { %v5479_v57 = vpop.eup %5478  ;;  %v2207_v55 = vadd.f32 1.0, %v5477_v32  ;;  %2416 = vadd.xlane.f32.xlu0 %v2415_v24  ;;  %2511 = vadd.xlane.f32.xlu2 %v2510_v61 }
 0x21c   : > { %v2278_v30 = vsel %vm2277_vm10, %v5475_v33, %v2274_v14  ;;  %v2286_v29 = vmul.f32 %v5479_v57, %v2206_v60  ;;  %5480 = vpow2.f32 %v4965_v0  ;;  %2514 = vadd.xlane.f32.xlu1 %v2513_v63  ;;  %vm2291_vm12 = vweird.f32 %v5479_v57  ;;  %v2469_v24 = vpop.xlane.xlu1 %2468 }
 0x21d   : > { %v2283_v35 = vsel %vm2280_vm11, %v2282_v58, %v2278_v30  ;;  %5482 = vrcp.f32 %v2207_v55  ;;  %vm2292_vm14 = vmor %vm2290_vm13, %vm2291_vm12  ;;  %v2311_v60 = vand.u32 2147483648, %v2207_v55  ;;  %v2309_v52 = vand.u32 2147483647, %v2207_v55 }
 0x21e   : > { %v2349_v11 = vmul.f32 %v2283_v35, %v6472_v50  ;;  %v2287_v48 = vsub.f32 1.0, %v2286_v29  ;;  %v2412_v50 = vsel %vm655_vm0, %v2399_v49, 0.0  ;;  %vm2305_vm5 = vweird.f32 %v2207_v55 }
 0x21f   : > { %v2170_v2 = vpop.f32.mrf.mxu2  ;;  %v2312_v34 = vor.u32 1.1754944e-38, %v2311_v60  ;;  %vm2310_vm7 = vcmp.eq.f32.partialorder %v2309_v52, 8.507059e+37 }
 0x220   : > { %v2288_v46 = vmul.f32 %v5479_v57, %v2287_v48  ;;  %v6509_v17 = vadd.f32 %v6449_v31, %v2170_v2  ;;  %v2401_v3 = vmul.f32 %v6477_v53, %v2349_v11  ;;  %v2499_v22 = vmul.f32 %v6468_v4, %v2349_v11 }
 0x222   : > { %v5481_v7 = vpop.eup %5480  ;;  %v2289_v13 = vadd.f32 %v5479_v57, %v2288_v46  ;;  %v2418_v5 = vsel %vm655_vm0, %v2401_v3, 0.0  ;;  %v2516_v44 = vsel %vm655_vm0, %v2499_v22, 0.0 }
 0x223   : > { %v5483_v15 = vpop.eup %5482  ;;  %v2208_v19 = vadd.f32 1.0, %v5481_v7  ;;  %2419 = vadd.xlane.f32.xlu0 %v2418_v5  ;;  %2413 = vadd.xlane.f32.xlu2 %v2412_v50 }
 0x224   : > { %v2293_v37 = vsel %vm2292_vm14, %v5479_v57, %v2289_v13  ;;  %v2301_v21 = vmul.f32 %v5483_v15, %v2207_v55  ;;  %vm2306_vm4 = vweird.f32 %v5483_v15  ;;  %v6529_v25 = vpop.xlane.xlu1 %2370 }
 0x225   : > { %v2298_v31 = vsel %vm2295_vm15, %v2297_v59, %v2293_v37  ;;  %5484 = vrcp.f32 %v2208_v19  ;;  %vm2307_vm6 = vmor %vm2305_vm5, %vm2306_vm4  ;;  %v2326_v0 = vand.u32 2147483648, %v2208_v19  ;;  %v2324_v57 = vand.u32 2147483647, %v2208_v19 }
 0x226   : > { %v2350_v1 = vmul.f32 %v2298_v31, %v6482_v18  ;;  %v2302_v33 = vsub.f32 1.0, %v2301_v21  ;;  %vm2320_vm9 = vweird.f32 %v2208_v19  ;;  %v6556_v31 = vld [vmem:[%s7348_s13] ss:$0 sm:$0xff] }
 0x227   : > { %v2172_v38 = vpop.f32.mrf.mxu2  ;;  %v2327_v29 = vor.u32 1.1754944e-38, %v2326_v0  ;;  %vm2325_vm11 = vcmp.eq.f32.partialorder %v2324_v57, 8.507059e+37 }
 0x228   : > { %v2303_v23 = vmul.f32 %v5483_v15, %v2302_v33  ;;  %v2500_v10 = vmul.f32 %v6468_v4, %v2350_v1  ;;  %v2402_v14 = vmul.f32 %v6477_v53, %v2350_v1 }
 0x22a   : > { %v2304_v28 = vadd.f32 %v5483_v15, %v2303_v23  ;;  %v2519_v9 = vsel %vm655_vm0, %v2500_v10, 0.0  ;;  %v2421_v30 = vsel %vm655_vm0, %v2402_v14, 0.0  ;;  %v5651_v10 = vmov 0  }
 0x22b   : > { %v5485_v27 = vpop.eup %5484  ;;  %2520 = vadd.xlane.f32.xlu1 %v2519_v9  ;;  %2517 = vadd.xlane.f32.xlu2 %v2516_v44 }
 0x22c   : > { %v2308_v18 = vsel %vm2307_vm6, %v5483_v15, %v2304_v28  ;;  %v2316_v42 = vmul.f32 %v5485_v27, %v2208_v19  ;;  %vm2321_vm8 = vweird.f32 %v5485_v27  ;;  %v2475_v7 = vpop.xlane.xlu1 %2474  ;;  %5374 = vset.pattern.permute.xlu2 %v5651_v10  ;;  %5376 = vset.pattern.permute.xlu1 %v5651_v10 }
 0x22d   : > { %v2313_v6 = vsel %vm2310_vm7, %v2312_v34, %v2308_v18  ;;  %vm2322_vm10 = vmor %vm2320_vm9, %vm2321_vm8  ;;  %5375 = vset.pattern.permute.xlu0 %v5651_v10 }
 0x22e   : > { %v2351_v20 = vmul.f32 %v2313_v6, %v6490_v47  ;;  %v2317_v32 = vsub.f32 1.0, %v2316_v42  ;;  %v2472_v6 = vpop.xlane.xlu0 %2471 }
 0x230   : > { %v2318_v61 = vmul.f32 %v5485_v27, %v2317_v32  ;;  %v2403_v58 = vmul.f32 %v6477_v53, %v2351_v20  ;;  %v2501_v48 = vmul.f32 %v6468_v4, %v2351_v20 }
 0x232   : > { %v2319_v55 = vadd.f32 %v5485_v27, %v2318_v61  ;;  %v2424_v63 = vsel %vm655_vm0, %v2403_v58, 0.0  ;;  %v2522_v43 = vsel %vm655_vm0, %v2501_v48, 0.0 }
 0x233   : > { %2425 = vadd.xlane.f32.xlu0 %v2424_v63  ;;  %2422 = vadd.xlane.f32.xlu1 %v2421_v30 }
 0x234   : > { %v2323_v47 = vsel %vm2322_vm10, %v5485_v27, %v2319_v55  ;;  %v6535_v13 = vpop.xlane.xlu1 %2376 }
 0x235   : > { %v2328_v35 = vsel %vm2325_vm11, %v2327_v29, %v2323_v47 }
 0x236   : > { %v2352_v11 = vmul.f32 %v2328_v35, %v6498_v12  ;;  %v6537_v12 = vpop.xlane.xlu2 %2367 }
 0x238   : > { %v2502_v49 = vmul.f32 %v6468_v4, %v2352_v11  ;;  %v2404_v46 = vmul.f32 %v6477_v53, %v2352_v11 }
 0x23a   : > { %v2525_v2 = vsel %vm655_vm0, %v2502_v49, 0.0  ;;  %v2427_v3 = vsel %vm655_vm0, %v2404_v46, 0.0 }
 0x23b   : > { %2523 = vadd.xlane.f32.xlu1 %v2522_v43  ;;  %2526 = vadd.xlane.f32.xlu2 %v2525_v2 }
 0x23c   : > { %v6539_v5 = vpop.xlane.xlu1 %2379 }
 0x23e   : > { %v6541_v50 = vpop.xlane.xlu2 %2477 }
 0x243   : > { %2428 = vadd.xlane.f32.xlu1 %v2427_v3  ;;  %v4966_v3 = vmul.f32 -1.442695, %v6509_v17 }
 0x244   : > { %v6543_v15 = vpop.xlane.xlu1 %2480 }
 0x246   : > { %v6545_v59 = vpop.xlane.xlu2 %2382 }
 0x24c   : > { %v6547_v19 = vpop.xlane.xlu1 %2385 }
 0x24e   : > { %v6549_v37 = vpop.xlane.xlu2 %2483 }
 0x254   : > { %v6551_v21 = vpop.xlane.xlu1 %2388 }
 0x25c   : > { %v6560_v38 = vpop.xlane.xlu1 %2489 }
 0x276   : > { %v2506_v1 = vpop.xlane.xlu2 %2505 }
 0x277   : > { %v2531_v33 = vadd.f32 %v2506_v1, %v6514_v16 }
 0x279   : > { %v2540_v22 = vadd.f32 %v6556_v31, %v2531_v33 }
 0x27b   : > { %v4976_v60 = vmul.f32 -1.442695, %v2540_v22 }
 0x27d   : > { %5486 = vpow2.f32 %v4976_v60 }
 0x27e   : > { %v6562_v23 = vpop.xlane.xlu2 %2407  ;;  %v6567_v16 = vpop.xlane.xlu1 %2410 }
 0x283   : > { %v5487_v52 = vpop.eup %5486 }
 0x284   : > { %v2756_v28 = vadd.f32 1.0, %v5487_v52 }
 0x286   : > { %5488 = vrcp.f32 %v2756_v28  ;;  %v2509_v9 = vpop.xlane.xlu2 %2508  ;;  %v2776_v57 = vand.u32 2147483648, %v2756_v28  ;;  %vm2770_vm13 = vweird.f32 %v2756_v28 }
 0x287   : > { %v2532_v44 = vadd.f32 %v2509_v9, %v2469_v24  ;;  %v2774_v24 = vand.u32 2147483647, %v2756_v28 }
 0x288   : > { %v2777_v48 = vor.u32 1.1754944e-38, %v2776_v57 }
 0x289   : > { %v6570_v27 = vadd.f32 %v6556_v31, %v2532_v44  ;;  %vm2775_vm15 = vcmp.eq.f32.partialorder %v2774_v24, 8.507059e+37  ;;  %v3251_v44 = vld [vmem:[%s7340_s5] sm:$0xff] }
 0x28b   : > { %v4977_v34 = vmul.f32 -1.442695, %v6570_v27 }
 0x28c   : > { %v5489_v18 = vpop.eup %5488 }
 0x28d   : > { %5490 = vpow2.f32 %v4977_v34  ;;  %v2766_v42 = vmul.f32 %v5489_v18, %v2756_v28  ;;  %vm2771_vm12 = vweird.f32 %v5489_v18 }
 0x28e   : > { %v2512_v20 = vpop.xlane.xlu2 %2511  ;;  %vm2772_vm14 = vmor %vm2770_vm13, %vm2771_vm12 }
 0x28f   : > { %v2515_v32 = vpop.xlane.xlu1 %2514  ;;  %v2533_v14 = vadd.f32 %v2512_v20, %v2472_v6  ;;  %v2767_v0 = vsub.f32 1.0, %v2766_v42 }
 0x290   : > { %v2534_v61 = vadd.f32 %v2515_v32, %v2475_v7 }
 0x291   : > { %v6574_v58 = vadd.f32 %v6556_v31, %v2533_v14  ;;  %v2768_v55 = vmul.f32 %v5489_v18, %v2767_v0 }
 0x292   : > { %v6577_v63 = vadd.f32 %v6556_v31, %v2534_v61 }
 0x293   : > { %v5491_v30 = vpop.eup %5490  ;;  %v2769_v29 = vadd.f32 %v5489_v18, %v2768_v55  ;;  %v4978_v11 = vmul.f32 -1.442695, %v6574_v58  ;;  %v6604_v55 = vpop.xlane.xlu0 %2373 }
 0x294   : > { %v2757_v47 = vadd.f32 1.0, %v5491_v30  ;;  %v4979_v35 = vmul.f32 -1.442695, %v6577_v63 }
 0x295   : > { %v2773_v49 = vsel %vm2772_vm14, %v5489_v18, %v2769_v29 }
 0x296   : > { %5492 = vrcp.f32 %v2757_v47  ;;  %v6581_v43 = vpop.xlane.xlu2 %2413  ;;  %v2778_v2 = vsel %vm2775_vm15, %v2777_v48, %v2773_v49  ;;  %v2791_v32 = vand.u32 2147483648, %v2757_v47  ;;  %v2789_v0 = vand.u32 2147483647, %v2757_v47 }
 0x297   : > { %5494 = vpow2.f32 %v4979_v35  ;;  %v2900_v46 = vmul.f32 %v2778_v2, %v2540_v22  ;;  %vm2785_vm5 = vweird.f32 %v2757_v47  ;;  %v3252_v35 = vld [vmem:[%s7340_s5 + $0x8] sm:$0xff] }
 0x298   : > { %5496 = vpow2.f32 %v4978_v11  ;;  %v2792_v24 = vor.u32 1.1754944e-38, %v2791_v32  ;;  %vm2790_vm7 = vcmp.eq.f32.partialorder %v2789_v0, 8.507059e+37 }
 0x299   : > { %2918 = vrot.lane.b32.xlu2 %v2900_v46, %s5652_s0  ;;  %5498 = vpow2.f32 %v4966_v3 }
 0x29c   : > { %v5493_v7 = vpop.eup %5492 }
 0x29d   : > { %v5495_v1 = vpop.eup %5494  ;;  %v2781_v33 = vmul.f32 %v5493_v7, %v2757_v47  ;;  %vm2786_vm4 = vweird.f32 %v5493_v7 }
 0x29e   : > { %v5497_v60 = vpop.eup %5496  ;;  %v6585_v52 = vadd.f32 1.0, %v5495_v1  ;;  %v2521_v28 = vpop.xlane.xlu1 %2520  ;;  %vm2787_vm6 = vmor %vm2785_vm5, %vm2786_vm4 }
 0x29f   : > { %v2518_v9 = vpop.xlane.xlu2 %2517  ;;  %v6590_v22 = vadd.f32 1.0, %v5497_v60  ;;  %v2536_v34 = vadd.f32 %v2521_v28, %v6543_v15  ;;  %v2782_v42 = vsub.f32 1.0, %v2781_v33  ;;  %v5499_v61 = vpop.eup %5498 }
 0x2a0   : > { %v2535_v18 = vadd.f32 %v2518_v9, %v6541_v50  ;;  %5500 = vrcp.f32 %v6585_v52  ;;  %v6611_v49 = vadd.f32 1.0, %v5499_v61  ;;  %v2819_v3 = vand.u32 2147483647, %v6585_v52 }
 0x2a1   : > { %5502 = vrcp.f32 %v6590_v22  ;;  %v6597_v6 = vadd.f32 %v6556_v31, %v2536_v34  ;;  %3262 = vperm.xlu2 %5374, %v3251_v44   ;;  %v2783_v14 = vmul.f32 %v5493_v7, %v2782_v42  ;;  %v2804_v9 = vand.u32 2147483647, %v6590_v22  ;;  %v2487_v42 = vpop.xlane.xlu0 %2486 }
 0x2a2   : > { %v6600_v20 = vadd.f32 %v6556_v31, %v2535_v18  ;;  %v2806_v34 = vand.u32 2147483648, %v6590_v22  ;;  %vm2815_vm9 = vweird.f32 %v6585_v52  ;;  %vm6625_vm10 = vcmp.eq.f32.partialorder %v2819_v3, 8.507059e+37 }
 0x2a3   : > { %v4981_v15 = vmul.f32 -1.442695, %v6597_v6  ;;  %v2784_v57 = vadd.f32 %v5493_v7, %v2783_v14  ;;  %vm2800_vm12 = vweird.f32 %v6590_v22  ;;  %vm2805_vm15 = vcmp.eq.f32.partialorder %v2804_v9, 8.507059e+37 }
 0x2a4   : > { %v4980_v50 = vmul.f32 -1.442695, %v6600_v20 }
 0x2a5   : > { %5504 = vpow2.f32 %v4981_v15  ;;  %v2788_v11 = vsel %vm2787_vm6, %v5493_v7, %v2784_v57  ;;  %v2821_v7 = vand.u32 2147483648, %v6585_v52 }
 0x2a6   : > { %v5501_v30 = vpop.eup %5500  ;;  %v6606_v29 = vpop.xlane.xlu1 %2422  ;;  %5506 = vpow2.f32 %v4980_v50  ;;  %v2793_v2 = vsel %vm2790_vm7, %v2792_v24, %v2788_v11 }
 0x2a7   : > { %v5503_v48 = vpop.eup %5502  ;;  %v2901_v47 = vmul.f32 %v2793_v2, %v6570_v27  ;;  %v2811_v46 = vmul.f32 %v5501_v30, %v6585_v52  ;;  %5508 = vrcp.f32 %v6611_v49  ;;  %vm2816_vm8 = vweird.f32 %v5501_v30 }
 0x2a8   : > { %v2796_v1 = vmul.f32 %v5503_v48, %v6590_v22  ;;  %vm2801_vm11 = vweird.f32 %v5503_v48  ;;  %vm2817_vm13 = vmor %vm2815_vm9, %vm2816_vm8  ;;  %v2822_v52 = vor.u32 1.1754944e-38, %v2821_v7  ;;  %v2807_v2 = vor.u32 1.1754944e-38, %v2806_v34 }
 0x2a9   : > { %3267 = vperm.xlu2 %5374, %v3252_v35   ;;  %2920 = vrot.lane.b32.xlu0 %v2901_v47, %s5652_s0  ;;  %v2812_v33 = vsub.f32 1.0, %v2811_v46  ;;  %vm2802_vm14 = vmor %vm2800_vm12, %vm2801_vm11  ;;  %vm2335_vm11 = vweird.f32 %v6611_v49 }
 0x2aa   : > { %v2797_v28 = vsub.f32 1.0, %v2796_v1 }
 0x2ab   : > { %v5505_v60 = vpop.eup %5504  ;;  %v2813_v27 = vmul.f32 %v5501_v30, %v2812_v33 }
 0x2ac   : > { %v6621_v44 = vadd.f32 1.0, %v5505_v60  ;;  %v5507_v18 = vpop.eup %5506  ;;  %v2798_v14 = vmul.f32 %v5503_v48, %v2797_v28 }
 0x2ad   : > { %v2760_v0 = vadd.f32 1.0, %v5507_v18  ;;  %v2814_v61 = vadd.f32 %v5501_v30, %v2813_v27  ;;  %v6633_v47 = vpop.eup %5508 }
 0x2ae   : > { %5510 = vrcp.f32 %v6621_v44  ;;  %v2524_v15 = vpop.xlane.xlu1 %2523  ;;  %v2527_v50 = vpop.xlane.xlu2 %2526  ;;  %v2799_v35 = vadd.f32 %v5503_v48, %v2798_v14  ;;  %v2331_v9 = vmul.f32 %v6633_v47, %v6611_v49  ;;  %vm2336_vm5 = vweird.f32 %v6633_v47 }
 0x2af   : > { %v2537_v57 = vadd.f32 %v2524_v15, %v6549_v37  ;;  %v2538_v24 = vadd.f32 %v2527_v50, %v2487_v42  ;;  %5512 = vrcp.f32 %v2760_v0  ;;  %v2818_v11 = vsel %vm2817_vm13, %v5501_v30, %v2814_v61  ;;  %vm2337_vm13 = vmor %vm2335_vm11, %vm2336_vm5 }
 0x2b0   : > { %v2823_v37 = vsel %vm6625_vm10, %v2822_v52, %v2818_v11  ;;  %v2803_v22 = vsel %vm2802_vm14, %v5503_v48, %v2799_v35  ;;  %v2332_v34 = vsub.f32 1.0, %v2331_v9  ;;  %v2836_v32 = vand.u32 2147483648, %v2760_v0 }
 0x2b1   : > { %v6636_v46 = vadd.f32 %v6556_v31, %v2537_v57  ;;  %v6639_v3 = vadd.f32 %v6556_v31, %v2538_v24  ;;  %v2903_v1 = vmul.f32 %v2823_v37, %v6577_v63  ;;  %v2808_v33 = vsel %vm2805_vm15, %v2807_v2, %v2803_v22 }
 0x2b2   : > { %v2902_v7 = vmul.f32 %v2808_v33, %v6574_v58  ;;  %v2433_v58 = vadd.f32 %v6562_v23, %v6537_v12  ;;  %v2834_v50 = vand.u32 2147483647, %v2760_v0  ;;  %v2333_v57 = vmul.f32 %v6633_v47, %v2332_v34 }
 0x2b3   : > { %v4982_v30 = vmul.f32 -1.442695, %v6636_v46  ;;  %v4983_v60 = vmul.f32 -1.442695, %v6639_v3  ;;  %2924 = vrot.lane.b32.xlu1 %v2903_v1, %s5652_s0  ;;  %vm2830_vm6 = vweird.f32 %v2760_v0  ;;  %v2837_v12 = vor.u32 1.1754944e-38, %v2836_v32 }
 0x2b4   : > { %v5511_v28 = vpop.eup %5510  ;;  %2922 = vrot.lane.b32.xlu2 %v2902_v7, %s5652_s0  ;;  %v6657_v11 = vadd.f32 %v6556_v31, %v2433_v58  ;;  %vm2835_vm8 = vcmp.eq.f32.partialorder %v2834_v50, 8.507059e+37  ;;  %v2334_v22 = vadd.f32 %v6633_v47, %v2333_v57  ;;  %v2851_v33 = vand.u32 2147483648, %v6621_v44 }
 0x2b5   : > { %5514 = vpow2.f32 %v4982_v30  ;;  %v2841_v48 = vmul.f32 %v5511_v28, %v6621_v44  ;;  %v5513_v27 = vpop.eup %5512  ;;  %vm2846_vm9 = vweird.f32 %v5511_v28  ;;  %vm2845_vm10 = vweird.f32 %v6621_v44 }
 0x2b6   : > { %5516 = vpow2.f32 %v4983_v60  ;;  %v2826_v63 = vmul.f32 %v5513_v27, %v2760_v0  ;;  %vm2831_vm4 = vweird.f32 %v5513_v27  ;;  %v2341_v0 = vand.u32 2147483648, %v6611_v49  ;;  %vm2847_vm12 = vmor %vm2845_vm10, %vm2846_vm9 }
 0x2b7   : > { %v2842_v18 = vsub.f32 1.0, %v2841_v48  ;;  %vm2832_vm7 = vmor %vm2830_vm6, %vm2831_vm4  ;;  %v2849_v60 = vand.u32 2147483647, %v6621_v44  ;;  %v2339_v7 = vand.u32 2147483647, %v6611_v49 }
 0x2b8   : > { %v2827_v42 = vsub.f32 1.0, %v2826_v63  ;;  %v4967_v9 = vmul.f32 -1.442695, %v6657_v11  ;;  %v2852_v63 = vor.u32 1.1754944e-38, %v2851_v33  ;;  %v2342_v34 = vor.u32 1.1754944e-38, %v2341_v0 }
 0x2b9   : > { %v2843_v61 = vmul.f32 %v5511_v28, %v2842_v18  ;;  %vm2850_vm14 = vcmp.eq.f32.partialorder %v2849_v60, 8.507059e+37  ;;  %vm2340_vm15 = vcmp.eq.f32.partialorder %v2339_v7, 8.507059e+37  ;;  %v2417_v60 = vpop.xlane.xlu0 %2416 }
 0x2ba   : > { %v2828_v15 = vmul.f32 %v5513_v27, %v2827_v42 }
 0x2bb   : > { %v5515_v14 = vpop.eup %5514  ;;  %v2844_v37 = vadd.f32 %v5511_v28, %v2843_v61 }
 0x2bc   : > { %v2762_v24 = vadd.f32 1.0, %v5515_v14  ;;  %v5517_v52 = vpop.eup %5516  ;;  %v2829_v35 = vadd.f32 %v5513_v27, %v2828_v15 }
 0x2bd   : > { %v6659_v2 = vadd.f32 1.0, %v5517_v52  ;;  %v2848_v48 = vsel %vm2847_vm12, %v5511_v28, %v2844_v37 }
 0x2be   : > { %5518 = vrcp.f32 %v2762_v24  ;;  %v2833_v23 = vsel %vm2832_vm7, %v5513_v27, %v2829_v35  ;;  %v2853_v49 = vsel %vm2850_vm14, %v2852_v63, %v2848_v48  ;;  %v2864_v14 = vand.u32 2147483647, %v2762_v24 }
 0x2bf   : > { %5520 = vrcp.f32 %v6659_v2  ;;  %v2838_v1 = vsel %vm2835_vm8, %v2837_v12, %v2833_v23  ;;  %v2866_v15 = vand.u32 2147483648, %v2762_v24  ;;  %v2905_v50 = vmul.f32 %v2853_v49, %v6597_v6 }
 0x2c0   : > { %v2904_v30 = vmul.f32 %v2838_v1, %v6600_v20  ;;  %v2338_v20 = vsel %vm2337_vm13, %v6633_v47, %v2334_v22  ;;  %5522 = vpow2.f32 %v4967_v9  ;;  %vm2860_vm5 = vweird.f32 %v2762_v24 }
 0x2c1   : > { %v2343_v42 = vsel %vm2340_vm15, %v2342_v34, %v2338_v20  ;;  %v2867_v12 = vor.u32 1.1754944e-38, %v2866_v15  ;;  %vm2865_vm7 = vcmp.eq.f32.partialorder %v2864_v14, 8.507059e+37  ;;  %vm2875_vm9 = vweird.f32 %v6659_v2 }
 0x2c2   : > { %2926 = vrot.lane.b32.xlu2 %v2904_v30, %s5652_s0  ;;  %v6678_v47 = vmul.f32 %v2343_v42, %v6509_v17  ;;  %v2881_v17 = vand.u32 2147483648, %v6659_v2  ;;  %v2436_v14 = vadd.f32 %v2417_v60, %v6535_v13  ;;  %v2438_v15 = vadd.f32 %v6606_v29, %v6545_v59 }
 0x2c4   : > { %v5519_v27 = vpop.eup %5518  ;;  %v2503_v6 = vmul.f32 %v6468_v4, %v6678_v47  ;;  %v2882_v4 = vor.u32 1.1754944e-38, %v2881_v17  ;;  %v6721_v13 = vadd.f32 %v6556_v31, %v2438_v15 }
 0x2c5   : > { %v2856_v44 = vmul.f32 %v5519_v27, %v2762_v24  ;;  %v5521_v18 = vpop.eup %5520  ;;  %vm2861_vm4 = vweird.f32 %v5519_v27  ;;  %v2879_v24 = vand.u32 2147483647, %v6659_v2 }
 0x2c6   : > { %v2871_v32 = vmul.f32 %v5521_v18, %v6659_v2  ;;  %v5523_v35 = vpop.eup %5522  ;;  %vm2862_vm6 = vmor %vm2860_vm5, %vm2861_vm4  ;;  %vm2876_vm8 = vweird.f32 %v5521_v18  ;;  %v2528_v0 = vsel %vm655_vm0, %v2503_v6, 0.0  ;;  %v2365_v2 = vmul.f32 %v6196_v8, %v6451_v41 }
 0x2c7   : > { %v2857_v58 = vsub.f32 1.0, %v2856_v44  ;;  %v2576_v22 = vadd.f32 1.0, %v5523_v35  ;;  %vm2877_vm10 = vmor %vm2875_vm9, %vm2876_vm8  ;;  %vm2880_vm11 = vcmp.eq.f32.partialorder %v2879_v24, 8.507059e+37  ;;  %v2420_v44 = vpop.xlane.xlu0 %2419  ;;  %v4972_v29 = vmul.f32 -1.442695, %v6721_v13 }
 0x2c8   : > { %v2872_v61 = vsub.f32 1.0, %v2871_v32  ;;  %v2390_v63 = vsel %vm655_vm0, %v2365_v2, 0.0 }
 0x2c9   : > { %v2858_v28 = vmul.f32 %v5519_v27, %v2857_v58  ;;  %5524 = vrcp.f32 %v2576_v22  ;;  %v2596_v32 = vand.u32 2147483648, %v2576_v22  ;;  %vm2590_vm13 = vweird.f32 %v2576_v22 }
 0x2ca   : > { %2928 = vrot.lane.b32.xlu2 %v2905_v50, %s5652_s0  ;;  %v2873_v52 = vmul.f32 %v5521_v18, %v2872_v61  ;;  %v6717_v61 = vadd.f32 %v6556_v31, %v2436_v14 }
 0x2cb   : > { %v2859_v57 = vadd.f32 %v5519_v27, %v2858_v28  ;;  %v2597_v28 = vor.u32 1.1754944e-38, %v2596_v32 }
 0x2cc   : > { %v2874_v33 = vadd.f32 %v5521_v18, %v2873_v52  ;;  %v4970_v52 = vmul.f32 -1.442695, %v6717_v61 }
 0x2cd   : > { %v2863_v23 = vsel %vm2862_vm6, %v5519_v27, %v2859_v57 }
 0x2ce   : > { %v2868_v37 = vsel %vm2865_vm7, %v2867_v12, %v2863_v23  ;;  %v2878_v30 = vsel %vm2877_vm10, %v5521_v18, %v2874_v33  ;;  %v2429_v33 = vpop.xlane.xlu1 %2428 }
 0x2cf   : > { %v2906_v1 = vmul.f32 %v2868_v37, %v6636_v46  ;;  %v2435_v46 = vadd.f32 %v6581_v43, %v6604_v55  ;;  %v2883_v7 = vsel %vm2880_vm11, %v2882_v4, %v2878_v30  ;;  %v5525_v9 = vpop.eup %5524  ;;  %v2434_v55 = vadd.f32 %v6567_v16, %v6529_v25 }
 0x2d0   : > { %v2907_v48 = vmul.f32 %v2883_v7, %v6639_v3  ;;  %v2586_v20 = vmul.f32 %v5525_v9, %v2576_v22  ;;  %v2437_v3 = vadd.f32 %v2420_v44, %v6539_v5  ;;  %vm2591_vm12 = vweird.f32 %v5525_v9  ;;  %v2426_v7 = vpop.xlane.xlu0 %2425 }
 0x2d1   : > { %v6695_v27 = vadd.f32 %v6556_v31, %v2435_v46  ;;  %v6704_v41 = vadd.f32 %v6556_v31, %v2434_v55  ;;  %v2594_v5 = vand.u32 2147483647, %v2576_v22  ;;  %vm2592_vm14 = vmor %vm2590_vm13, %vm2591_vm12 }
 0x2d2   : > { %2930 = vrot.lane.b32.xlu2 %v2906_v1, %s5652_s0  ;;  %v2587_v43 = vsub.f32 1.0, %v2586_v20  ;;  %v6707_v18 = vadd.f32 %v6556_v31, %v2437_v3 }
 0x2d3   : > { %2529 = vadd.xlane.f32.xlu0 %v2528_v0  ;;  %v4969_v34 = vmul.f32 -1.442695, %v6695_v27  ;;  %v4968_v58 = vmul.f32 -1.442695, %v6704_v41  ;;  %vm2595_vm15 = vcmp.eq.f32.partialorder %v2594_v5, 8.507059e+37 }
 0x2d4   : > { %v2588_v8 = vmul.f32 %v5525_v9, %v2587_v43  ;;  %v4971_v25 = vmul.f32 -1.442695, %v6707_v18 }
 0x2d5   : > { %5526 = vpow2.f32 %v4969_v34 }
 0x2d6   : > { %v2589_v42 = vadd.f32 %v5525_v9, %v2588_v8  ;;  %5528 = vpow2.f32 %v4968_v58 }
 0x2d7   : > { %5530 = vpow2.f32 %v4971_v25 }
 0x2d8   : > { %v2593_v50 = vsel %vm2592_vm14, %v5525_v9, %v2589_v42 }
 0x2d9   : > { %v2598_v57 = vsel %vm2595_vm15, %v2597_v28, %v2593_v50 }
 0x2da   : > { %2932 = vrot.lane.b32.xlu2 %v2907_v48, %s5652_s0  ;;  %v2720_v35 = vmul.f32 %v2598_v57, %v6657_v11  ;;  %v2440_v11 = vadd.f32 %v2429_v33, %v6551_v21  ;;  %v2439_v21 = vadd.f32 %v2426_v7, %v6547_v19 }
 0x2db   : > { %v5527_v49 = vpop.eup %5526 }
 0x2dc   : > { %v6712_v16 = vadd.f32 1.0, %v5527_v49  ;;  %v5529_v59 = vpop.eup %5528  ;;  %v6737_v9 = vadd.f32 %v6556_v31, %v2440_v11  ;;  %v6753_v8 = vadd.f32 %v6556_v31, %v2439_v21 }
 0x2dd   : > { %2391 = vadd.xlane.f32.xlu1 %v2390_v63  ;;  %v5531_v23 = vpop.eup %5530  ;;  %v6726_v1 = vadd.f32 1.0, %v5529_v59 }
 0x2de   : > { %5532 = vrcp.f32 %v6712_v16  ;;  %v6728_v17 = vadd.f32 1.0, %v5531_v23  ;;  %v4974_v43 = vmul.f32 -1.442695, %v6737_v9  ;;  %v2626_v49 = vand.u32 2147483648, %v6712_v16 }
 0x2df   : > { %5534 = vpow2.f32 %v4970_v52  ;;  %vm2620_vm5 = vweird.f32 %v6712_v16  ;;  %v2624_v58 = vand.u32 2147483647, %v6712_v16  ;;  %v4973_v5 = vmul.f32 -1.442695, %v6753_v8 }
 0x2e0   : > { %5536 = vpow2.f32 %v4972_v29  ;;  %v2627_v15 = vor.u32 1.1754944e-38, %v2626_v49  ;;  %vm2605_vm13 = vweird.f32 %v6726_v1  ;;  %v2611_v21 = vand.u32 2147483648, %v6726_v1 }
 0x2e1   : > { %vm2625_vm7 = vcmp.eq.f32.partialorder %v2624_v58, 8.507059e+37 }
 0x2e4   : > { %v5533_v6 = vpop.eup %5532 }
 0x2e5   : > { %v2616_v24 = vmul.f32 %v5533_v6, %v6712_v16  ;;  %v5535_v30 = vpop.eup %5534  ;;  %vm2621_vm4 = vweird.f32 %v5533_v6  ;;  %v3253_v16 = vld [vmem:[%s7340_s5 + $0x10] sm:$0xff] }
 0x2e6   : > { %v5537_v60 = vpop.eup %5536  ;;  %v6739_v2 = vadd.f32 1.0, %v5535_v30  ;;  %vm2622_vm6 = vmor %vm2620_vm5, %vm2621_vm4  ;;  %vm2650_vm4 = vweird.f32 %v6728_v17 }
 0x2e7   : > { %v2617_v4 = vsub.f32 1.0, %v2616_v24  ;;  %v6744_v34 = vadd.f32 1.0, %v5537_v60 }
 0x2e9   : > { %v2618_v20 = vmul.f32 %v5533_v6, %v2617_v4 }
 0x2eb   : > { %v2619_v55 = vadd.f32 %v5533_v6, %v2618_v20 }
 0x2ed   : > { %v2623_v14 = vsel %vm2622_vm6, %v5533_v6, %v2619_v55 }
 0x2f3   : > { %v2919_v12 = vpop.permute.xlu2 %2918 }
 0x2f4   : > { %v2945_v37 = vsub.f32 %v2720_v35, %v2919_v12  ;;  %v2628_v35 = vsel %vm2625_vm7, %v2627_v15, %v2623_v14  ;;  %v2612_v14 = vor.u32 1.1754944e-38, %v2611_v21 }
 0x2f6   : > { %v4985_v22 = vmul.f32 -1.442695, %v2945_v37  ;;  %3272 = vperm.xlu1 %5376, %v3253_v16  }
 0x2f8   : > { %5538 = vpow2.f32 %v4985_v22  ;;  %v2722_v22 = vmul.f32 %v2628_v35, %v6695_v27 }
 0x2f9   : > { %5540 = vrcp.f32 %v6726_v1 }
 0x2fa   : > { %5542 = vrcp.f32 %v6728_v17 }
 0x2fb   : > { %v6733_v0 = vpop.permute.xlu2 %3262 }
 0x2fe   : > { %v5539_v46 = vpop.eup %5538 }
 0x2ff   : > { %v2981_v48 = vadd.f32 1.0, %v5539_v46  ;;  %v6741_v63 = vpop.eup %5540 }
 0x300   : > { %v6746_v44 = vpop.eup %5542  ;;  %v2601_v3 = vmul.f32 %v6741_v63, %v6726_v1  ;;  %vm2606_vm11 = vweird.f32 %v6741_v63 }
 0x301   : > { %5544 = vrcp.f32 %v2981_v48  ;;  %v2646_v42 = vmul.f32 %v6746_v44, %v6728_v17  ;;  %v3001_v59 = vand.u32 2147483648, %v2981_v48  ;;  %v2999_v23 = vand.u32 2147483647, %v2981_v48  ;;  %vm2607_vm15 = vmor %vm2605_vm13, %vm2606_vm11 }
 0x302   : > { %5546 = vrcp.f32 %v6739_v2  ;;  %v2602_v31 = vsub.f32 1.0, %v2601_v3  ;;  %vm2995_vm9 = vweird.f32 %v2981_v48  ;;  %vm2651_vm14 = vweird.f32 %v6746_v44 }
 0x303   : > { %5548 = vrcp.f32 %v6744_v34  ;;  %v6756_v19 = vpop.permute.xlu2 %3267  ;;  %v2647_v50 = vsub.f32 1.0, %v2646_v42  ;;  %v3002_v4 = vor.u32 1.1754944e-38, %v3001_v59  ;;  %vm3000_vm12 = vcmp.eq.f32.partialorder %v2999_v23, 8.507059e+37  ;;  %vm2652_vm5 = vmor %vm2650_vm4, %vm2651_vm14 }
 0x304   : > { %5550 = vpow2.f32 %v4974_v43  ;;  %v2603_v37 = vmul.f32 %v6741_v63, %v2602_v31  ;;  %v2656_v42 = vand.u32 2147483648, %v6728_v17  ;;  %v2671_v23 = vand.u32 2147483648, %v6744_v34 }
 0x305   : > { %5552 = vpow2.f32 %v4973_v5  ;;  %v2648_v6 = vmul.f32 %v6746_v44, %v2647_v50  ;;  %vm2665_vm11 = vweird.f32 %v6744_v34 }
 0x306   : > { %v2604_v27 = vadd.f32 %v6741_v63, %v2603_v37  ;;  %v2657_v50 = vor.u32 1.1754944e-38, %v2656_v42 }
 0x307   : > { %v5545_v32 = vpop.eup %5544  ;;  %v2649_v55 = vadd.f32 %v6746_v44, %v2648_v6 }
 0x308   : > { %v2991_v25 = vmul.f32 %v5545_v32, %v2981_v48  ;;  %v6764_v28 = vpop.eup %5546  ;;  %vm2996_vm8 = vweird.f32 %v5545_v32  ;;  %v2609_v48 = vand.u32 2147483647, %v6726_v1  ;;  %v2654_v1 = vand.u32 2147483647, %v6728_v17 }
 0x309   : > { %v6766_v52 = vpop.eup %5548  ;;  %vm2997_vm10 = vmor %vm2995_vm9, %vm2996_vm8  ;;  %v2631_v60 = vmul.f32 %v6764_v28, %v6739_v2  ;;  %v2653_v31 = vsel %vm2652_vm5, %v6746_v44, %v2649_v55  ;;  %vm2635_vm8 = vweird.f32 %v6739_v2 }
 0x30a   : > { %v2992_v57 = vsub.f32 1.0, %v2991_v25  ;;  %v5551_v29 = vpop.eup %5550  ;;  %v2661_v24 = vmul.f32 %v6766_v52, %v6744_v34  ;;  %vm2610_vm6 = vcmp.eq.f32.partialorder %v2609_v48, 8.507059e+37  ;;  %vm2655_vm7 = vcmp.eq.f32.partialorder %v2654_v1, 8.507059e+37 }
 0x30b   : > { %v6776_v11 = vadd.f32 1.0, %v5551_v29  ;;  %v5553_v49 = vpop.eup %5552  ;;  %v2632_v58 = vsub.f32 1.0, %v2631_v60  ;;  %v2658_v59 = vsel %vm2655_vm7, %v2657_v50, %v2653_v31  ;;  %vm2666_vm9 = vweird.f32 %v6766_v52 }
 0x30c   : > { %v2993_v12 = vmul.f32 %v5545_v32, %v2992_v57  ;;  %v2662_v3 = vsub.f32 1.0, %v2661_v24  ;;  %v6794_v25 = vadd.f32 1.0, %v5553_v49  ;;  %v2724_v6 = vmul.f32 %v2658_v59, %v6707_v18 }
 0x30d   : > { %5554 = vrcp.f32 %v6776_v11  ;;  %v2633_v57 = vmul.f32 %v6764_v28, %v2632_v58 }
 0x30e   : > { %v2994_v33 = vadd.f32 %v5545_v32, %v2993_v12  ;;  %v2923_v30 = vpop.permute.xlu2 %2922  ;;  %v2663_v5 = vmul.f32 %v6766_v52, %v2662_v3 }
 0x30f   : > { %v2947_v46 = vsub.f32 %v2722_v22, %v2923_v30  ;;  %v2634_v12 = vadd.f32 %v6764_v28, %v2633_v57  ;;  %v2641_v22 = vand.u32 2147483648, %v6739_v2  ;;  %v2639_v30 = vand.u32 2147483647, %v6739_v2 }
 0x310   : > { %v2998_v7 = vsel %vm2997_vm10, %v5545_v32, %v2994_v33  ;;  %v2608_v32 = vsel %vm2607_vm15, %v6741_v63, %v2604_v27  ;;  %v2664_v44 = vadd.f32 %v6766_v52, %v2663_v5  ;;  %vm2636_vm10 = vweird.f32 %v6764_v28 }
 0x311   : > { %v3003_v20 = vsel %vm3000_vm12, %v3002_v4, %v2998_v7  ;;  %v4987_v43 = vmul.f32 -1.442695, %v2947_v46  ;;  %v2613_v15 = vsel %vm2610_vm6, %v2612_v14, %v2608_v32  ;;  %vm2667_vm12 = vmor %vm2665_vm11, %vm2666_vm9  ;;  %v2642_v48 = vor.u32 1.1754944e-38, %v2641_v22 }
 0x312   : > { %3136 = vperm.xlu2 %5374, %v3003_v20   ;;  %v3125_v35 = vsub.f32 1.0, %v3003_v20  ;;  %v2721_v16 = vmul.f32 %v2613_v15, %v6704_v41  ;;  %v2669_v41 = vand.u32 2147483647, %v6744_v34  ;;  %vm2637_vm13 = vmor %vm2635_vm8, %vm2636_vm10  ;;  %v2668_v18 = vsel %vm2667_vm12, %v6766_v52, %v2664_v44 }
 0x313   : > { %5556 = vpow2.f32 %v4987_v43  ;;  %v6799_v63 = vpop.eup %5554  ;;  %v2638_v7 = vsel %vm2637_vm13, %v6764_v28, %v2634_v12  ;;  %v2672_v34 = vor.u32 1.1754944e-38, %v2671_v23  ;;  %vm2640_vm15 = vcmp.eq.f32.partialorder %v2639_v30, 8.507059e+37 }
 0x314   : > { %5558 = vrcp.f32 %v6794_v25  ;;  %v2691_v4 = vmul.f32 %v6799_v63, %v6776_v11  ;;  %vm2670_vm14 = vcmp.eq.f32.partialorder %v2669_v41, 8.507059e+37  ;;  %v2643_v55 = vsel %vm2640_vm15, %v2642_v48, %v2638_v7 }
 0x315   : > { %v2673_v21 = vsel %vm2670_vm14, %v2672_v34, %v2668_v18  ;;  %v2723_v49 = vmul.f32 %v2643_v55, %v6717_v61  ;;  %vm2696_vm4 = vweird.f32 %v6799_v63  ;;  %v2701_v23 = vand.u32 2147483648, %v6776_v11 }
 0x316   : > { %v2692_v43 = vsub.f32 1.0, %v2691_v4  ;;  %v2725_v52 = vmul.f32 %v2673_v21, %v6721_v13  ;;  %vm2695_vm8 = vweird.f32 %v6776_v11  ;;  %vm2680_vm12 = vweird.f32 %v6794_v25 }
 0x317   : > { %vm2697_vm10 = vmor %vm2695_vm8, %vm2696_vm4  ;;  %v2702_v30 = vor.u32 1.1754944e-38, %v2701_v23  ;;  %v2686_v34 = vand.u32 2147483648, %v6794_v25 }
 0x318   : > { %v2693_v58 = vmul.f32 %v6799_v63, %v2692_v43 }
 0x319   : > { %v5557_v17 = vpop.eup %5556 }
 0x31a   : > { %3190 = vperm.xlu2 %5374, %v3125_v35   ;;  %v6806_v29 = vadd.f32 1.0, %v5557_v17  ;;  %v6823_v27 = vpop.eup %5558  ;;  %v2694_v44 = vadd.f32 %v6799_v63, %v2693_v58 }
 0x31b   : > { %v2921_v37 = vpop.permute.xlu0 %2920  ;;  %v2676_v2 = vmul.f32 %v6823_v27, %v6794_v25  ;;  %vm2681_vm13 = vweird.f32 %v6823_v27 }
 0x31c   : > { %5560 = vrcp.f32 %v6806_v29  ;;  %v2946_v33 = vsub.f32 %v2721_v16, %v2921_v37  ;;  %v2927_v24 = vpop.permute.xlu2 %2926  ;;  %v3031_v15 = vand.u32 2147483648, %v6806_v29  ;;  %v3029_v61 = vand.u32 2147483647, %v6806_v29  ;;  %vm6876_vm15 = vmor %vm2680_vm12, %vm2681_vm13 }
 0x31d   : > { %v2949_v60 = vsub.f32 %v2724_v6, %v2927_v24  ;;  %v2677_v50 = vsub.f32 1.0, %v2676_v2  ;;  %vm3025_vm6 = vweird.f32 %v6806_v29  ;;  %v2699_v6 = vand.u32 2147483647, %v6776_v11 }
 0x31e   : > { %v4986_v46 = vmul.f32 -1.442695, %v2946_v33  ;;  %v3032_v37 = vor.u32 1.1754944e-38, %v3031_v15  ;;  %vm3030_vm9 = vcmp.eq.f32.partialorder %v3029_v61, 8.507059e+37  ;;  %v2698_v33 = vsel %vm2697_vm10, %v6799_v63, %v2694_v44 }
 0x31f   : > { %v4989_v20 = vmul.f32 -1.442695, %v2949_v60  ;;  %v2678_v24 = vmul.f32 %v6823_v27, %v2677_v50  ;;  %vm2700_vm11 = vcmp.eq.f32.partialorder %v2699_v6, 8.507059e+37  ;;  %v2684_v63 = vand.u32 2147483647, %v6794_v25 }
 0x320   : > { %5562 = vpow2.f32 %v4986_v46  ;;  %v2703_v4 = vsel %vm2700_vm11, %v2702_v30, %v2698_v33 }
 0x321   : > { %5564 = vpow2.f32 %v4989_v20  ;;  %v2679_v7 = vadd.f32 %v6823_v27, %v2678_v24  ;;  %v2727_v43 = vmul.f32 %v2703_v4, %v6737_v9 }
 0x322   : > { %v5561_v3 = vpop.eup %5560 }
 0x323   : > { %v3021_v28 = vmul.f32 %v5561_v3, %v6806_v29  ;;  %vm3026_vm5 = vweird.f32 %v5561_v3 }
 0x324   : > { %v2929_v42 = vpop.permute.xlu2 %2928  ;;  %vm3027_vm7 = vmor %vm3025_vm6, %vm3026_vm5  ;;  %vm6883_vm5 = vcmp.eq.f32.partialorder %v2684_v63, 8.507059e+37 }
 0x325   : > { %v2925_v32 = vpop.permute.xlu1 %2924  ;;  %v2950_v1 = vsub.f32 %v2725_v52, %v2929_v42  ;;  %v3022_v14 = vsub.f32 1.0, %v3021_v28 }
 0x326   : > { %v5563_v31 = vpop.eup %5562  ;;  %v2948_v5 = vsub.f32 %v2723_v49, %v2925_v32 }
 0x327   : > { %v5565_v57 = vpop.eup %5564  ;;  %v6833_v35 = vadd.f32 1.0, %v5563_v31  ;;  %v3023_v13 = vmul.f32 %v5561_v3, %v3022_v14  ;;  %v4990_v16 = vmul.f32 -1.442695, %v2950_v1  ;;  %v2683_v31 = vsel %vm6876_vm15, %v6823_v27, %v2679_v7 }
 0x328   : > { %v6836_v59 = vadd.f32 1.0, %v5565_v57  ;;  %v4988_v17 = vmul.f32 -1.442695, %v2948_v5 }
 0x329   : > { %5566 = vrcp.f32 %v6833_v35  ;;  %v3024_v12 = vadd.f32 %v5561_v3, %v3023_v13  ;;  %v3016_v52 = vand.u32 2147483648, %v6833_v35  ;;  %vm3010_vm6 = vweird.f32 %v6833_v35 }
 0x32a   : > { %5568 = vrcp.f32 %v6836_v59  ;;  %v3059_v49 = vand.u32 2147483647, %v6836_v59  ;;  %v3061_v32 = vand.u32 2147483648, %v6836_v59  ;;  %vm3055_vm8 = vweird.f32 %v6836_v59 }
 0x32b   : > { %5570 = vpow2.f32 %v4988_v17  ;;  %v3028_v22 = vsel %vm3027_vm7, %v5561_v3, %v3024_v12  ;;  %v3014_v3 = vand.u32 2147483647, %v6833_v35  ;;  %v3017_v25 = vor.u32 1.1754944e-38, %v3016_v52 }
 0x32c   : > { %5572 = vpow2.f32 %v4990_v16  ;;  %v6847_v41 = vsel %vm3030_vm9, %v3032_v37, %v3028_v22  ;;  %v6849_v29 = vpop.permute.xlu2 %2930  ;;  %v2687_v13 = vor.u32 1.1754944e-38, %v2686_v34  ;;  %v3062_v17 = vor.u32 1.1754944e-38, %v3061_v32 }
 0x32d   : > { %3146 = vperm.xlu1 %5376, %v6847_v41   ;;  %vm3015_vm9 = vcmp.eq.f32.partialorder %v3014_v3, 8.507059e+37  ;;  %vm3060_vm11 = vcmp.eq.f32.partialorder %v3059_v49, 8.507059e+37  ;;  %v3127_v3 = vsub.f32 1.0, %v6847_v41 }
 0x32f   : > { %v5567_v11 = vpop.eup %5566 }
 0x330   : > { %v5569_v60 = vpop.eup %5568  ;;  %v3006_v18 = vmul.f32 %v5567_v11, %v6833_v35  ;;  %vm3011_vm14 = vweird.f32 %v5567_v11  ;;  %v2688_v35 = vsel %vm6883_vm5, %v2687_v13, %v2683_v31 }
 0x331   : > { %v5571_v46 = vpop.eup %5570  ;;  %v3051_v20 = vmul.f32 %v5569_v60, %v6836_v59  ;;  %vm3056_vm4 = vweird.f32 %v5569_v60  ;;  %vm3012_vm7 = vmor %vm3010_vm6, %vm3011_vm14  ;;  %v2726_v6 = vmul.f32 %v2688_v35, %v6753_v8  ;;  %v3257_v35 = vld [vmem:[%s7340_s5 + $0x30] sm:$0xff] }
 0x332   : > { %v5573_v48 = vpop.eup %5572  ;;  %v6861_v21 = vadd.f32 1.0, %v5571_v46  ;;  %v3007_v55 = vsub.f32 1.0, %v3006_v18  ;;  %vm3057_vm10 = vmor %vm3055_vm8, %vm3056_vm4 }
 0x333   : > { %v6865_v2 = vadd.f32 1.0, %v5573_v48  ;;  %v3052_v28 = vsub.f32 1.0, %v3051_v20  ;;  %v2951_v30 = vsub.f32 %v2726_v6, %v6849_v29 }
 0x334   : > { %5574 = vrcp.f32 %v6861_v21  ;;  %v2933_v42 = vpop.permute.xlu2 %2932  ;;  %v3008_v58 = vmul.f32 %v5567_v11, %v3007_v55  ;;  %v3046_v49 = vand.u32 2147483648, %v6861_v21  ;;  %vm3040_vm5 = vweird.f32 %v6861_v21 }
 0x335   : > { %5576 = vrcp.f32 %v6865_v2  ;;  %v2952_v1 = vsub.f32 %v2727_v43, %v2933_v42  ;;  %v3053_v14 = vmul.f32 %v5569_v60, %v3052_v28  ;;  %v3076_v8 = vand.u32 2147483648, %v6865_v2 }
 0x336   : > { %v3009_v15 = vadd.f32 %v5567_v11, %v3008_v58  ;;  %v3074_v46 = vand.u32 2147483647, %v6865_v2  ;;  %vm3070_vm13 = vweird.f32 %v6865_v2  ;;  %v4991_v63 = vmul.f32 -1.442695, %v2951_v30 }
 0x337   : > { %v4992_v50 = vmul.f32 -1.442695, %v2952_v1  ;;  %v3054_v57 = vadd.f32 %v5569_v60, %v3053_v14  ;;  %v3077_v20 = vor.u32 1.1754944e-38, %v3076_v8  ;;  %v3044_v58 = vand.u32 2147483647, %v6861_v21 }
 0x338   : > { %v3013_v61 = vsel %vm3012_vm7, %v5567_v11, %v3009_v15  ;;  %v3254_v11 = vld [vmem:[%s7340_s5 + $0x18] sm:$0xff]  ;;  %vm3075_vm15 = vcmp.eq.f32.partialorder %v3074_v46, 8.507059e+37  ;;  %v3047_v31 = vor.u32 1.1754944e-38, %v3046_v49 }
 0x339   : > { %5578 = vpow2.f32 %v4992_v50  ;;  %v3018_v27 = vsel %vm3015_vm9, %v3017_v25, %v3013_v61  ;;  %v3058_v16 = vsel %vm3057_vm10, %v5569_v60, %v3054_v57  ;;  %v3256_v60 = vld [vmem:[%s7340_s5 + $0x28] sm:$0xff]  ;;  %vm3045_vm9 = vcmp.eq.f32.partialorder %v3044_v58, 8.507059e+37  ;;  %v3258_v49 = vld [vmem:[%s7340_s5 + $0x38] sm:$0xff] }
 0x33a   : > { %v6889_v44 = vpop.eup %5574  ;;  %3141 = vperm.xlu0 %5375, %v3018_v27   ;;  %v3126_v12 = vsub.f32 1.0, %v3018_v27  ;;  %v6893_v23 = vsel %vm3060_vm11, %v3062_v17, %v3058_v16  ;;  %v6936_v17 = vld [vmem:[%s7348_s13] ss:$0 sm:$0xff] }
 0x33b   : > { %v5577_v37 = vpop.eup %5576  ;;  %3156 = vperm.xlu1 %5376, %v6893_v23   ;;  %v3036_v33 = vmul.f32 %v6889_v44, %v6861_v21  ;;  %vm3041_vm4 = vweird.f32 %v6889_v44 }
 0x33c   : > { %v3066_v59 = vmul.f32 %v5577_v37, %v6865_v2  ;;  %3195 = vperm.xlu2 %5374, %v3126_v12   ;;  %vm3071_vm12 = vweird.f32 %v5577_v37  ;;  %vm3042_vm6 = vmor %vm3040_vm5, %vm3041_vm4 }
 0x33d   : > { %v3037_v29 = vsub.f32 1.0, %v3036_v33  ;;  %vm3072_vm14 = vmor %vm3070_vm13, %vm3071_vm12  ;;  %vm3314_vm12 = vcmask 257024  }
 0x33e   : > { %v3067_v22 = vsub.f32 1.0, %v3066_v59  ;;  %3317 = vst.msk [vmem:[#allocation2 + $0x8] sm:$0xf] %vm3314_vm12, %v5651_v10  ;;  %v2405_v59 = vmul.f32 %v6477_v53, %v6678_v47 }
 0x33f   : > { %v5579_v24 = vpop.eup %5578  ;;  %v3038_v43 = vmul.f32 %v6889_v44, %v3037_v29  ;;  %3315 = vst.msk [vmem:[#allocation2] sm:$0xf] %vm3314_vm12, %v5651_v10 }
 0x340   : > { %v2988_v4 = vadd.f32 1.0, %v5579_v24  ;;  %v3068_v18 = vmul.f32 %v5577_v37, %v3067_v22  ;;  %3316 = vst.msk [vmem:[#allocation2 + $0x4] sm:$0xf] %vm3314_vm12, %v5651_v10  ;;  %v2430_v22 = vsel %vm655_vm0, %v2405_v59, 0.0 }
 0x341   : > { %v3039_v2 = vadd.f32 %v6889_v44, %v3038_v43  ;;  %3318 = vst.msk [vmem:[#allocation2 + $0xc] sm:$0xf] %vm3314_vm12, %v5651_v10 }
 0x342   : > { %5580 = vrcp.f32 %v2988_v4  ;;  %3277 = vperm.xlu0 %5375, %v3254_v11   ;;  %v3069_v7 = vadd.f32 %v5577_v37, %v3068_v18  ;;  %v3106_v32 = vand.u32 2147483648, %v2988_v4  ;;  %v3104_v9 = vand.u32 2147483647, %v2988_v4  ;;  %3319 = vst.msk [vmem:[#allocation2 + $0x10] sm:$0xf] %vm3314_vm12, %v5651_v10  ;;  %v1811_v18 = vld [vmem:[%s5982_s25] sm:$0xff]  }
 0x343   : > { %3287 = vperm.xlu1 %5376, %v3256_v60   ;;  %5582 = vpow2.f32 %v4991_v63  ;;  %v3043_v14 = vsel %vm3042_vm6, %v6889_v44, %v3039_v2  ;;  %vm3100_vm8 = vweird.f32 %v2988_v4  ;;  %3320 = vst.msk [vmem:[#allocation2 + $0x14] sm:$0xf] %vm3314_vm12, %v5651_v10  ;;  %v1820_v8 = vunpack.c.l.bf16 %v1811_v18 }
 0x344   : > { %v3073_v34 = vsel %vm3072_vm14, %v5577_v37, %v3069_v7  ;;  %v3107_v50 = vor.u32 1.1754944e-38, %v3106_v32  ;;  %v3048_v57 = vsel %vm3045_vm9, %v3047_v31, %v3043_v14  ;;  %vm3105_vm11 = vcmp.eq.f32.partialorder %v3104_v9, 8.507059e+37  ;;  %3321 = vst.msk [vmem:[#allocation2 + $0x18] sm:$0xf] %vm3314_vm12, %v5651_v10  ;;  %v3255_v37 = vld [vmem:[%s7340_s5 + $0x20] sm:$0xff]  ;;  %v5223_v14 = vld [vmem:[%s7349_s14 + $0x8] sm:$0xff] }
 0x345   : > { %v6910_v48 = vsel %vm3075_vm15, %v3077_v20, %v3073_v34  ;;  %v3128_v27 = vsub.f32 1.0, %v3048_v57  ;;  %3322 = vst.msk [vmem:[#allocation2 + $0x1c] sm:$0xf] %vm3314_vm12, %v5651_v10  ;;  %v5227_v31 = vld [vmem:[%s7349_s14 + $0x28] sm:$0xff]  ;;  %3542 = vmatpush.bf16.msrb.mxu0 %v5223_v14  ;;  %vm3391_vm9 = vsmask.f32 4352 }
 0x346   : > { %v3130_v52 = vsub.f32 1.0, %v6910_v48  ;;  %v2530_v15 = vpop.xlane.xlu0 %2529  ;;  %3323 = vst.msk [vmem:[#allocation2 + $0x20] sm:$0xf] %vm3314_vm12, %v5651_v10  ;;  %3612 = vmatpush.bf16.msrb.mxu1 %v5227_v31 }
 0x347   : > { %v2539_v61 = vadd.f32 %v2530_v15, %v6560_v38  ;;  %3324 = vst.msk [vmem:[#allocation2 + $0x24] sm:$0xf] %vm3314_vm12, %v5651_v10  ;;  %v5222_v15 = vld [vmem:[%s7349_s14] sm:$0xff] }
 0x348   : > { %v5581_v55 = vpop.eup %5580  ;;  %3325 = vst.msk [vmem:[#allocation2 + $0x28] sm:$0xf] %vm3314_vm12, %v5651_v10 }
 0x349   : > { %v3096_v28 = vmul.f32 %v5581_v55, %v2988_v4  ;;  %vm3101_vm7 = vweird.f32 %v5581_v55  ;;  %v5583_v1 = vpop.eup %5582  ;;  %v6939_v38 = vadd.f32 %v6936_v17, %v2539_v61  ;;  %3326 = vst.msk [vmem:[#allocation2 + $0x2c] sm:$0xf] %vm3314_vm12, %v5651_v10  ;;  %3543 = vmatpush.bf16.msrb.mxu0 %v5222_v15 }
 0x34a   : > { %3200 = vperm.xlu0 %5375, %v3127_v3   ;;  %vm3102_vm10 = vmor %vm3100_vm8, %vm3101_vm7  ;;  %v2987_v25 = vadd.f32 1.0, %v5583_v1  ;;  %3327 = vst.msk [vmem:[#allocation2 + $0x30] sm:$0xf] %vm3314_vm12, %v5651_v10  ;;  %v3259_v1 = vld [vmem:[%s7340_s5 + $0x40] sm:$0xff]  ;;  %vm3499_vm8 = vcmask 1044480  }
 0x34b   : > { %3215 = vperm.xlu1 %5376, %v3130_v52   ;;  %v3097_v42 = vsub.f32 1.0, %v3096_v28  ;;  %v4984_v44 = vmul.f32 -1.442695, %v6939_v38  ;;  %v3129_v28 = vsub.f32 1.0, %v6893_v23 }
 0x34c   : > { %5584 = vrcp.f32 %v2987_v25  ;;  %v3091_v60 = vand.u32 2147483648, %v2987_v25  ;;  %vm3085_vm14 = vweird.f32 %v2987_v25  ;;  %v3089_v10 = vand.u32 2147483647, %v2987_v25 }
 0x34d   : > { %v3098_v41 = vmul.f32 %v5581_v55, %v3097_v42  ;;  %5586 = vpow2.f32 %v4984_v44  ;;  %v3347_v44 = vld [vmem:[#allocation2 + $0x4] sm:$0xf] }
 0x34e   : > { %v3092_v47 = vor.u32 1.1754944e-38, %v3091_v60  ;;  %vm3090_vm4 = vcmp.eq.f32.partialorder %v3089_v10, 8.507059e+37  ;;  %v3377_v59 = vunpack.c.l.b16 %v3347_v44 }
 0x34f   : > { %v3099_v5 = vadd.f32 %v5581_v55, %v3098_v41 }
 0x351   : > { %v3103_v13 = vsel %vm3102_vm10, %v5581_v55, %v3099_v5  ;;  %v5225_v5 = vld [vmem:[%s7349_s14 + $0x18] sm:$0xff] }
 0x352   : > { %3151 = vperm.xlu0 %5375, %v3048_v57   ;;  %v6921_v21 = vsel %vm3105_vm11, %v3107_v50, %v3103_v13  ;;  %v5585_v16 = vpop.eup %5584  ;;  %v5226_v50 = vld [vmem:[%s7349_s14 + $0x20] sm:$0xff]  ;;  %3469 = vmatpush.bf16.msra.mxu3 %v5225_v5  ;;  %v5224_v57 = vld [vmem:[%s7349_s14 + $0x10] sm:$0xff]  ;;  %v1821_v13 = vunpack.c.h.bf16 %v1811_v18 }
 0x353   : > { %3171 = vperm.xlu1 %5376, %v6921_v21   ;;  %v3081_v12 = vmul.f32 %v5585_v16, %v2987_v25  ;;  %v5587_v33 = vpop.eup %5586  ;;  %vm3086_vm13 = vweird.f32 %v5585_v16  ;;  %v3132_v58 = vsub.f32 1.0, %v6921_v21  ;;  %v6999_v25 = vpop.xlane.xlu1 %2391  ;;  %3613 = vmatpush.bf16.msrb.mxu1 %v5226_v50 }
 0x354   : > { %v2764_v30 = vadd.f32 1.0, %v5587_v33  ;;  %vm3087_vm15 = vmor %vm3085_vm14, %vm3086_vm13 }
 0x355   : > { %v3082_v6 = vsub.f32 1.0, %v3081_v12 }
 0x356   : > { %5588 = vrcp.f32 %v2764_v30  ;;  %vm2890_vm5 = vweird.f32 %v2764_v30  ;;  %3470 = vmatpush.bf16.msra.mxu3 %v5224_v57 }
 0x357   : > { %v3083_v24 = vmul.f32 %v5585_v16, %v3082_v6 }
 0x359   : > { %v3084_v11 = vadd.f32 %v5585_v16, %v3083_v24 }
 0x35a   : > { %3205 = vperm.xlu0 %5375, %v3128_v27  }
 0x35b   : > { %3292 = vperm.xlu1 %5376, %v3257_v35   ;;  %v3088_v53 = vsel %vm3087_vm15, %v5585_v16, %v3084_v11  ;;  %v3346_v16 = vld [vmem:[#allocation2] sm:$0x8]  ;;  %v5229_v11 = vld [vmem:[%s7349_s14 + $0x38] sm:$0xff] }
 0x35c   : > { %v3093_v46 = vsel %vm3090_vm4, %v3092_v47, %v3088_v53  ;;  %v5589_v7 = vpop.eup %5588  ;;  %3765 = vmatpush.bf16.msrb.mxu2 %v5229_v11  ;;  %v1815_v11 = vld [vmem:[%s5982_s25 + $0x10] sm:$0xff]  }
 0x35d   : > { %v2886_v20 = vmul.f32 %v5589_v7, %v2764_v30  ;;  %v3131_v43 = vsub.f32 1.0, %v3093_v46  ;;  %vm2891_vm0 = vweird.f32 %v5589_v7 }
 0x35e   : > { %vm2892_vm6 = vmor %vm2890_vm5, %vm2891_vm0 }
 0x35f   : > { %v2887_v3 = vsub.f32 1.0, %v2886_v20 }
 0x361   : > { %v2888_v2 = vmul.f32 %v5589_v7, %v2887_v3 }
 0x362   : > { %3282 = vperm.xlu0 %5375, %v3255_v37   ;;  %v3376_v37 = vunpack.c.l.b16 %v3346_v16 }
 0x363   : > { %v2889_v42 = vadd.f32 %v5589_v7, %v2888_v2 }
 0x364   : > { %v3386_v24 = vpack.c.b16 %v3377_v59, %v3376_v37 }
 0x365   : > { %2431 = vadd.xlane.f32.xlu2 %v2430_v22  ;;  %v2893_v32 = vsel %vm2892_vm6, %v5589_v7, %v2889_v42 }
 0x366   : > { %v3393_v60 = vshrl.u32 %v3386_v24, 16  ;;  %v3396_v10 = vshll.u32 %v3386_v24, 16 }
 0x368   : > { %v3273_v35 = vpop.permute.xlu1 %3272  ;;  %v3398_v7 = vrot.slane %v3396_v10, 4 }
 0x36a   : > { %3161 = vperm.xlu0 %5375, %v6910_v48  }
 0x36c   : > { %v3137_v4 = vpop.permute.xlu2 %3136 }
 0x36d   : > { %v3179_v63 = vmul.f32 %v3137_v4, %v1820_v8 }
 0x372   : > { %3166 = vperm.xlu0 %5375, %v3093_v46   ;;  %v3395_v46 = vrot.slane %v3393_v60, 3 }
 0x374   : > { %v3191_v29 = vpop.permute.xlu2 %3190 }
 0x375   : > { %v3233_v34 = vmul.f32 %v3191_v29, %v6114_v62  ;;  %v2896_v62 = vand.u32 2147483648, %v2764_v30 }
 0x377   : > { %v3242_v48 = vadd.f32 %v3233_v34, %v3179_v63  ;;  %v2897_v23 = vor.u32 1.1754944e-38, %v2896_v62  ;;  %v5330_v62 = vld [vmem:[#allocation2 + $0x4] sm:$0x8] }
 0x379   : > { %v3305_v55 = vmul.f32 %v6733_v0, %v3242_v48  ;;  %v2894_v0 = vand.u32 2147483647, %v2764_v30  ;;  %v1813_v30 = vld [vmem:[%s5982_s25 + $0x8] sm:$0xff]  }
 0x37a   : > { %3220 = vperm.xlu0 %5375, %v3131_v43   ;;  %v1822_v4 = vunpack.c.l.bf16 %v1813_v30  ;;  %v1823_v14 = vunpack.c.h.bf16 %v1813_v30 }
 0x37b   : > { %v3328_v52 = vpack.c.bf16 %v3305_v55, %v3305_v55  ;;  %vm2895_vm7 = vcmp.eq.f32.partialorder %v2894_v0, 8.507059e+37 }
 0x37c   : > { %v2898_v41 = vsel %vm2895_vm7, %v2897_v23, %v2893_v32 }
 0x37d   : > { %3337 = vst.msk [vmem:[#allocation2 + $0x8] sm:$0xf] %vm3314_vm12, %v3328_v52  ;;  %3210 = vperm.xlu2 %5374, %v3129_v28   ;;  %v2908_v9 = vmul.f32 %v2898_v41, %v6939_v38  ;;  %v3399_v28 = vor.u32 %v3398_v7, %v3395_v46 }
 0x382   : > { %3297 = vperm.xlu0 %5375, %v3258_v49  }
 0x385   : > { %3225 = vperm.xlu2 %5374, %v3132_v58   ;;  %v5354_v58 = vld [vmem:[#allocation2 + $0x4] sm:$0xf0]  }
 0x38d   : > { %2934 = vrot.lane.b32.xlu2 %v2908_v9, %s5652_s0  ;;  %v5331_v9 = vor.u32 %v5354_v58, %v5330_v62 }
 0x38f   : > { %v3689_v31 = vshrl.u32 %v5331_v9, 16  ;;  %v3692_v5 = vshll.u32 %v5331_v9, 16 }
 0x395   : > { %3302 = vperm.xlu2 %5374, %v3259_v1  }
 0x396   : > { %v3196_v21 = vpop.permute.xlu2 %3195 }
 0x397   : > { %v3234_v38 = vmul.f32 %v3196_v21, %v6117_v36  ;;  %v5228_v36 = vld [vmem:[%s7349_s14 + $0x30] sm:$0xff]  ;;  %v3691_v21 = vrot.slane %v3689_v31, 3 }
 0x398   : > { %3766 = vmatpush.bf16.msrb.mxu2 %v5228_v36 }
 0x39f   : > { %v3147_v18 = vpop.permute.xlu1 %3146 }
 0x3a0   : > { %v3181_v53 = vmul.f32 %v3147_v18, %v1822_v4  ;;  %v1824_v18 = vunpack.c.l.bf16 %v1815_v11 }
 0x3ac   : > { %v3142_v61 = vpop.permute.xlu0 %3141 }
 0x3ad   : > { %v3180_v27 = vmul.f32 %v3142_v61, %v1821_v13  ;;  %v3157_v41 = vpop.permute.xlu1 %3156  ;;  %v3694_v61 = vrot.slane %v3692_v5, 4 }
 0x3af   : > { %v3243_v12 = vadd.f32 %v3234_v38, %v3180_v27 }
 0x3b1   : > { %v3306_v6 = vmul.f32 %v6756_v19, %v3243_v12  ;;  %v3500_v19 = vrot.slane %v3386_v24, 3 }
 0x3b3   : > { %v3329_v22 = vpack.c.bf16 %v3306_v6, %v3306_v6  ;;  %v3695_v6 = vor.u32 %v3694_v61, %v3691_v21 }
 0x3b4   : > { %v3278_v33 = vpop.permute.xlu0 %3277 }
 0x3b5   : > { %3338 = vst.msk [vmem:[#allocation2 + $0xc] sm:$0xf] %vm3314_vm12, %v3329_v22  ;;  %v3288_v16 = vpop.permute.xlu1 %3287 }
 0x3bc   : > { %v3201_v47 = vpop.permute.xlu0 %3200  ;;  %v7014_v8 = vld [vmem:[#allocation2 + $0x8] sm:$0xff]  }
 0x3bd   : > { %v3235_v29 = vmul.f32 %v3201_v47, %v6180_v40  ;;  %v3501_v63 = vrot.slane %v7014_v8, 3  ;;  %v5246_v34 = vunpack.c.l.b16 %v7014_v8  ;;  %v3401_v20 = vshrl.u32 %v7014_v8, 16  ;;  %v3216_v4 = vpop.permute.xlu1 %3215 }
 0x3be   : > { %v3404_v48 = vshll.u32 %v7014_v8, 16 }
 0x3bf   : > { %v3244_v43 = vadd.f32 %v3235_v29, %v3181_v53  ;;  %v3502_v55 = vsel %vm3499_vm8, %v3500_v19, %v3501_v63  ;;  %v3574_v3 = vpack.c.b16 %v5246_v34, %v3377_v59  ;;  %v3403_v52 = vrot.slane %v3401_v20, 3 }
 0x3c0   : > { %5019 = vmatmul.msk.bf16.vlgmr.msrb.gmra.mxu0 %vm1872_vm3, %v3502_v55  ;;  %v3406_v2 = vrot.slane %v3404_v48, 4  ;;  %v3925_v23 = vrot.slane %v3404_v48, 1  ;;  %v3238_v19 = vmul.f32 %v3216_v4, %v6249_v56  ;;  %v3183_v55 = vmul.f32 %v3157_v41, %v1824_v18 }
 0x3c1   : > { %v3307_v40 = vmul.f32 %v3273_v35, %v3244_v43  ;;  %5036 = vmatmul.msk.bf16.vlgmr.msrb.gmra.mxu1 %vm1872_vm3, %v3574_v3 }
 0x3c2   : > { %v7026_v49 = vor.u32 %v3406_v2, %v3403_v52  ;;  %v7032_v1 = vor.u32 %v3925_v23, %v3401_v20 }
 0x3c3   : > { %v3330_v42 = vpack.c.bf16 %v3307_v40, %v3307_v40 }
 0x3c4   : > { %v3152_v0 = vpop.permute.xlu0 %3151  ;;  %v3408_v32 = vsel %vm3391_vm9, %v3399_v28, %v7026_v49 }
 0x3c5   : > { %3339 = vst.msk [vmem:[#allocation2 + $0x10] sm:$0xf] %vm3314_vm12, %v3330_v42  ;;  %5006 = vmatmul.msk.bf16.vlgmr.msra.gmra.mxu3 %vm1872_vm3, %v3408_v32  ;;  %v3182_v57 = vmul.f32 %v3152_v0, %v1823_v14  ;;  %v3172_v32 = vpop.permute.xlu1 %3171  ;;  %v1818_v14 = vld [vmem:[%s5982_s25 + $0x18] sm:$0xff]  }
 0x3c6   : > { %v1827_v5 = vunpack.c.h.bf16 %v1818_v14 }
 0x3cc   : > { %v3206_v15 = vpop.permute.xlu0 %3205  ;;  %v5356_v50 = vld [vmem:[#allocation2 + $0xc] sm:$0xff]  }
 0x3cd   : > { %v3236_v13 = vmul.f32 %v3206_v15, %v6183_v39  ;;  %v3697_v38 = vshrl.u32 %v5356_v50, 16  ;;  %v3700_v27 = vshll.u32 %v5356_v50, 16  ;;  %v5326_v35 = vld [vmem:[#allocation2 + $0xc] sm:$0xff]   ;;  %v3293_v61 = vpop.permute.xlu1 %3292 }
 0x3cf   : > { %v3245_v44 = vadd.f32 %v3236_v13, %v3182_v57  ;;  %v3699_v12 = vrot.slane %v3697_v38, 3  ;;  %v3702_v37 = vrot.slane %v3700_v27, 4  ;;  %v3186_v27 = vmul.f32 %v3172_v32, %v1827_v5  ;;  %v5234_v32 = vld [vmem:[%s7349_s14 + $0x60] sm:$0xff] }
 0x3d1   : > { %v3308_v59 = vmul.f32 %v3278_v33, %v3245_v44  ;;  %5037 = vmatmul.msk.bf16.gmra.mxu1 %vm1872_vm3, %v5326_v35  ;;  %v7036_v22 = vor.u32 %v3702_v37, %v3699_v12  ;;  %v1825_v33 = vunpack.c.h.bf16 %v1815_v11 }
 0x3d3   : > { %v3331_v24 = vpack.c.bf16 %v3308_v59, %v3308_v59  ;;  %v3704_v39 = vsel %vm3391_vm9, %v3695_v6, %v7036_v22 }
 0x3d4   : > { %v3283_v30 = vpop.permute.xlu0 %3282  ;;  %5053 = vmatmul.msk.bf16.vlgmr.msrb.gmra.mxu2 %vm1872_vm3, %v3704_v39 }
 0x3d5   : > { %3340 = vst.msk [vmem:[#allocation2 + $0x14] sm:$0xf] %vm3314_vm12, %v3331_v24 }
 0x3d8   : > { %v2432_v36 = vpop.xlane.xlu2 %2431 }
 0x3d9   : > { %v2441_v60 = vadd.f32 %v2432_v36, %v6999_v25 }
 0x3db   : > { %v7045_v10 = vadd.f32 %v6936_v17, %v2441_v60 }
 0x3dc   : > { %v3162_v53 = vpop.permute.xlu0 %3161  ;;  %v7048_v47 = vld [vmem:[#allocation2 + $0x10] sm:$0xff]  }
 0x3dd   : > { %v4975_v46 = vmul.f32 -1.442695, %v7045_v10  ;;  %v3184_v7 = vmul.f32 %v3162_v53, %v1825_v33  ;;  %v3503_v29 = vrot.slane %v7048_v47, 3  ;;  %v3410_v34 = vshrl.u32 %v7048_v47, 16 }
 0x3de   : > { %v3413_v20 = vshll.u32 %v7048_v47, 16 }
 0x3df   : > { %5590 = vpow2.f32 %v4975_v46  ;;  %v3247_v25 = vadd.f32 %v3238_v19, %v3184_v7  ;;  %v3504_v17 = vsel %vm3499_vm8, %v3501_v63, %v3503_v29  ;;  %v3412_v48 = vrot.slane %v3410_v34, 3 }
 0x3e0   : > { %v3211_v56 = vpop.permute.xlu2 %3210  ;;  %5020 = vmatmul.msk.bf16.gmra.mxu0 %vm1872_vm3, %v3504_v17  ;;  %v3415_v43 = vrot.slane %v3413_v20, 4  ;;  %v3930_v63 = vrot.slane %v3413_v20, 1 }
 0x3e1   : > { %v3310_v3 = vmul.f32 %v3288_v16, %v3247_v25  ;;  %v3237_v52 = vmul.f32 %v3211_v56, %v6232_v26 }
 0x3e2   : > { %v7059_v28 = vor.u32 %v3415_v43, %v3412_v48  ;;  %v7068_v26 = vsel %vm819_vm1, %v7032_v1, %v3930_v63  ;;  %v3934_v41 = vor.u32 %v3930_v63, %v3410_v34 }
 0x3e3   : > { %v3333_v2 = vpack.c.bf16 %v3310_v3, %v3310_v3  ;;  %v3246_v40 = vadd.f32 %v3237_v52, %v3183_v55 }
 0x3e4   : > { %v3167_v42 = vpop.permute.xlu0 %3166  ;;  %v3417_v62 = vsel %vm3391_vm9, %v7026_v49, %v7059_v28  ;;  %v1826_v49 = vunpack.c.l.bf16 %v1818_v14 }
 0x3e5   : > { %v5591_v58 = vpop.eup %5590  ;;  %3342 = vst.msk [vmem:[#allocation2 + $0x1c] sm:$0xf] %vm3314_vm12, %v3333_v2  ;;  %v3309_v0 = vmul.f32 %v3283_v30, %v3246_v40  ;;  %5007 = vmatmul.msk.bf16.gmra.mxu3 %vm1872_vm3, %v3417_v62 }
 0x3e6   : > { %v2584_v23 = vadd.f32 1.0, %v5591_v58  ;;  %v3185_v50 = vmul.f32 %v3167_v42, %v1826_v49  ;;  %v5233_v58 = vld [vmem:[%s7349_s14 + $0x58] sm:$0xff] }
 0x3e7   : > { %v3332_v9 = vpack.c.bf16 %v3309_v0, %v3309_v0  ;;  %3992 = vmatpush.bf16.msra.mxu0 %v5233_v58 }
 0x3e8   : > { %5592 = vrcp.f32 %v2584_v23  ;;  %v3226_v31 = vpop.permute.xlu2 %3225  ;;  %v2714_v16 = vand.u32 2147483647, %v2584_v23  ;;  %vm2710_vm11 = vweird.f32 %v2584_v23 }
 0x3e9   : > { %3341 = vst.msk [vmem:[#allocation2 + $0x18] sm:$0xf] %vm3314_vm12, %v3332_v9  ;;  %v3240_v21 = vmul.f32 %v3226_v31, %v6338_v45 }
 0x3ea   : > { %vm2715_vm14 = vcmp.eq.f32.partialorder %v2714_v16, 8.507059e+37 }
 0x3eb   : > { %v3249_v45 = vadd.f32 %v3240_v21, %v3186_v27  ;;  %v5232_v27 = vld [vmem:[%s7349_s14 + $0x50] sm:$0xff] }
 0x3ec   : > { %v3221_v15 = vpop.permute.xlu0 %3220  ;;  %3993 = vmatpush.bf16.msra.mxu0 %v5232_v27 }
 0x3ed   : > { %v3239_v57 = vmul.f32 %v3221_v15, %v6335_v54  ;;  %v2716_v54 = vand.u32 2147483648, %v2584_v23 }
 0x3ee   : > { %v5593_v13 = vpop.eup %5592 }
 0x3ef   : > { %v3248_v38 = vadd.f32 %v3239_v57, %v3185_v50  ;;  %v2706_v1 = vmul.f32 %v5593_v13, %v2584_v23  ;;  %vm2711_vm10 = vweird.f32 %v5593_v13  ;;  %v2717_v7 = vor.u32 1.1754944e-38, %v2716_v54 }
 0x3f0   : > { %v5327_v44 = vld [vmem:[#allocation2 + $0x14] sm:$0xff]   ;;  %vm2712_vm13 = vmor %vm2710_vm11, %vm2711_vm10  ;;  %v2935_v52 = vpop.permute.xlu2 %2934 }
 0x3f1   : > { %v7074_v35 = vld [vmem:[#allocation2 + $0x18] sm:$0xff]   ;;  %v3311_v12 = vmul.f32 %v3293_v61, %v3248_v38  ;;  %v2707_v37 = vsub.f32 1.0, %v2706_v1  ;;  %5038 = vmatmul.msk.bf16.gmra.mxu1 %vm1872_vm3, %v5327_v44  ;;  %v5231_v1 = vld [vmem:[%s7349_s14 + $0x48] sm:$0xff] }
 0x3f2   : > { %v3505_v59 = vrot.slane %v7074_v35, 3  ;;  %v3419_v6 = vshrl.u32 %v7074_v35, 16  ;;  %v5358_v24 = vld [vmem:[#allocation2 + $0x14] sm:$0xff]   ;;  %v3422_v30 = vshll.u32 %v7074_v35, 16  ;;  %v5255_v9 = vunpack.c.h.b16 %v7074_v35  ;;  %3844 = vmatpush.bf16.msrb.mxu3 %v5231_v1 }
 0x3f3   : > { %v3334_v39 = vpack.c.bf16 %v3311_v12, %v3311_v12  ;;  %v2708_v11 = vmul.f32 %v5593_v13, %v2707_v37  ;;  %v3706_v18 = vshrl.u32 %v5358_v24, 16  ;;  %v3709_v19 = vshll.u32 %v5358_v24, 16  ;;  %v5230_v24 = vld [vmem:[%s7349_s14 + $0x40] sm:$0xff] }
 0x3f4   : > { %v3506_v36 = vsel %vm3499_vm8, %v3503_v29, %v3505_v59  ;;  %v3421_v4 = vrot.slane %v3419_v6, 3  ;;  %v3298_v60 = vpop.permute.xlu0 %3297  ;;  %v3424_v33 = vrot.slane %v3422_v30, 4  ;;  %v3938_v55 = vrot.slane %v3422_v30, 1 }
 0x3f5   : > { %5021 = vmatmul.msk.bf16.gmra.mxu0 %vm1872_vm3, %v3506_v36  ;;  %3343 = vst.msk [vmem:[#allocation2 + $0x20] sm:$0xf] %vm3314_vm12, %v3334_v39  ;;  %v2709_v53 = vadd.f32 %v5593_v13, %v2708_v11  ;;  %v3312_v46 = vmul.f32 %v3298_v60, %v3249_v45  ;;  %v3708_v20 = vrot.slane %v3706_v18, 3  ;;  %v3711_v25 = vrot.slane %v3709_v19, 4 }
 0x3f6   : > { %v3425_v34 = vor.u32 %v3424_v33, %v3421_v4  ;;  %v7094_v40 = vsel %vm819_vm1, %v3934_v41, %v3938_v55  ;;  %v7096_v42 = vor.u32 %v3938_v55, %v3419_v6  ;;  %3845 = vmatpush.bf16.msrb.mxu3 %v5230_v24 }
 0x3f7   : > { %v2713_v17 = vsel %vm2712_vm13, %v5593_v13, %v2709_v53  ;;  %v3335_v29 = vpack.c.bf16 %v3312_v46, %v3312_v46  ;;  %v3712_v43 = vor.u32 %v3711_v25, %v3708_v20  ;;  %v5351_v20 = vld [vmem:[#allocation2 + $0x14] sm:$0xff]  }
 0x3f8   : > { %v2718_v48 = vsel %vm2715_vm14, %v2717_v7, %v2713_v17  ;;  %v3426_v56 = vsel %vm3391_vm9, %v7059_v28, %v3425_v34 }
 0x3f9   : > { %v2728_v3 = vmul.f32 %v2718_v48, %v7045_v10  ;;  %3344 = vst.msk [vmem:[#allocation2 + $0x24] sm:$0xf] %vm3314_vm12, %v3335_v29  ;;  %5008 = vmatmul.msk.bf16.gmra.mxu3 %vm1872_vm3, %v3426_v56  ;;  %v3713_v2 = vsel %vm3391_vm9, %v7036_v22, %v3712_v43  ;;  %v5235_v10 = vld [vmem:[%s7349_s14 + $0x68] sm:$0xff] }
 0x3fa   : > { %5054 = vmatmul.msk.bf16.gmra.mxu2 %vm1872_vm3, %v3713_v2  ;;  %4074 = vmatpush.bf16.msra.mxu1 %v5235_v10 }
 0x3fb   : > { %v2953_v62 = vsub.f32 %v2728_v3, %v2935_v52 }
 0x3fc   : > { %v5359_v28 = vld [vmem:[#allocation2 + $0x1c] sm:$0xff]  }
 0x3fd   : > { %v4993_v63 = vmul.f32 -1.442695, %v2953_v62  ;;  %v3715_v0 = vshrl.u32 %v5359_v28, 16  ;;  %v3718_v22 = vshll.u32 %v5359_v28, 16  ;;  %v5352_v29 = vld [vmem:[#allocation2 + $0x1c] sm:$0xff]  }
 0x3fe   : > { %4075 = vmatpush.bf16.msra.mxu1 %v5234_v32 }
 0x3ff   : > { %5594 = vpow2.f32 %v4993_v63  ;;  %v3717_v5 = vrot.slane %v3715_v0, 3  ;;  %v3720_v15 = vrot.slane %v3718_v22, 4 }
 0x400   : > { %v3354_v23 = vld [vmem:[#allocation2 + $0x20] sm:$0xff]  }
 0x401   : > { %v3355_v41 = vld [vmem:[#allocation2 + $0x24] sm:$0x7]  ;;  %v3384_v14 = vunpack.c.l.b16 %v3354_v23  ;;  %v3385_v31 = vunpack.c.h.b16 %v3354_v23  ;;  %v3428_v61 = vshrl.u32 %v3354_v23, 16  ;;  %v3431_v38 = vshll.u32 %v3354_v23, 16 }
 0x402   : > { %v3497_v49 = vunpack.c.l.b16 %v3355_v41  ;;  %v7116_v44 = vor.u32 %v3720_v15, %v3717_v5  ;;  %v7143_v25 = vld [vmem:[#allocation2 + $0x20] sm:$0xff]  }
 0x403   : > { %v3577_v50 = vpack.c.b16 %v3384_v14, %v5255_v9  ;;  %v3430_v37 = vrot.slane %v3428_v61, 3  ;;  %v3433_v6 = vrot.slane %v3431_v38, 4  ;;  %v3578_v4 = vpack.c.b16 %v3385_v31, %v3385_v31 }
 0x404   : > { %v3498_v57 = vpack.c.b16 %v3497_v49, %v3384_v14  ;;  %v3722_v45 = vsel %vm3391_vm9, %v3712_v43, %v7116_v44  ;;  %v3944_v17 = vshll.u32 %v7143_v25, 16 }
 0x405   : > { %v5595_v13 = vpop.eup %5594  ;;  %5039 = vmatmul.msk.bf16.gmra.mxu1 %vm1872_vm3, %v3577_v50  ;;  %v3434_v54 = vor.u32 %v3433_v6, %v3430_v37  ;;  %v5242_v37 = vld [vmem:[%s7349_s14 + $0x80] sm:$0xff] }
 0x406   : > { %v3507_v21 = vrot.slane %v3498_v57, 3  ;;  %v2989_v16 = vadd.f32 1.0, %v5595_v13  ;;  %v7146_v48 = vrot.slane %v3944_v17, 1  ;;  %v3303_v17 = vpop.permute.xlu2 %3302 }
 0x407   : > { %v3435_v30 = vsel %vm3391_vm9, %v3425_v34, %v3434_v54  ;;  %v5349_v34 = vld [vmem:[#allocation2 + $0xc] sm:$0xff]  }
 0x408   : > { %v3508_v12 = vsel %vm3499_vm8, %v3505_v59, %v3507_v21  ;;  %5596 = vrcp.f32 %v2989_v16  ;;  %v3121_v36 = vand.u32 2147483648, %v2989_v16  ;;  %v3119_v33 = vand.u32 2147483647, %v2989_v16 }
 0x409   : > { %5022 = vmatmul.msk.bf16.gmra.mxu0 %vm1872_vm3, %v3508_v12  ;;  %5009 = vmatmul.msk.bf16.gmra.mxu3 %vm1872_vm3, %v3435_v30  ;;  %vm3115_vm4 = vweird.f32 %v2989_v16  ;;  %v5240_v12 = vld [vmem:[%s7349_s14 + $0x70] sm:$0xff] }
 0x40a   : > { %5055 = vmatmul.msk.bf16.gmra.mxu2 %vm1872_vm3, %v3722_v45  ;;  %v3122_v19 = vor.u32 1.1754944e-38, %v3121_v36  ;;  %vm3120_vm5 = vcmp.eq.f32.partialorder %v3119_v33, 8.507059e+37 }
 0x40e   : > { %v5597_v59 = vpop.eup %5596 }
 0x40f   : > { %v3111_v39 = vmul.f32 %v5597_v59, %v2989_v16  ;;  %vm3116_vm15 = vweird.f32 %v5597_v59 }
 0x410   : > { %vm3117_vm0 = vmor %vm3115_vm4, %vm3116_vm15 }
 0x411   : > { %v3112_v11 = vsub.f32 1.0, %v3111_v39 }
 0x413   : > { %v3113_v60 = vmul.f32 %v5597_v59, %v3112_v11  ;;  %v5635_v11 = vld [vmem:[%s5982_s25 + $0x20] sm:$0xf] }
 0x414   : > { %v1828_v36 = vunpack.c.l.bf16 %v5635_v11 }
 0x415   : > { %5040 = vmatmul.msk.bf16.gmra.mxu1 %vm1872_vm3, %v3578_v4  ;;  %v3114_v18 = vadd.f32 %v5597_v59, %v3113_v60 }
 0x417   : > { %v3118_v53 = vsel %vm3117_vm0, %v5597_v59, %v3114_v18 }
 0x418   : > { %v3123_v46 = vsel %vm3120_vm5, %v3122_v19, %v3118_v53 }
 0x419   : > { %5023 = vmatmul.msk.bf16.gmra.mxu0 %vm1872_vm3, %v3507_v21  ;;  %3176 = vperm.xlu1 %5376, %v3123_v46   ;;  %v3133_v7 = vsub.f32 1.0, %v3123_v46 }
 0x41a   : > { %5010 = vmatmul.msk.bf16.gmra.mxu3 %vm1872_vm3, %v3434_v54 }
 0x41b   : > { %3230 = vperm.xlu0 %5375, %v3133_v7  }
 0x425   : > { %5104 = vmatmul.msk.bf16.vlgmr.msra.gmra.mxu1 %vm1872_vm3, %v5349_v34 }
 0x429   : > { %5087 = vmatmul.msk.bf16.vlgmr.msra.gmra.mxu0 %vm1872_vm3, %v7068_v26 }
 0x42a   : > { %5070 = vmatmul.msk.bf16.vlgmr.msrb.gmra.mxu3 %vm1872_vm3, %v7014_v8  ;;  %v3947_v8 = vsel %vm819_vm1, %v7096_v42, %v7146_v48  ;;  %v5241_v42 = vld [vmem:[%s7349_s14 + $0x78] sm:$0xff] }
 0x42b   : > { %4222 = vmatpush.bf16.msra.mxu2 %v5241_v42 }
 0x42f   : > { %4223 = vmatpush.bf16.msra.mxu2 %v5240_v12 }
 0x435   : > { %5105 = vmatmul.msk.bf16.gmra.mxu1 %vm1872_vm3, %v5351_v20 }
 0x439   : > { %5088 = vmatmul.msk.bf16.gmra.mxu0 %vm1872_vm3, %v7094_v40 }
 0x43a   : > { %5071 = vmatmul.msk.bf16.gmra.mxu3 %vm1872_vm3, %v7048_v47 }
 0x43d   : > { %v3545_v26 = vpop.f32.mrf.mxu0 }
 0x43e   : > { %v3615_v56 = vpop.f32.mrf.mxu1 }
 0x445   : > { %5106 = vmatmul.msk.bf16.gmra.mxu1 %vm1872_vm3, %v5352_v29  ;;  %v3547_v3 = vpop.f32.mrf.mxu0 }
 0x446   : > { %v3617_v40 = vpop.f32.mrf.mxu1 }
 0x448   : > { %v3472_v43 = vpop.f32.mrf.mxu3 }
 0x449   : > { %5089 = vmatmul.msk.bf16.gmra.mxu0 %vm1872_vm3, %v3947_v8  ;;  %v3546_v55 = vadd.f32 %v3545_v26, %v3472_v43 }
 0x44a   : > { %5072 = vmatmul.msk.bf16.gmra.mxu3 %vm1872_vm3, %v7074_v35  ;;  %v5243_v35 = vld [vmem:[%s7349_s14 + $0x88] sm:$0xff] }
 0x44b   : > { %v3639_v47 = vadd.f32 %v3615_v56, %v3546_v55  ;;  %4309 = vmatpush.bf16.msra.mxu3 %v5243_v35 }
 0x44e   : > { %v3620_v63 = vpop.f32.mrf.mxu1 }
 0x44f   : > { %4310 = vmatpush.bf16.msra.mxu3 %v5242_v37 }
 0x450   : > { %v3474_v52 = vpop.f32.mrf.mxu3 }
 0x451   : > { %v3548_v2 = vadd.f32 %v3547_v3, %v3474_v52  ;;  %v3889_v52 = vld [vmem:[#allocation2 + $0x2c] sm:$0x1] }
 0x453   : > { %v3640_v62 = vadd.f32 %v3617_v40, %v3548_v2 }
 0x456   : > { %v3622_v32 = vpop.f32.mrf.mxu1 }
 0x457   : > { %v3768_v28 = vpop.f32.mrf.mxu2 }
 0x458   : > { %v7155_v10 = vadd.f32 %v3768_v28, %v3639_v47  ;;  %v5271_v28 = vunpack.c.h.b16 %v7143_v25 }
 0x45a   : > { %5073 = vmatmul.msk.bf16.gmra.mxu3 %vm1872_vm3, %v7143_v25 }
 0x45d   : > { %v3550_v0 = vpop.f32.mrf.mxu0 }
 0x45f   : > { %v3770_v58 = vpop.f32.mrf.mxu2 }
 0x460   : > { %v7165_v22 = vadd.f32 %v3770_v58, %v3640_v62  ;;  %v3914_v62 = vunpack.c.l.b16 %v3889_v52 }
 0x465   : > { %v3552_v9 = vpop.f32.mrf.mxu0 }
 0x468   : > { %v3477_v23 = vpop.f32.mrf.mxu3 }
 0x469   : > { %v3551_v41 = vadd.f32 %v3550_v0, %v3477_v23 }
 0x46b   : > { %v3641_v14 = vadd.f32 %v3620_v63, %v3551_v41 }
 0x46e   : > { %v3625_v31 = vpop.f32.mrf.mxu1 }
 0x470   : > { %v3479_v49 = vpop.f32.mrf.mxu3 }
 0x471   : > { %v3553_v5 = vadd.f32 %v3552_v9, %v3479_v49 }
 0x472   : > { %v3555_v15 = vpop.f32.mrf.mxu0 }
 0x473   : > { %v3642_v50 = vadd.f32 %v3622_v32, %v3553_v5 }
 0x476   : > { %v3627_v57 = vpop.f32.mrf.mxu1 }
 0x47a   : > { %v3557_v21 = vpop.f32.mrf.mxu0 }
 0x47c   : > { %v3482_v13 = vpop.f32.mrf.mxu3 }
 0x47d   : > { %v3556_v61 = vadd.f32 %v3555_v15, %v3482_v13  ;;  %v3773_v38 = vpop.f32.mrf.mxu2  ;;  %v5643_v13 = vld [vmem:[#allocation2 + $0xc] sm:$0xf0] }
 0x47e   : > { %v7167_v1 = vadd.f32 %v3773_v38, %v3641_v14 }
 0x47f   : > { %v3643_v27 = vadd.f32 %v3625_v31, %v3556_v61  ;;  %v3948_v31 = vshrl.u32 %v7143_v25, 16 }
 0x482   : > { %v3630_v16 = vpop.f32.mrf.mxu1 }
 0x484   : > { %v3484_v6 = vpop.f32.mrf.mxu3 }
 0x485   : > { %v3558_v24 = vadd.f32 %v3557_v21, %v3484_v6  ;;  %v3775_v45 = vpop.f32.mrf.mxu2  ;;  %v3950_v21 = vor.u32 %v3948_v31, %v7146_v48 }
 0x486   : > { %v3560_v54 = vpop.f32.mrf.mxu0  ;;  %v7175_v30 = vadd.f32 %v3775_v45, %v3642_v50 }
 0x487   : > { %v7177_v59 = vadd.f32 %v3627_v57, %v3558_v24  ;;  %v4111_v57 = vld [vmem:[#allocation2 + $0xc] sm:$0xff]   ;;  %v7200_v24 = vld [vmem:[#allocation2 + $0x14] sm:$0xff] }
 0x488   : > { %v4268_v45 = vrot.slane %v7200_v24, 1 }
 0x48a   : > { %v3632_v39 = vpop.f32.mrf.mxu1 }
 0x48b   : > { %v3177_v4 = vpop.permute.xlu1 %3176 }
 0x48c   : > { %v3187_v18 = vmul.f32 %v3177_v4, %v1828_v36  ;;  %v3487_v7 = vpop.f32.mrf.mxu3 }
 0x48d   : > { %v3231_v60 = vpop.permute.xlu0 %3230  ;;  %v3778_v53 = vpop.f32.mrf.mxu2  ;;  %v3561_v20 = vadd.f32 %v3560_v54, %v3487_v7 }
 0x48e   : > { %v3562_v33 = vpop.f32.mrf.mxu0  ;;  %v3241_v19 = vmul.f32 %v3231_v60, %v6393_v51  ;;  %v7181_v46 = vadd.f32 %v3778_v53, %v3643_v27  ;;  %v5644_v27 = vld [vmem:[#allocation2 + $0xc] sm:$0xe] }
 0x48f   : > { %v7184_v55 = vadd.f32 %v3630_v16, %v3561_v20  ;;  %v5645_v54 = vor.u32 %v5644_v27, %v5643_v13 }
 0x490   : > { %v3250_v34 = vadd.f32 %v3241_v19, %v3187_v18 }
 0x491   : > { %v4267_v36 = vrot.slane %v5645_v54, 1 }
 0x492   : > { %v3313_v29 = vmul.f32 %v3303_v17, %v3250_v34  ;;  %v3635_v26 = vpop.f32.mrf.mxu1 }
 0x494   : > { %v3336_v8 = vpack.c.bf16 %v3313_v29, %v3313_v29  ;;  %v3489_v43 = vpop.f32.mrf.mxu3 }
 0x495   : > { %v3563_v47 = vadd.f32 %v3562_v33, %v3489_v43  ;;  %v4269_v33 = vsel %vm1545_vm2, %v4267_v36, %v4268_v45  ;;  %v3780_v13 = vpop.f32.mrf.mxu2 }
 0x496   : > { %v3565_v56 = vpop.f32.mrf.mxu0  ;;  %3345 = vst.msk [vmem:[#allocation2 + $0x28] sm:$0xf] %vm3314_vm12, %v3336_v8 }
 0x497   : > { %v7187_v58 = vadd.f32 %v3632_v39, %v3563_v47 }
 0x49a   : > { %v3637_v3 = vpop.f32.mrf.mxu1 }
 0x49b   : > { %v4158_v3 = vshll.u32 %v7200_v24, 16 }
 0x49d   : > { %v3657_v2 = vld [vmem:[#allocation2 + $0x28] sm:$0xff]   ;;  %v3492_v63 = vpop.f32.mrf.mxu3 }
 0x49e   : > { %v3567_v51 = vpop.f32.mrf.mxu0  ;;  %v3888_v40 = vld [vmem:[#allocation2 + $0x28] sm:$0xf]  ;;  %v3682_v42 = vunpack.c.l.b16 %v3657_v2  ;;  %v3566_v0 = vadd.f32 %v3565_v56, %v3492_v63  ;;  %v4035_v48 = vunpack.c.h.b16 %v3657_v2  ;;  %v4153_v56 = vshll.u32 %v4111_v57, 16 }
 0x49f   : > { %v3913_v35 = vunpack.c.l.b16 %v3888_v40 }
 0x4a0   : > { %v3687_v32 = vpack.c.b16 %v3682_v42, %v5271_v28  ;;  %v3810_v23 = vpack.c.b16 %v3682_v42, %v3682_v42  ;;  %v7194_v37 = vadd.f32 %v3635_v26, %v3566_v0  ;;  %v4040_v60 = vpack.c.b16 %v4035_v48, %v4035_v48 }
 0x4a1   : > { %v4039_v41 = vpack.c.b16 %v3913_v35, %v5271_v28  ;;  %v3919_v9 = vpack.c.b16 %v3914_v62, %v3913_v35  ;;  %v4155_v40 = vrot.slane %v4153_v56, 1  ;;  %v4151_v62 = vshrl.u32 %v4111_v57, 16 }
 0x4a2   : > { %5074 = vmatmul.msk.bf16.gmra.mxu3 %vm1872_vm3, %v3810_v23  ;;  %v3724_v14 = vshrl.u32 %v3687_v32, 16  ;;  %v3727_v49 = vshll.u32 %v3687_v32, 16  ;;  %v4077_v39 = vpop.f32.mrf.mxu1  ;;  %v4160_v28 = vrot.slane %v4158_v3, 1  ;;  %v5238_v32 = vld [vmem:[#allocation2 + $0x24] sm:$0xff] }
 0x4a3   : > { %5107 = vmatmul.msk.bf16.gmra.mxu1 %vm1872_vm3, %v4039_v41  ;;  %v3952_v5 = vshll.u32 %v3919_v9, 16  ;;  %v3956_v19 = vshrl.u32 %v3919_v9, 16  ;;  %v4156_v42 = vor.u32 %v4155_v40, %v4151_v62 }
 0x4a4   : > { %v3726_v15 = vrot.slane %v3724_v14, 3  ;;  %v3729_v50 = vrot.slane %v3727_v49, 4  ;;  %v4272_v14 = vrot.slane %v5238_v32, 1 }
 0x4a5   : > { %v3954_v61 = vrot.slane %v3952_v5, 1  ;;  %v3494_v16 = vpop.f32.mrf.mxu3 }
 0x4a6   : > { %v3730_v38 = vor.u32 %v3729_v50, %v3726_v15  ;;  %v3995_v6 = vpop.f32.mrf.mxu0 }
 0x4a7   : > { %v3955_v12 = vsel %vm819_vm1, %v3950_v21, %v3954_v61  ;;  %v3958_v53 = vor.u32 %v3956_v19, %v3954_v61  ;;  %v4162_v21 = vshrl.u32 %v7200_v24, 16 }
 0x4a8   : > { %5090 = vmatmul.msk.bf16.gmra.mxu0 %vm1872_vm3, %v3955_v12  ;;  %v3731_v25 = vsel %vm3391_vm9, %v7116_v44, %v3730_v38  ;;  %v5127_v12 = vld [vmem:[#allocation2 + $0x2c] sm:$0xf] }
 0x4a9   : > { %5056 = vmatmul.msk.bf16.gmra.mxu2 %vm1872_vm3, %v3731_v25  ;;  %v4164_v16 = vor.u32 %v4162_v21, %v4160_v28  ;;  %v5239_v25 = vld [vmem:[#allocation2 + $0x2c] sm:$0x10] }
 0x4aa   : > { %v4079_v34 = vpop.f32.mrf.mxu1  ;;  %v5128_v48 = vor.u32 %v5239_v25, %v5127_v12 }
 0x4ac   : > { %v4274_v36 = vrot.slane %v5128_v48, 1 }
 0x4ad   : > { %v3847_v11 = vpop.f32.mrf.mxu3 }
 0x4ae   : > { %v3871_v4 = vadd.f32 %v3847_v11, %v7155_v10  ;;  %v3997_v44 = vpop.f32.mrf.mxu0  ;;  %v5237_v10 = vld [vmem:[#allocation2 + $0x1c] sm:$0xff] }
 0x4af   : > { %v4270_v8 = vrot.slane %v5237_v10, 1  ;;  %v4166_v5 = vshll.u32 %v5237_v10, 16 }
 0x4b0   : > { %v4019_v18 = vadd.f32 %v3995_v6, %v3871_v4  ;;  %v4174_v4 = vshll.u32 %v5238_v32, 16 }
 0x4b1   : > { %v4271_v52 = vsel %vm1545_vm2, %v4268_v45, %v4270_v8  ;;  %v4273_v50 = vsel %vm1545_vm2, %v4270_v8, %v4272_v14  ;;  %v4168_v61 = vrot.slane %v4166_v5, 1 }
 0x4b2   : > { %5154 = vmatmul.msk.bf16.vlgmr.msra.gmra.mxu3 %vm1872_vm3, %v4269_v33  ;;  %v7210_v17 = vadd.f32 %v4077_v39, %v4019_v18  ;;  %v4170_v33 = vshrl.u32 %v5237_v10, 16  ;;  %v4176_v18 = vrot.slane %v4174_v4, 1 }
 0x4b3   : > { %5108 = vmatmul.msk.bf16.gmra.mxu1 %vm1872_vm3, %v4040_v60  ;;  %v4169_v54 = vsel %vm819_vm1, %v4164_v16, %v4168_v61 }
 0x4b5   : > { %v3849_v7 = vpop.f32.mrf.mxu3 }
 0x4b6   : > { %v3872_v20 = vadd.f32 %v3849_v7, %v7165_v22  ;;  %v4000_v26 = vpop.f32.mrf.mxu0  ;;  %v4082_v22 = vpop.f32.mrf.mxu1  ;;  %v4178_v7 = vshrl.u32 %v5238_v32, 16 }
 0x4b8   : > { %5091 = vmatmul.msk.bf16.gmra.mxu0 %vm1872_vm3, %v3958_v53  ;;  %v4020_v29 = vadd.f32 %v3997_v44, %v3872_v20  ;;  %v4172_v44 = vor.u32 %v4170_v33, %v4168_v61  ;;  %v4182_v53 = vshll.u32 %v5128_v48, 16 }
 0x4b9   : > { %5057 = vmatmul.msk.bf16.gmra.mxu2 %vm1872_vm3, %v3730_v38  ;;  %v3797_v38 = vadd.f32 %v3780_v13, %v7177_v59  ;;  %v4275_v59 = vsel %vm1545_vm2, %v4272_v14, %v4274_v36 }
 0x4ba   : > { %v7215_v51 = vadd.f32 %v4079_v34, %v4020_v29  ;;  %v4177_v19 = vsel %vm819_vm1, %v4172_v44, %v4176_v18  ;;  %v4180_v34 = vor.u32 %v4178_v7, %v4176_v18  ;;  %v4184_v20 = vrot.slane %v4182_v53, 1 }
 0x4bc   : > { %v4185_v29 = vsel %vm819_vm1, %v4180_v34, %v4184_v20 }
 0x4bd   : > { %v3852_v43 = vpop.f32.mrf.mxu3 }
 0x4be   : > { %v3873_v47 = vadd.f32 %v3852_v43, %v7167_v1  ;;  %v4002_v35 = vpop.f32.mrf.mxu0  ;;  %v4161_v1 = vsel %vm819_vm1, %v4156_v42, %v4160_v28  ;;  %v4084_v9 = vpop.f32.mrf.mxu1 }
 0x4c0   : > { %v4021_v2 = vadd.f32 %v4000_v26, %v3873_v47  ;;  %v4186_v26 = vshrl.u32 %v5128_v48, 16 }
 0x4c2   : > { %5155 = vmatmul.msk.bf16.gmra.mxu3 %vm1872_vm3, %v4271_v52  ;;  %v7221_v23 = vadd.f32 %v4082_v22, %v4021_v2  ;;  %v4188_v8 = vor.u32 %v4186_v26, %v4184_v20 }
 0x4c5   : > { %v3854_v63 = vpop.f32.mrf.mxu3 }
 0x4c6   : > { %v3874_v0 = vadd.f32 %v3854_v63, %v7175_v30  ;;  %v4005_v15 = vpop.f32.mrf.mxu0  ;;  %v4087_v27 = vpop.f32.mrf.mxu1 }
 0x4c8   : > { %v4022_v41 = vadd.f32 %v4002_v35, %v3874_v0 }
 0x4c9   : > { %5137 = vmatmul.msk.bf16.vlgmr.msra.gmra.mxu2 %vm1872_vm3, %v4161_v1 }
 0x4ca   : > { %v7225_v57 = vadd.f32 %v4084_v9, %v4022_v41 }
 0x4cd   : > { %v3857_v49 = vpop.f32.mrf.mxu3 }
 0x4ce   : > { %v3875_v31 = vadd.f32 %v3857_v49, %v7181_v46  ;;  %v4007_v39 = vpop.f32.mrf.mxu0  ;;  %v4089_v24 = vpop.f32.mrf.mxu1 }
 0x4d0   : > { %v4023_v30 = vadd.f32 %v4005_v15, %v3875_v31 }
 0x4d2   : > { %5156 = vmatmul.msk.bf16.gmra.mxu3 %vm1872_vm3, %v4273_v50  ;;  %v7232_v45 = vadd.f32 %v4087_v27, %v4023_v30  ;;  %v7257_v27 = vld [vmem:[%s7350_s15] ss:$0 sm:$0xff] }
 0x4d5   : > { %v3859_v46 = vpop.f32.mrf.mxu3 }
 0x4d6   : > { %v3876_v6 = vadd.f32 %v3859_v46, %v3797_v38 }
 0x4d8   : > { %v4024_v11 = vadd.f32 %v4007_v39, %v3876_v6 }
 0x4d9   : > { %5138 = vmatmul.msk.bf16.gmra.mxu2 %vm1872_vm3, %v4169_v54 }
 0x4da   : > { %v7235_v60 = vadd.f32 %v4089_v24, %v4024_v11 }
 0x4dd   : > { %v3862_v10 = vpop.f32.mrf.mxu3 }
 0x4e2   : > { %5157 = vmatmul.msk.bf16.gmra.mxu3 %vm1872_vm3, %v4275_v59 }
 0x4e5   : > { %v3864_v56 = vpop.f32.mrf.mxu3 }
 0x4e9   : > { %5139 = vmatmul.msk.bf16.gmra.mxu2 %vm1872_vm3, %v4177_v19 }
 0x4f2   : > { %5158 = vmatmul.msk.bf16.gmra.mxu3 %vm1872_vm3, %v4274_v36 }
 0x4f9   : > { %5140 = vmatmul.msk.bf16.gmra.mxu2 %vm1872_vm3, %v4185_v29 }
 0x509   : > { %5141 = vmatmul.msk.bf16.gmra.mxu2 %vm1872_vm3, %v4188_v8 }
 0x520   : > { %v4092_v43 = vpop.f32.mrf.mxu1 }
 0x525   : > { %v4010_v47 = vpop.f32.mrf.mxu0  ;;  %v3867_v3 = vpop.f32.mrf.mxu3 }
 0x528   : > { %v4094_v52 = vpop.f32.mrf.mxu1 }
 0x52c   : > { %v3783_v22 = vpop.f32.mrf.mxu2 }
 0x52d   : > { %v3798_v2 = vadd.f32 %v3783_v22, %v7184_v55  ;;  %v4012_v40 = vpop.f32.mrf.mxu0  ;;  %v3869_v62 = vpop.f32.mrf.mxu3 }
 0x52f   : > { %v3877_v42 = vadd.f32 %v3862_v10, %v3798_v2 }
 0x530   : > { %v4097_v28 = vpop.f32.mrf.mxu1 }
 0x531   : > { %v4025_v1 = vadd.f32 %v4010_v47, %v3877_v42 }
 0x533   : > { %v7246_v9 = vadd.f32 %v4092_v43, %v4025_v1 }
 0x534   : > { %v3785_v35 = vpop.f32.mrf.mxu2 }
 0x535   : > { %v3799_v63 = vadd.f32 %v3785_v35, %v7187_v58  ;;  %v4015_v0 = vpop.f32.mrf.mxu0  ;;  %v4312_v49 = vpop.f32.mrf.mxu3 }
 0x537   : > { %v3878_v32 = vadd.f32 %v3864_v56, %v3799_v63 }
 0x538   : > { %v4099_v41 = vpop.f32.mrf.mxu1 }
 0x539   : > { %v4026_v15 = vadd.f32 %v4012_v40, %v3878_v32 }
 0x53b   : > { %v7249_v50 = vadd.f32 %v4094_v52, %v4026_v15 }
 0x53c   : > { %v3788_v14 = vpop.f32.mrf.mxu2 }
 0x53d   : > { %v3800_v31 = vadd.f32 %v3788_v14, %v7194_v37  ;;  %v4017_v5 = vpop.f32.mrf.mxu0  ;;  %v4314_v58 = vpop.f32.mrf.mxu3 }
 0x53f   : > { %v3879_v55 = vadd.f32 %v3867_v3, %v3800_v31 }
 0x541   : > { %v4027_v30 = vadd.f32 %v4015_v0, %v3879_v55 }
 0x543   : > { %v7251_v13 = vadd.f32 %v4097_v28, %v4027_v30 }
 0x544   : > { %v3790_v21 = vpop.f32.mrf.mxu2 }
 0x545   : > { %v4317_v37 = vpop.f32.mrf.mxu3 }
 0x54c   : > { %v4225_v61 = vpop.f32.mrf.mxu2 }
 0x54d   : > { %v4249_v38 = vadd.f32 %v4225_v61, %v7210_v17  ;;  %v4319_v17 = vpop.f32.mrf.mxu3 }
 0x54f   : > { %v4336_v16 = vadd.f32 %v4312_v49, %v4249_v38 }
 0x551   : > { %v4349_v12 = vadd.f32 %v7257_v27, %v4336_v16 }
 0x553   : > { %v5159_v25 = vmul.f32 -1.442695, %v4349_v12 }
 0x554   : > { %v4227_v46 = vpop.f32.mrf.mxu2 }
 0x555   : > { %5598 = vpow2.f32 %v5159_v25  ;;  %v4250_v6 = vadd.f32 %v4227_v46, %v7215_v51  ;;  %v4322_v34 = vpop.f32.mrf.mxu3 }
 0x557   : > { %v4337_v54 = vadd.f32 %v4314_v58, %v4250_v6 }
 0x559   : > { %v7262_v48 = vadd.f32 %v7257_v27, %v4337_v54 }
 0x55b   : > { %v5599_v39 = vpop.eup %5598  ;;  %v5160_v11 = vmul.f32 -1.442695, %v7262_v48 }
 0x55c   : > { %v4385_v36 = vadd.f32 1.0, %v5599_v39  ;;  %v4230_v24 = vpop.f32.mrf.mxu2 }
 0x55d   : > { %5600 = vpow2.f32 %v5160_v11  ;;  %v4251_v4 = vadd.f32 %v4230_v24, %v7221_v23  ;;  %v4324_v63 = vpop.f32.mrf.mxu3 }
 0x55e   : > { %5602 = vrcp.f32 %v4385_v36  ;;  %v4405_v26 = vand.u32 2147483648, %v4385_v36  ;;  %v4403_v10 = vand.u32 2147483647, %v4385_v36  ;;  %vm4399_vm2 = vweird.f32 %v4385_v36 }
 0x55f   : > { %v4338_v59 = vadd.f32 %v4317_v37, %v4251_v4 }
 0x560   : > { %v4406_v22 = vor.u32 1.1754944e-38, %v4405_v26  ;;  %vm4404_vm6 = vcmp.eq.f32.partialorder %v4403_v10, 8.507059e+37 }
 0x561   : > { %v7267_v33 = vadd.f32 %v7257_v27, %v4338_v59 }
 0x563   : > { %v5601_v18 = vpop.eup %5600  ;;  %v5161_v51 = vmul.f32 -1.442695, %v7267_v33 }
 0x564   : > { %v5603_v44 = vpop.eup %5602  ;;  %v4386_v19 = vadd.f32 1.0, %v5601_v18  ;;  %v4232_v53 = vpop.f32.mrf.mxu2 }
 0x565   : > { %v4395_v7 = vmul.f32 %v5603_v44, %v4385_v36  ;;  %5604 = vpow2.f32 %v5161_v51  ;;  %v4252_v20 = vadd.f32 %v4232_v53, %v7225_v57  ;;  %vm4400_vm1 = vweird.f32 %v5603_v44  ;;  %v4327_v54 = vpop.f32.mrf.mxu3 }
 0x566   : > { %5606 = vrcp.f32 %v4386_v19  ;;  %vm4401_vm12 = vmor %vm4399_vm2, %vm4400_vm1  ;;  %v4420_v1 = vand.u32 2147483648, %v4386_v19  ;;  %v4418_v41 = vand.u32 2147483647, %v4386_v19  ;;  %vm4414_vm8 = vweird.f32 %v4386_v19 }
 0x567   : > { %v4396_v29 = vsub.f32 1.0, %v4395_v7  ;;  %v4339_v23 = vadd.f32 %v4319_v17, %v4252_v20 }
 0x568   : > { %v4421_v55 = vor.u32 1.1754944e-38, %v4420_v1  ;;  %vm4419_vm10 = vcmp.eq.f32.partialorder %v4418_v41, 8.507059e+37 }
 0x569   : > { %v4397_v8 = vmul.f32 %v5603_v44, %v4396_v29  ;;  %v7272_v56 = vadd.f32 %v7257_v27, %v4339_v23 }
 0x56b   : > { %v5605_v43 = vpop.eup %5604  ;;  %v4398_v47 = vadd.f32 %v5603_v44, %v4397_v8  ;;  %v5162_v3 = vmul.f32 -1.442695, %v7272_v56 }
 0x56c   : > { %v5607_v52 = vpop.eup %5606  ;;  %v4387_v57 = vadd.f32 1.0, %v5605_v43  ;;  %v4235_v2 = vpop.f32.mrf.mxu2 }
 0x56d   : > { %v4402_v40 = vsel %vm4401_vm12, %v5603_v44, %v4398_v47  ;;  %v4410_v62 = vmul.f32 %v5607_v52, %v4386_v19  ;;  %5608 = vpow2.f32 %v5162_v3  ;;  %v4253_v0 = vadd.f32 %v4235_v2, %v7232_v45  ;;  %v4329_v8 = vpop.f32.mrf.mxu3 }
 0x56e   : > { %v4407_v28 = vsel %vm4404_vm6, %v4406_v22, %v4402_v40  ;;  %5610 = vrcp.f32 %v4387_v57  ;;  %vm4415_vm7 = vweird.f32 %v5607_v52  ;;  %v4433_v6 = vand.u32 2147483647, %v4387_v57 }
 0x56f   : > { %v4529_v42 = vmul.f32 %v4407_v28, %v4349_v12  ;;  %v4411_v35 = vsub.f32 1.0, %v4410_v62  ;;  %v4340_v14 = vadd.f32 %v4322_v34, %v4253_v0  ;;  %vm4416_vm9 = vmor %vm4414_vm8, %vm4415_vm7  ;;  %v4435_v12 = vand.u32 2147483648, %v4387_v57 }
 0x570   : > { %vm4429_vm13 = vweird.f32 %v4387_v57  ;;  %vm4434_vm15 = vcmp.eq.f32.partialorder %v4433_v6, 8.507059e+37 }
 0x571   : > { %4538 = vst.msk [vmem:[%s7279_s26] sm:$0xff] %vm1872_vm3, %v4529_v42  ;;  %v4412_v32 = vmul.f32 %v5607_v52, %v4411_v35  ;;  %v7285_v5 = vadd.f32 %v7257_v27, %v4340_v14  ;;  %v4436_v36 = vor.u32 1.1754944e-38, %v4435_v12 }
 0x573   : > { %v5609_v49 = vpop.eup %5608  ;;  %v4413_v31 = vadd.f32 %v5607_v52, %v4412_v32  ;;  %v5163_v61 = vmul.f32 -1.442695, %v7285_v5 }
 0x574   : > { %v5611_v15 = vpop.eup %5610  ;;  %v4388_v30 = vadd.f32 1.0, %v5609_v49  ;;  %v4237_v21 = vpop.f32.mrf.mxu2 }
 0x575   : > { %v4417_v45 = vsel %vm4416_vm9, %v5607_v52, %v4413_v31  ;;  %v4425_v58 = vmul.f32 %v5611_v15, %v4387_v57  ;;  %v4254_v25 = vadd.f32 %v4237_v21, %v7235_v60  ;;  %vm4430_vm11 = vweird.f32 %v5611_v15  ;;  %v4332_v32 = vpop.f32.mrf.mxu3 }
 0x576   : > { %v4422_v38 = vsel %vm4419_vm10, %v4421_v55, %v4417_v45  ;;  %5612 = vrcp.f32 %v4388_v30  ;;  %vm4431_vm14 = vmor %vm4429_vm13, %vm4430_vm11  ;;  %v4448_v34 = vand.u32 2147483647, %v4388_v30  ;;  %v4450_v20 = vand.u32 2147483648, %v4388_v30 }
 0x577   : > { %v4530_v16 = vmul.f32 %v4422_v38, %v7262_v48  ;;  %v4426_v37 = vsub.f32 1.0, %v4425_v58  ;;  %5614 = vpow2.f32 %v5163_v61  ;;  %v4341_v39 = vadd.f32 %v4324_v63, %v4254_v25 }
 0x578   : > { %vm4444_vm0 = vweird.f32 %v4388_v30  ;;  %vm4449_vm1 = vcmp.eq.f32.partialorder %v4448_v34, 8.507059e+37 }
 0x579   : > { %4539 = vst.msk [vmem:[%s7279_s26 + $0x8] sm:$0xff] %vm1872_vm3, %v4530_v16  ;;  %v4427_v46 = vmul.f32 %v5611_v15, %v4426_v37  ;;  %v7293_v48 = vadd.f32 %v7257_v27, %v4341_v39 }
 0x57b   : > { %v4428_v17 = vadd.f32 %v5611_v15, %v4427_v46  ;;  %v5164_v44 = vmul.f32 -1.442695, %v7293_v48 }
 0x57c   : > { %v5613_v11 = vpop.eup %5612  ;;  %v4240_v59 = vpop.f32.mrf.mxu2 }
 0x57d   : > { %v5615_v24 = vpop.eup %5614  ;;  %v4432_v4 = vsel %vm4431_vm14, %v5611_v15, %v4428_v17  ;;  %v4440_v60 = vmul.f32 %v5613_v11, %v4388_v30  ;;  %v4255_v19 = vadd.f32 %v4240_v59, %v7246_v9  ;;  %vm4445_vm4 = vweird.f32 %v5613_v11  ;;  %v4334_v16 = vpop.f32.mrf.mxu3 }
 0x57e   : > { %v4437_v18 = vsel %vm4434_vm15, %v4436_v36, %v4432_v4  ;;  %v4389_v51 = vadd.f32 1.0, %v5615_v24  ;;  %vm4446_vm5 = vmor %vm4444_vm0, %vm4445_vm4  ;;  %v4451_v9 = vor.u32 1.1754944e-38, %v4450_v20 }
 0x57f   : > { %v4531_v53 = vmul.f32 %v4437_v18, %v7267_v33  ;;  %v4441_v7 = vsub.f32 1.0, %v4440_v60  ;;  %v4342_v23 = vadd.f32 %v4327_v54, %v4255_v19 }
 0x580   : > { %5616 = vrcp.f32 %v4389_v51  ;;  %v4465_v35 = vand.u32 2147483648, %v4389_v51  ;;  %v4463_v0 = vand.u32 2147483647, %v4389_v51  ;;  %vm4459_vm12 = vweird.f32 %v4389_v51 }
 0x581   : > { %4540 = vst.msk [vmem:[%s7279_s26 + $0x10] sm:$0xff] %vm1872_vm3, %v4531_v53  ;;  %v4442_v29 = vmul.f32 %v5613_v11, %v4441_v7  ;;  %5618 = vpow2.f32 %v5164_v44  ;;  %v7301_v10 = vadd.f32 %v7257_v27, %v4342_v23 }
 0x582   : > { %v4466_v49 = vor.u32 1.1754944e-38, %v4465_v35  ;;  %vm4464_vm7 = vcmp.eq.f32.partialorder %v4463_v0, 8.507059e+37 }
 0x583   : > { %v4443_v26 = vadd.f32 %v5613_v11, %v4442_v29  ;;  %v5165_v43 = vmul.f32 -1.442695, %v7301_v10 }
 0x584   : > { %v4242_v47 = vpop.f32.mrf.mxu2 }
 0x585   : > { %v4447_v33 = vsel %vm4446_vm5, %v5613_v11, %v4443_v26  ;;  %v4256_v22 = vadd.f32 %v4242_v47, %v7249_v50  ;;  %5620 = vpow2.f32 %v5165_v43 }
 0x586   : > { %v5617_v3 = vpop.eup %5616  ;;  %v4452_v52 = vsel %vm4449_vm1, %v4451_v9, %v4447_v33 }
 0x587   : > { %v5619_v57 = vpop.eup %5618  ;;  %v4532_v2 = vmul.f32 %v4452_v52, %v7272_v56  ;;  %v4455_v40 = vmul.f32 %v5617_v3, %v4389_v51  ;;  %v4343_v28 = vadd.f32 %v4329_v8, %v4256_v22  ;;  %vm4460_vm2 = vweird.f32 %v5617_v3 }
 0x588   : > { %v4390_v62 = vadd.f32 1.0, %v5619_v57  ;;  %vm4461_vm6 = vmor %vm4459_vm12, %vm4460_vm2 }
 0x589   : > { %4541 = vst.msk [vmem:[%s7279_s26 + $0x18] sm:$0xff] %vm1872_vm3, %v4532_v2  ;;  %v4456_v42 = vsub.f32 1.0, %v4455_v40  ;;  %v7309_v1 = vadd.f32 %v7257_v27, %v4343_v28 }
 0x58a   : > { %5622 = vrcp.f32 %v4390_v62  ;;  %v4480_v37 = vand.u32 2147483648, %v4390_v62  ;;  %v4478_v46 = vand.u32 2147483647, %v4390_v62  ;;  %vm4474_vm9 = vweird.f32 %v4390_v62 }
 0x58b   : > { %v4457_v63 = vmul.f32 %v5617_v3, %v4456_v42  ;;  %v5621_v50 = vpop.eup %5620  ;;  %v5166_v56 = vmul.f32 -1.442695, %v7309_v1 }
 0x58c   : > { %v4245_v14 = vpop.f32.mrf.mxu2  ;;  %v4391_v31 = vadd.f32 1.0, %v5621_v50  ;;  %v4481_v36 = vor.u32 1.1754944e-38, %v4480_v37  ;;  %vm4479_vm11 = vcmp.eq.f32.partialorder %v4478_v46, 8.507059e+37 }
 0x58d   : > { %v4458_v41 = vadd.f32 %v5617_v3, %v4457_v63  ;;  %v4257_v15 = vadd.f32 %v4245_v14, %v7251_v13  ;;  %5624 = vpow2.f32 %v5166_v56 }
 0x58e   : > { %5626 = vrcp.f32 %v4391_v31  ;;  %v4495_v60 = vand.u32 2147483648, %v4391_v31  ;;  %v4493_v51 = vand.u32 2147483647, %v4391_v31  ;;  %vm4489_vm14 = vweird.f32 %v4391_v31 }
 0x58f   : > { %v4462_v55 = vsel %vm4461_vm6, %v5617_v3, %v4458_v41  ;;  %v4344_v61 = vadd.f32 %v4332_v32, %v4257_v15 }
 0x590   : > { %v5623_v30 = vpop.eup %5622  ;;  %v4467_v21 = vsel %vm4464_vm7, %v4466_v49, %v4462_v55  ;;  %v4496_v53 = vor.u32 1.1754944e-38, %v4495_v60  ;;  %vm4494_vm4 = vcmp.eq.f32.partialorder %v4493_v51, 8.507059e+37 }
 0x591   : > { %v4533_v45 = vmul.f32 %v4467_v21, %v7285_v5  ;;  %v4470_v58 = vmul.f32 %v5623_v30, %v4390_v62  ;;  %v7317_v12 = vadd.f32 %v7257_v27, %v4344_v61  ;;  %vm4475_vm8 = vweird.f32 %v5623_v30 }
 0x592   : > { %vm4476_vm10 = vmor %vm4474_vm9, %vm4475_vm8 }
 0x593   : > { %4542 = vst.msk [vmem:[%s7279_s26 + $0x20] sm:$0xff] %vm1872_vm3, %v4533_v45  ;;  %v4471_v38 = vsub.f32 1.0, %v4470_v58  ;;  %v5625_v25 = vpop.eup %5624  ;;  %v5167_v17 = vmul.f32 -1.442695, %v7317_v12 }
 0x594   : > { %v4247_v6 = vpop.f32.mrf.mxu2  ;;  %v5627_v54 = vpop.eup %5626  ;;  %v4392_v39 = vadd.f32 1.0, %v5625_v25 }
 0x595   : > { %v4472_v13 = vmul.f32 %v5623_v30, %v4471_v38  ;;  %v4485_v11 = vmul.f32 %v5627_v54, %v4391_v31  ;;  %vm4490_vm13 = vweird.f32 %v5627_v54 }
 0x596   : > { %5628 = vrcp.f32 %v4392_v39  ;;  %vm4491_vm15 = vmor %vm4489_vm14, %vm4490_vm13  ;;  %v4510_v8 = vand.u32 2147483648, %v4392_v39  ;;  %v4508_v33 = vand.u32 2147483647, %v4392_v39  ;;  %vm4504_vm5 = vweird.f32 %v4392_v39 }
 0x597   : > { %v4473_v5 = vadd.f32 %v5623_v30, %v4472_v13  ;;  %v4486_v27 = vsub.f32 1.0, %v4485_v11  ;;  %5630 = vpow2.f32 %v5167_v17 }
 0x598   : > { %v4511_v47 = vor.u32 1.1754944e-38, %v4510_v8  ;;  %vm4509_vm2 = vcmp.eq.f32.partialorder %v4508_v33, 8.507059e+37 }
 0x599   : > { %v4477_v24 = vsel %vm4476_vm10, %v5623_v30, %v4473_v5  ;;  %v4487_v18 = vmul.f32 %v5627_v54, %v4486_v27 }
 0x59a   : > { %v4482_v4 = vsel %vm4479_vm11, %v4481_v36, %v4477_v24 }
 0x59b   : > { %v4534_v59 = vmul.f32 %v4482_v4, %v7293_v48  ;;  %v4488_v44 = vadd.f32 %v5627_v54, %v4487_v18 }
 0x59c   : > { %v5629_v19 = vpop.eup %5628 }
 0x59d   : > { %4543 = vst.msk [vmem:[%s7279_s26 + $0x28] sm:$0xff] %vm1872_vm3, %v4534_v59  ;;  %v5631_v7 = vpop.eup %5630  ;;  %v4492_v34 = vsel %vm4491_vm15, %v5627_v54, %v4488_v44  ;;  %v4500_v20 = vmul.f32 %v5629_v19, %v4392_v39  ;;  %vm4505_vm0 = vweird.f32 %v5629_v19 }
 0x59e   : > { %v4497_v29 = vsel %vm4494_vm4, %v4496_v53, %v4492_v34  ;;  %v4393_v23 = vadd.f32 1.0, %v5631_v7  ;;  %vm4506_vm1 = vmor %vm4504_vm5, %vm4505_vm0 }
 0x59f   : > { %v4535_v26 = vmul.f32 %v4497_v29, %v7301_v10  ;;  %v4501_v48 = vsub.f32 1.0, %v4500_v20 }
 0x5a0   : > { %5632 = vrcp.f32 %v4393_v23  ;;  %v4525_v40 = vand.u32 2147483648, %v4393_v23  ;;  %v4523_v28 = vand.u32 2147483647, %v4393_v23  ;;  %vm4519_vm6 = vweird.f32 %v4393_v23 }
 0x5a1   : > { %4544 = vst.msk [vmem:[%s7279_s26 + $0x30] sm:$0xff] %vm1872_vm3, %v4535_v26  ;;  %v4502_v9 = vmul.f32 %v5629_v19, %v4501_v48 }
 0x5a2   : > { %v4526_v35 = vor.u32 1.1754944e-38, %v4525_v40  ;;  %vm4524_vm8 = vcmp.eq.f32.partialorder %v4523_v28, 8.507059e+37 }
 0x5a3   : > { %v4503_v43 = vadd.f32 %v5629_v19, %v4502_v9 }
 0x5a5   : > { %v4507_v3 = vsel %vm4506_vm1, %v5629_v19, %v4503_v43 }
 0x5a6   : > { %v5633_v52 = vpop.eup %5632  ;;  %v4512_v22 = vsel %vm4509_vm2, %v4511_v47, %v4507_v3 }
 0x5a7   : > { %v4536_v57 = vmul.f32 %v4512_v22, %v7309_v1  ;;  %v4515_v10 = vmul.f32 %v5633_v52, %v4393_v23  ;;  %vm4520_vm12 = vweird.f32 %v5633_v52 }
 0x5a8   : > { %vm4521_vm7 = vmor %vm4519_vm6, %vm4520_vm12 }
 0x5a9   : > { %4545 = vst.msk [vmem:[%s7279_s26 + $0x38] sm:$0xff] %vm1872_vm3, %v4536_v57  ;;  %v4516_v2 = vsub.f32 1.0, %v4515_v10 }
 0x5ab   : > { %v4517_v62 = vmul.f32 %v5633_v52, %v4516_v2 }
 0x5ad   : > { %v4518_v42 = vadd.f32 %v5633_v52, %v4517_v62 }
 0x5af   : > { %v4522_v63 = vsel %vm4521_vm7, %v5633_v52, %v4518_v42 }
 0x5b0   : > { %v4527_v0 = vsel %vm4524_vm8, %v4526_v35, %v4522_v63 }
 0x5b1   : > { %v4537_v32 = vmul.f32 %v4527_v0, %v7317_v12 }
 0x5b3   : > { %4546 = vst.msk [vmem:[%s7279_s26 + $0x40] sm:$0xff] %vm1872_vm3, %v4537_v32 }
 0x5b4 PF: > { %s26_s21 = sadd.s32 1, %s5648_s21  }
 0x5b5   : > { %p23_p4 = scmp.ge.s32.totalorder %s26_s21, 4  }
 0x5b7   :  { %25 = sbr.rel (!%p23_p4) target bundleno = 2 (0x2), region = 142 }

</bundles_post_ra>
